<compile_context>
chip_gen: v7x
topology: tpu7x:2x2x1
jax: 0.10.0
libtpu: 0.0.40
codegen_flags: <defaults>
</compile_context>

<pallas_src>
import numpy as np

import jax
import jax.numpy as jnp
from jax import lax
from jax.experimental import pallas as pl
from jax.experimental.pallas import tpu as pltpu


def _conv_out(n, k=3, s=2, p=1):
    return (n + 2 * p - k) // s + 1


def _round_up(x, m):
    return (x + m - 1) // m * m


def _tile_bytes(rows, cols, dtype):
    """Rough VMEM footprint of a (rows, cols) buffer after (sublane, lane) tiling."""
    item = jnp.dtype(dtype).itemsize
    sub = max(32 // item, 1)                      # 8 sublanes f32, 16 bf16
    return _round_up(max(int(rows), 1), sub) * _round_up(max(int(cols), 1), 128) * item


def _pick_vmem_limit(*, T2, T1o, W3, FW, Cout, E, F2):
    """Derive vmem_limit_bytes from the actual working set, capped by physical VMEM."""
    bf16, f32 = jnp.bfloat16, jnp.float32
    # double-buffered grid blocks (inputs + output)
    blocks = 2 * (_tile_bytes(T2, W3, bf16) + _tile_bytes(T1o, W3, bf16)
                  + _tile_bytes(T2, E, f32))
    # weights / biases (counted double-buffered to stay conservative)
    weights = 2 * (_tile_bytes(W3, FW, bf16) + _tile_bytes(1, FW, f32)
                   + 9 * _tile_bytes(Cout, Cout, bf16) + _tile_bytes(1, Cout, f32)
                   + F2 * _tile_bytes(Cout, E, bf16) + _tile_bytes(1, E, f32))
    # bf16 activation planes + f32 conv1 pre-activation + per-column accumulators
    scratch = (_tile_bytes(T2, FW, bf16) + _tile_bytes(T2 + 1, FW, bf16)
               + _tile_bytes(T2, FW, f32)
               + 2 * _tile_bytes(T2, Cout, f32) + 2 * _tile_bytes(T2, E, f32))
    need = int((blocks + weights + scratch) * 1.25) + (4 << 20)
    try:
        info = pltpu.get_tpu_info()
        cap = int(getattr(info, "vmem_capacity_bytes", 128 << 20))
    except Exception:
        cap = 64 << 20
    return max(32 << 20, min(need, int(cap * 0.9)))


# ---------------------------------------------------------------------------
# Fused kernel: conv1 (banded MXU matmul) -> bf16 planes -> per-column
# conv2 + bias + ReLU + Linear (MXU), one batch element per grid step.
# ---------------------------------------------------------------------------
def _make_fused_kernel(T2, T1o, F1, F2, Cout):
    FW = F1 * Cout
    n_tail = T2 - T1o           # 0 or 1 zero rows at the bottom of the odd plane

    def kernel(xe_ref, xo_ref, w1_ref, b1_ref, w2_ref, b2_ref, wl_ref, bl_ref,
               out_ref, ev_ref, od_ref):
        # ---------- conv1 + bias + ReLU ------------------------------------
        # One bf16 MXU matmul per time-parity group against the banded conv1
        # weight (taps + frequency unfold folded in); result layout is already
        # (time, f1*Cout), so each plane write is a single bulk store.
        pre_e = jnp.dot(xe_ref[0], w1_ref[...], preferred_element_type=jnp.float32)
        ev_ref[...] = jnp.maximum(pre_e + b1_ref[...], 0.0).astype(jnp.bfloat16)

        # Zero only the halo rows of the odd-t plane (conv2's time padding);
        # done every step because each megacore has its own scratch copy.
        od_ref[0:1, :] = jnp.zeros((1, FW), jnp.bfloat16)
        if n_tail > 0:
            od_ref[1 + T1o:T2 + 1, :] = jnp.zeros((n_tail, FW), jnp.bfloat16)
        if T1o > 0:
            pre_o = jnp.dot(xo_ref[0], w1_ref[...],
                            preferred_element_type=jnp.float32)
            od_ref[1:1 + T1o, :] = jnp.maximum(
                pre_o + b1_ref[...], 0.0).astype(jnp.bfloat16)

        # ---------- conv2 + bias + ReLU + Linear, fused per output column f2
        acc_out = None
        for f2 in range(F2):
            acc2 = None
            for kh in range(3):
                for kw in range(3):
                    f1 = 2 * f2 + kw - 1
                    if f1 < 0 or f1 >= F1:
                        continue                      # conv2 zero padding in freq
                    ls = slice(f1 * Cout, (f1 + 1) * Cout)
                    if kh == 1:
                        lhs = ev_ref[:, ls]           # y1[2*t2,     f1, :]
                    elif kh == 0:
                        lhs = od_ref[0:T2, ls]        # y1[2*t2 - 1, f1, :] (halo row 0)
                    else:
                        lhs = od_ref[1:T2 + 1, ls]    # y1[2*t2 + 1, f1, :] (halo tail)
                    term = jnp.dot(lhs, w2_ref[3 * kh + kw],
                                   preferred_element_type=jnp.float32)
                    acc2 = term if acc2 is None else acc2 + term
            y2 = jnp.maximum(acc2 + b2_ref[...], 0.0).astype(jnp.bfloat16)
            term = jnp.dot(y2, wl_ref[f2], preferred_element_type=jnp.float32)
            acc_out = term if acc_out is None else acc_out + term

        out_ref[0] = (acc_out + bl_ref[...]).astype(out_ref.dtype)

    return kernel


# ---------------------------------------------------------------------------
# Forward pass matching Conv2dSubsampler.forward
# ---------------------------------------------------------------------------
def conv2d_subsampler_forward(src_tokens, src_lengths, params):
    B, T_i, C = src_tokens.shape
    assert T_i >= 3, "need at least 3 input frames"
    C2 = C + 2
    W3 = 3 * C2
    T1, F1 = _conv_out(T_i), _conv_out(C)
    T2, F2 = _conv_out(T1), _conv_out(F1)
    T1e, T1o = (T1 + 1) // 2, T1 // 2            # T1e == T2 always
    Cout = params["w2"].shape[1]
    E = params["wl"].shape[2]
    FW = F1 * Cout
    assert params["w1_band"].shape == (W3, FW), \
        "params were prepared for a different feature dim / channel count"
    assert params["wl"].shape[0] == F2

    # Row-selected, kh-unfolded raw input: lane-dense (minor dim 3*(C+2)), ~3x the
    # raw spectrogram -- replaces the old 9-lane-padded host-side im2col taps.
    xp = jnp.pad(src_tokens, ((0, 0), (1, 1), (1, 1)))

    def row_sel(pt, n_rows):
        cols = [xp[:, 2 * pt + kh: 2 * pt + kh + 4 * (n_rows - 1) + 1: 4, :]
                for kh in range(3)]
        return jnp.concatenate(cols, axis=-1).astype(jnp.bfloat16)

    x_even = row_sel(0, T1e)                     # (B, T2,  3*(C+2))
    x_odd = row_sel(1, T1o)                      # (B, T1o, 3*(C+2))

    kernel = _make_fused_kernel(T2, T1o, F1, F2, Cout)
    vmem_limit = _pick_vmem_limit(T2=T2, T1o=T1o, W3=W3, FW=FW,
                                  Cout=Cout, E=E, F2=F2)

    out = pl.pallas_call(
        kernel,
        out_shape=jax.ShapeDtypeStruct((B, T2, E), jnp.float32),
        grid_spec=pltpu.PrefetchScalarGridSpec(
            num_scalar_prefetch=0,
            grid=(B,),
            in_specs=[
                pl.BlockSpec((1, T2, W3), lambda b: (b, 0, 0)),
                pl.BlockSpec((1, T1o, W3), lambda b: (b, 0, 0)),
                # weights / biases: constant index_map -> stay VMEM resident
                pl.BlockSpec((W3, FW), lambda b: (0, 0)),
                pl.BlockSpec((1, FW), lambda b: (0, 0)),
                pl.BlockSpec((9, Cout, Cout), lambda b: (0, 0, 0)),
                pl.BlockSpec((1, Cout), lambda b: (0, 0)),
                pl.BlockSpec((F2, Cout, E), lambda b: (0, 0, 0)),
                pl.BlockSpec((1, E), lambda b: (0, 0)),
            ],
            out_specs=pl.BlockSpec((1, T2, E), lambda b: (b, 0, 0)),
            scratch_shapes=[
                pltpu.VMEM((T2, FW), jnp.bfloat16),      # even-t1 conv1 output
                pltpu.VMEM((T2 + 1, FW), jnp.bfloat16),  # odd-t1 (+1-row zero halo)
            ],
        ),
        compiler_params=pltpu.CompilerParams(
            dimension_semantics=("parallel",),           # megacore split over batch
            vmem_limit_bytes=vmem_limit,
        ),
    )(x_even, x_odd,
      params["w1_band"], params["b1"], params["w2"], params["b2"],
      params["wl"], params["bl"])

    # (T_o, B, E) like the PyTorch module.  TODO(synk): if this HBM round trip
    # shows up in a profile, emit (T_o, B, E) directly from a time-tiled grid.
    out = jnp.transpose(out, (1, 0, 2))

    subsampling_factor = int(T_i * 1.0 / T2 + 0.5)
    len0 = jnp.ceil(src_lengths.astype(jnp.float32) / subsampling_factor).astype(jnp.int32)
    lengths = jnp.minimum(len0, jnp.full_like(len0, T2))
    return out, lengths


# ---------------------------------------------------------------------------
# Parameters: raw (PyTorch layout) + one-time kernel-layout preparation.
# ---------------------------------------------------------------------------
def init_params(key, input_feat_per_channel, conv_out_channels, encoder_embed_dim):
    # transformer_input_dim computed analytically (== infer_conv_output_dim).
    f_o = _conv_out(_conv_out(input_feat_per_channel))
    transformer_input_dim = conv_out_channels * f_o
    k1, k2, k3, k4, k5, k6 = jax.random.split(key, 6)
    s = 0.1
    return {
        "w1": s * jax.random.normal(k1, (conv_out_channels, 1, 3, 3), jnp.float32),
        "b1": s * jax.random.normal(k2, (conv_out_channels,), jnp.float32),
        "w2": s * jax.random.normal(k3, (conv_out_channels, conv_out_channels, 3, 3),
                                    jnp.float32),
        "b2": s * jax.random.normal(k4, (conv_out_channels,), jnp.float32),
        "w_out": s * jax.random.normal(k5, (encoder_embed_dim, transformer_input_dim),
                                       jnp.float32),
        "b_out": s * jax.random.normal(k6, (encoder_embed_dim,), jnp.float32),
    }


def prepare_kernel_params(raw, input_feat_per_channel):
    """One-time weight re-layout:
       conv1   -> banded (taps x frequency-unfold) matrix, bf16
       conv2   -> per-tap (Cin, Cout) matrices, bf16
       Linear  -> per-f2 (Cout, E) blocks with the channel-major flatten folded in.
       All matmuls run in bf16 with f32 accumulation (documented precision choice)."""
    C = input_feat_per_channel
    C2 = C + 2
    Cout = raw["w1"].shape[0]
    E = raw["w_out"].shape[0]
    F1 = _conv_out(C)
    F2 = _conv_out(F1)
    assert raw["w_out"].shape[1] == Cout * F2

    w1 = np.asarray(raw["w1"], np.float32).reshape(Cout, 3, 3)      # (Cout, kh, kw)
    band = np.zeros((3 * C2, F1 * Cout), np.float32)
    for kh in range(3):
        for kw in range(3):
            for f1 in range(F1):
                band[kh * C2 + 2 * f1 + kw, f1 * Cout:(f1 + 1) * Cout] = w1[:, kh, kw]

    b1_tiled = np.tile(np.asarray(raw["b1"], np.float32), F1).reshape(1, F1 * Cout)

    w2 = jnp.transpose(raw["w2"], (2, 3, 1, 0)).reshape(9, Cout, Cout).astype(jnp.bfloat16)
    wl = jnp.transpose(raw["w_out"].reshape(E, Cout, F2), (2, 1, 0)).astype(jnp.bfloat16)
    return {
        "w1_band": jnp.asarray(band, jnp.bfloat16),
        "b1": jnp.asarray(b1_tiled, jnp.float32),
        "w2": w2,
        "b2": raw["b2"].reshape(1, Cout).astype(jnp.float32),
        "wl": wl,
        "bl": raw["b_out"].reshape(1, E).astype(jnp.float32),
    }


# ---------------------------------------------------------------------------
# Pure-JAX reference (for the numerical self-check).
# ---------------------------------------------------------------------------
def _reference_forward(src_tokens, src_lengths, raw):
    B, T_i, C = src_tokens.shape
    dn = ("NCHW", "OIHW", "NCHW")
    x = src_tokens[:, None, :, :]
    y = lax.conv_general_dilated(x, raw["w1"], (2, 2), ((1, 1), (1, 1)),
                                 dimension_numbers=dn)
    y = jax.nn.relu(y + raw["b1"][None, :, None, None])
    y = lax.conv_general_dilated(y, raw["w2"], (2, 2), ((1, 1), (1, 1)),
                                 dimension_numbers=dn)
    y = jax.nn.relu(y + raw["b2"][None, :, None, None])
    Bo, Co, T_o, F_o = y.shape
    feat = jnp.transpose(y, (2, 0, 1, 3)).reshape(T_o, Bo, Co * F_o)
    out = feat @ raw["w_out"].T + raw["b_out"]
    sf = int(T_i * 1.0 / T_o + 0.5)
    l0 = jnp.ceil(src_lengths.astype(jnp.float32) / sf).astype(jnp.int32)
    lengths = jnp.minimum(l0, jnp.full_like(l0, T_o))
    return out, lengths


if __name__ == "__main__":
    def _run_case(name, B, T_i, C, conv_channels, embed_dim, seed):
        key = jax.random.PRNGKey(seed)
        pkey, xkey = jax.random.split(key)
        raw = init_params(pkey, C, conv_channels, embed_dim)
        prepared = prepare_kernel_params(raw, input_feat_per_channel=C)

        src_tokens = jax.random.normal(xkey, (B, T_i, C), jnp.float32)
        src_lengths = jnp.array([T_i, max(3, T_i - 5)], dtype=jnp.int32)[:B]

        fwd = jax.jit(conv2d_subsampler_forward)
        out, out_len = fwd(src_tokens, src_lengths, prepared)
        jax.block_until_ready((out, out_len))

        T_o = _conv_out(_conv_out(T_i))
        assert out.shape == (T_o, B, embed_dim), (name, out.shape)
        assert out_len.shape == (B,), (name, out_len.shape)

        # Numerical self-check against plain-JAX/XLA f32 (tolerance covers the
        # intentional bf16 MXU matmuls with f32 accumulation).
        ref_out, ref_len = _reference_forward(src_tokens, src_lengths, raw)
        err = float(np.max(np.abs(np.asarray(out) - np.asarray(ref_out))))
        assert np.allclose(np.asarray(out), np.asarray(ref_out),
                           rtol=2e-2, atol=2e-2), (name, err)
        assert np.array_equal(np.asarray(out_len), np.asarray(ref_len)), name

    # Even-parity shapes (T1, F1 even).
    _run_case("even", B=2, T_i=16, C=16, conv_channels=128, embed_dim=128, seed=0)
    # Odd-parity shapes (odd T_i, odd C -> T1, F1 odd): exercises the odd-plane
    # zero-halo tail row and the right-edge frequency-padding skip.
    _run_case("odd", B=2, T_i=13, C=13, conv_channels=128, embed_dim=128, seed=1)

    print("KERNEL_OK")
</pallas_src>

<mosaic_0001>
module attributes {stable_mosaic.version = 11 : i64} {
  func.func @kernel(%arg0: i32, %arg1: memref<1x4x54xbf16, #tpu.memory_space<vmem>>, %arg2: memref<1x4x54xbf16, #tpu.memory_space<vmem>>, %arg3: memref<54x1024xbf16, #tpu.memory_space<vmem>>, %arg4: memref<1x1024xf32, #tpu.memory_space<vmem>>, %arg5: memref<9x128x128xbf16, #tpu.memory_space<vmem>>, %arg6: memref<1x128xf32, #tpu.memory_space<vmem>>, %arg7: memref<4x128x128xbf16, #tpu.memory_space<vmem>>, %arg8: memref<1x128xf32, #tpu.memory_space<vmem>>, %arg9: memref<1x4x128xf32, #tpu.memory_space<vmem>>, %arg10: memref<4x1024xbf16, #tpu.memory_space<vmem>>, %arg11: memref<5x1024xbf16, #tpu.memory_space<vmem>>) attributes {dimension_semantics = [#tpu.dimension_semantics<parallel>], iteration_bounds = array<i64: 2>, scalar_prefetch = 0 : i64, scratch_operands = 2 : i64, tpu.core_type = #tpu.core_type<tc>, window_params = [{transform_indices = @transform_0, window_bounds = array<i64: 1, 4, 54>}, {transform_indices = @transform_1, window_bounds = array<i64: 1, 4, 54>}, {pipeline_mode = #tpu.pipeline_mode<synchronous>, transform_indices = @transform_2, window_bounds = array<i64: 54, 1024>}, {pipeline_mode = #tpu.pipeline_mode<synchronous>, transform_indices = @transform_3, window_bounds = array<i64: 1, 1024>}, {pipeline_mode = #tpu.pipeline_mode<synchronous>, transform_indices = @transform_4, window_bounds = array<i64: 9, 128, 128>}, {pipeline_mode = #tpu.pipeline_mode<synchronous>, transform_indices = @transform_5, window_bounds = array<i64: 1, 128>}, {pipeline_mode = #tpu.pipeline_mode<synchronous>, transform_indices = @transform_6, window_bounds = array<i64: 4, 128, 128>}, {pipeline_mode = #tpu.pipeline_mode<synchronous>, transform_indices = @transform_7, window_bounds = array<i64: 1, 128>}, {transform_indices = @transform_8, window_bounds = array<i64: 1, 4, 128>}]} {
    %c0 = arith.constant 0 : index
    %c0_0 = arith.constant 0 : index
    %c0_1 = arith.constant 0 : index
    %0 = vector.load %arg1[%c0, %c0_0, %c0_1] : memref<1x4x54xbf16, #tpu.memory_space<vmem>>, vector<1x4x54xbf16>
    %1 = vector.shape_cast %0 : vector<1x4x54xbf16> to vector<4x54xbf16>
    %c0_2 = arith.constant 0 : index
    %c0_3 = arith.constant 0 : index
    %2 = vector.load %arg3[%c0_2, %c0_3] : memref<54x1024xbf16, #tpu.memory_space<vmem>>, vector<54x1024xbf16>
    %cst = arith.constant dense<0.000000e+00> : vector<4x1024xf32>
    %3 = tpu.matmul %1, %2, %cst {dimension_numbers = #tpu.dot_dimension_numbers<[1], [0], [0], [1], [0, 0, 1, 1], [], []>} : vector<4x54xbf16>, vector<54x1024xbf16>, vector<4x1024xf32> -> vector<4x1024xf32>
    %c0_4 = arith.constant 0 : index
    %c0_5 = arith.constant 0 : index
    %4 = vector.load %arg4[%c0_4, %c0_5] : memref<1x1024xf32, #tpu.memory_space<vmem>>, vector<1x1024xf32>
    %5 = vector.broadcast %4 : vector<1x1024xf32> to vector<4x1024xf32>
    %6 = arith.addf %3, %5 : vector<4x1024xf32>
    %cst_6 = arith.constant 0.000000e+00 : f32
    %7 = vector.broadcast %cst_6 : f32 to vector<4x1024xf32>
    %8 = arith.maximumf %6, %7 : vector<4x1024xf32>
    %9 = arith.truncf %8 : vector<4x1024xf32> to vector<4x1024xbf16>
    %c0_7 = arith.constant 0 : index
    %c0_8 = arith.constant 0 : index
    %10 = vector.load %arg10[%c0_7, %c0_8] : memref<4x1024xbf16, #tpu.memory_space<vmem>>, vector<4x1024xbf16>
    tpu.vector_store %arg10[%c0_7, %c0_8], %9 {strides = array<i32>} : memref<4x1024xbf16, #tpu.memory_space<vmem>>, vector<4x1024xbf16>,
    %cst_9 = arith.constant 0.000000e+00 : bf16
    %11 = vector.broadcast %cst_9 : bf16 to vector<1x1024xbf16>
    %c0_10 = arith.constant 0 : index
    %c0_11 = arith.constant 0 : index
    %12 = vector.load %arg11[%c0_10, %c0_11] : memref<5x1024xbf16, #tpu.memory_space<vmem>>, vector<1x1024xbf16>
    tpu.vector_store %arg11[%c0_10, %c0_11], %11 {strides = array<i32>} : memref<5x1024xbf16, #tpu.memory_space<vmem>>, vector<1x1024xbf16>,
    %c0_12 = arith.constant 0 : index
    %c0_13 = arith.constant 0 : index
    %c0_14 = arith.constant 0 : index
    %13 = vector.load %arg2[%c0_12, %c0_13, %c0_14] : memref<1x4x54xbf16, #tpu.memory_space<vmem>>, vector<1x4x54xbf16>
    %14 = vector.shape_cast %13 : vector<1x4x54xbf16> to vector<4x54xbf16>
    %c0_15 = arith.constant 0 : index
    %c0_16 = arith.constant 0 : index
    %15 = vector.load %arg3[%c0_15, %c0_16] : memref<54x1024xbf16, #tpu.memory_space<vmem>>, vector<54x1024xbf16>
    %cst_17 = arith.constant dense<0.000000e+00> : vector<4x1024xf32>
    %16 = tpu.matmul %14, %15, %cst_17 {dimension_numbers = #tpu.dot_dimension_numbers<[1], [0], [0], [1], [0, 0, 1, 1], [], []>} : vector<4x54xbf16>, vector<54x1024xbf16>, vector<4x1024xf32> -> vector<4x1024xf32>
    %c0_18 = arith.constant 0 : index
    %c0_19 = arith.constant 0 : index
    %17 = vector.load %arg4[%c0_18, %c0_19] : memref<1x1024xf32, #tpu.memory_space<vmem>>, vector<1x1024xf32>
    %18 = vector.broadcast %17 : vector<1x1024xf32> to vector<4x1024xf32>
    %19 = arith.addf %16, %18 : vector<4x1024xf32>
    %cst_20 = arith.constant 0.000000e+00 : f32
    %20 = vector.broadcast %cst_20 : f32 to vector<4x1024xf32>
    %21 = arith.maximumf %19, %20 : vector<4x1024xf32>
    %22 = arith.truncf %21 : vector<4x1024xf32> to vector<4x1024xbf16>
    %c1 = arith.constant 1 : index
    %c0_21 = arith.constant 0 : index
    %23 = vector.load %arg11[%c1, %c0_21] : memref<5x1024xbf16, #tpu.memory_space<vmem>>, vector<4x1024xbf16>
    tpu.vector_store %arg11[%c1, %c0_21], %22 {strides = array<i32>} : memref<5x1024xbf16, #tpu.memory_space<vmem>>, vector<4x1024xbf16>,
    %c0_22 = arith.constant 0 : index
    %c0_23 = arith.constant 0 : index
    %24 = vector.load %arg11[%c0_22, %c0_23] : memref<5x1024xbf16, #tpu.memory_space<vmem>>, vector<4x128xbf16>
    %c1_24 = arith.constant 1 : index
    %c0_25 = arith.constant 0 : index
    %c0_26 = arith.constant 0 : index
    %25 = vector.load %arg5[%c1_24, %c0_25, %c0_26] : memref<9x128x128xbf16, #tpu.memory_space<vmem>>, vector<1x128x128xbf16>
    %26 = vector.shape_cast %25 : vector<1x128x128xbf16> to vector<128x128xbf16>
    %cst_27 = arith.constant dense<0.000000e+00> : vector<4x128xf32>
    %27 = tpu.matmul %24, %26, %cst_27 {dimension_numbers = #tpu.dot_dimension_numbers<[1], [0], [0], [1], [0, 0, 1, 1], [], []>} : vector<4x128xbf16>, vector<128x128xbf16>, vector<4x128xf32> -> vector<4x128xf32>
    %c0_28 = arith.constant 0 : index
    %c128 = arith.constant 128 : index
    %28 = vector.load %arg11[%c0_28, %c128] : memref<5x1024xbf16, #tpu.memory_space<vmem>>, vector<4x128xbf16>
    %c2 = arith.constant 2 : index
    %c0_29 = arith.constant 0 : index
    %c0_30 = arith.constant 0 : index
    %29 = vector.load %arg5[%c2, %c0_29, %c0_30] : memref<9x128x128xbf16, #tpu.memory_space<vmem>>, vector<1x128x128xbf16>
    %30 = vector.shape_cast %29 : vector<1x128x128xbf16> to vector<128x128xbf16>
    %cst_31 = arith.constant dense<0.000000e+00> : vector<4x128xf32>
    %31 = tpu.matmul %28, %30, %cst_31 {dimension_numbers = #tpu.dot_dimension_numbers<[1], [0], [0], [1], [0, 0, 1, 1], [], []>} : vector<4x128xbf16>, vector<128x128xbf16>, vector<4x128xf32> -> vector<4x128xf32>
    %32 = arith.addf %27, %31 : vector<4x128xf32>
    %c0_32 = arith.constant 0 : index
    %c0_33 = arith.constant 0 : index
    %33 = vector.load %arg10[%c0_32, %c0_33] : memref<4x1024xbf16, #tpu.memory_space<vmem>>, vector<4x128xbf16>
    %c4 = arith.constant 4 : index
    %c0_34 = arith.constant 0 : index
    %c0_35 = arith.constant 0 : index
    %34 = vector.load %arg5[%c4, %c0_34, %c0_35] : memref<9x128x128xbf16, #tpu.memory_space<vmem>>, vector<1x128x128xbf16>
    %35 = vector.shape_cast %34 : vector<1x128x128xbf16> to vector<128x128xbf16>
    %cst_36 = arith.constant dense<0.000000e+00> : vector<4x128xf32>
    %36 = tpu.matmul %33, %35, %cst_36 {dimension_numbers = #tpu.dot_dimension_numbers<[1], [0], [0], [1], [0, 0, 1, 1], [], []>} : vector<4x128xbf16>, vector<128x128xbf16>, vector<4x128xf32> -> vector<4x128xf32>
    %37 = arith.addf %32, %36 : vector<4x128xf32>
    %c0_37 = arith.constant 0 : index
    %c128_38 = arith.constant 128 : index
    %38 = vector.load %arg10[%c0_37, %c128_38] : memref<4x1024xbf16, #tpu.memory_space<vmem>>, vector<4x128xbf16>
    %c5 = arith.constant 5 : index
    %c0_39 = arith.constant 0 : index
    %c0_40 = arith.constant 0 : index
    %39 = vector.load %arg5[%c5, %c0_39, %c0_40] : memref<9x128x128xbf16, #tpu.memory_space<vmem>>, vector<1x128x128xbf16>
    %40 = vector.shape_cast %39 : vector<1x128x128xbf16> to vector<128x128xbf16>
    %cst_41 = arith.constant dense<0.000000e+00> : vector<4x128xf32>
    %41 = tpu.matmul %38, %40, %cst_41 {dimension_numbers = #tpu.dot_dimension_numbers<[1], [0], [0], [1], [0, 0, 1, 1], [], []>} : vector<4x128xbf16>, vector<128x128xbf16>, vector<4x128xf32> -> vector<4x128xf32>
    %42 = arith.addf %37, %41 : vector<4x128xf32>
    %c1_42 = arith.constant 1 : index
    %c0_43 = arith.constant 0 : index
    %43 = vector.load %arg11[%c1_42, %c0_43] : memref<5x1024xbf16, #tpu.memory_space<vmem>>, vector<4x128xbf16>
    %c7 = arith.constant 7 : index
    %c0_44 = arith.constant 0 : index
    %c0_45 = arith.constant 0 : index
    %44 = vector.load %arg5[%c7, %c0_44, %c0_45] : memref<9x128x128xbf16, #tpu.memory_space<vmem>>, vector<1x128x128xbf16>
    %45 = vector.shape_cast %44 : vector<1x128x128xbf16> to vector<128x128xbf16>
    %cst_46 = arith.constant dense<0.000000e+00> : vector<4x128xf32>
    %46 = tpu.matmul %43, %45, %cst_46 {dimension_numbers = #tpu.dot_dimension_numbers<[1], [0], [0], [1], [0, 0, 1, 1], [], []>} : vector<4x128xbf16>, vector<128x128xbf16>, vector<4x128xf32> -> vector<4x128xf32>
    %47 = arith.addf %42, %46 : vector<4x128xf32>
    %c1_47 = arith.constant 1 : index
    %c128_48 = arith.constant 128 : index
    %48 = vector.load %arg11[%c1_47, %c128_48] : memref<5x1024xbf16, #tpu.memory_space<vmem>>, vector<4x128xbf16>
    %c8 = arith.constant 8 : index
    %c0_49 = arith.constant 0 : index
    %c0_50 = arith.constant 0 : index
    %49 = vector.load %arg5[%c8, %c0_49, %c0_50] : memref<9x128x128xbf16, #tpu.memory_space<vmem>>, vector<1x128x128xbf16>
    %50 = vector.shape_cast %49 : vector<1x128x128xbf16> to vector<128x128xbf16>
    %cst_51 = arith.constant dense<0.000000e+00> : vector<4x128xf32>
    %51 = tpu.matmul %48, %50, %cst_51 {dimension_numbers = #tpu.dot_dimension_numbers<[1], [0], [0], [1], [0, 0, 1, 1], [], []>} : vector<4x128xbf16>, vector<128x128xbf16>, vector<4x128xf32> -> vector<4x128xf32>
    %52 = arith.addf %47, %51 : vector<4x128xf32>
    %c0_52 = arith.constant 0 : index
    %c0_53 = arith.constant 0 : index
    %53 = vector.load %arg6[%c0_52, %c0_53] : memref<1x128xf32, #tpu.memory_space<vmem>>, vector<1x128xf32>
    %54 = vector.broadcast %53 : vector<1x128xf32> to vector<4x128xf32>
    %55 = arith.addf %52, %54 : vector<4x128xf32>
    %cst_54 = arith.constant 0.000000e+00 : f32
    %56 = vector.broadcast %cst_54 : f32 to vector<4x128xf32>
    %57 = arith.maximumf %55, %56 : vector<4x128xf32>
    %58 = arith.truncf %57 : vector<4x128xf32> to vector<4x128xbf16>
    %c0_55 = arith.constant 0 : index
    %c0_56 = arith.constant 0 : index
    %c0_57 = arith.constant 0 : index
    %59 = vector.load %arg7[%c0_55, %c0_56, %c0_57] : memref<4x128x128xbf16, #tpu.memory_space<vmem>>, vector<1x128x128xbf16>
    %60 = vector.shape_cast %59 : vector<1x128x128xbf16> to vector<128x128xbf16>
    %cst_58 = arith.constant dense<0.000000e+00> : vector<4x128xf32>
    %61 = tpu.matmul %58, %60, %cst_58 {dimension_numbers = #tpu.dot_dimension_numbers<[1], [0], [0], [1], [0, 0, 1, 1], [], []>} : vector<4x128xbf16>, vector<128x128xbf16>, vector<4x128xf32> -> vector<4x128xf32>
    %c0_59 = arith.constant 0 : index
    %c128_60 = arith.constant 128 : index
    %62 = vector.load %arg11[%c0_59, %c128_60] : memref<5x1024xbf16, #tpu.memory_space<vmem>>, vector<4x128xbf16>
    %c0_61 = arith.constant 0 : index
    %c0_62 = arith.constant 0 : index
    %c0_63 = arith.constant 0 : index
    %63 = vector.load %arg5[%c0_61, %c0_62, %c0_63] : memref<9x128x128xbf16, #tpu.memory_space<vmem>>, vector<1x128x128xbf16>
    %64 = vector.shape_cast %63 : vector<1x128x128xbf16> to vector<128x128xbf16>
    %cst_64 = arith.constant dense<0.000000e+00> : vector<4x128xf32>
    %65 = tpu.matmul %62, %64, %cst_64 {dimension_numbers = #tpu.dot_dimension_numbers<[1], [0], [0], [1], [0, 0, 1, 1], [], []>} : vector<4x128xbf16>, vector<128x128xbf16>, vector<4x128xf32> -> vector<4x128xf32>
    %c0_65 = arith.constant 0 : index
    %c256 = arith.constant 256 : index
    %66 = vector.load %arg11[%c0_65, %c256] : memref<5x1024xbf16, #tpu.memory_space<vmem>>, vector<4x128xbf16>
    %c1_66 = arith.constant 1 : index
    %c0_67 = arith.constant 0 : index
    %c0_68 = arith.constant 0 : index
    %67 = vector.load %arg5[%c1_66, %c0_67, %c0_68] : memref<9x128x128xbf16, #tpu.memory_space<vmem>>, vector<1x128x128xbf16>
    %68 = vector.shape_cast %67 : vector<1x128x128xbf16> to vector<128x128xbf16>
    %cst_69 = arith.constant dense<0.000000e+00> : vector<4x128xf32>
    %69 = tpu.matmul %66, %68, %cst_69 {dimension_numbers = #tpu.dot_dimension_numbers<[1], [0], [0], [1], [0, 0, 1, 1], [], []>} : vector<4x128xbf16>, vector<128x128xbf16>, vector<4x128xf32> -> vector<4x128xf32>
    %70 = arith.addf %65, %69 : vector<4x128xf32>
    %c0_70 = arith.constant 0 : index
    %c384 = arith.constant 384 : index
    %71 = vector.load %arg11[%c0_70, %c384] : memref<5x1024xbf16, #tpu.memory_space<vmem>>, vector<4x128xbf16>
    %c2_71 = arith.constant 2 : index
    %c0_72 = arith.constant 0 : index
    %c0_73 = arith.constant 0 : index
    %72 = vector.load %arg5[%c2_71, %c0_72, %c0_73] : memref<9x128x128xbf16, #tpu.memory_space<vmem>>, vector<1x128x128xbf16>
    %73 = vector.shape_cast %72 : vector<1x128x128xbf16> to vector<128x128xbf16>
    %cst_74 = arith.constant dense<0.000000e+00> : vector<4x128xf32>
    %74 = tpu.matmul %71, %73, %cst_74 {dimension_numbers = #tpu.dot_dimension_numbers<[1], [0], [0], [1], [0, 0, 1, 1], [], []>} : vector<4x128xbf16>, vector<128x128xbf16>, vector<4x128xf32> -> vector<4x128xf32>
    %75 = arith.addf %70, %74 : vector<4x128xf32>
    %c0_75 = arith.constant 0 : index
    %c128_76 = arith.constant 128 : index
    %76 = vector.load %arg10[%c0_75, %c128_76] : memref<4x1024xbf16, #tpu.memory_space<vmem>>, vector<4x128xbf16>
    %c3 = arith.constant 3 : index
    %c0_77 = arith.constant 0 : index
    %c0_78 = arith.constant 0 : index
    %77 = vector.load %arg5[%c3, %c0_77, %c0_78] : memref<9x128x128xbf16, #tpu.memory_space<vmem>>, vector<1x128x128xbf16>
    %78 = vector.shape_cast %77 : vector<1x128x128xbf16> to vector<128x128xbf16>
    %cst_79 = arith.constant dense<0.000000e+00> : vector<4x128xf32>
    %79 = tpu.matmul %76, %78, %cst_79 {dimension_numbers = #tpu.dot_dimension_numbers<[1], [0], [0], [1], [0, 0, 1, 1], [], []>} : vector<4x128xbf16>, vector<128x128xbf16>, vector<4x128xf32> -> vector<4x128xf32>
    %80 = arith.addf %75, %79 : vector<4x128xf32>
    %c0_80 = arith.constant 0 : index
    %c256_81 = arith.constant 256 : index
    %81 = vector.load %arg10[%c0_80, %c256_81] : memref<4x1024xbf16, #tpu.memory_space<vmem>>, vector<4x128xbf16>
    %c4_82 = arith.constant 4 : index
    %c0_83 = arith.constant 0 : index
    %c0_84 = arith.constant 0 : index
    %82 = vector.load %arg5[%c4_82, %c0_83, %c0_84] : memref<9x128x128xbf16, #tpu.memory_space<vmem>>, vector<1x128x128xbf16>
    %83 = vector.shape_cast %82 : vector<1x128x128xbf16> to vector<128x128xbf16>
    %cst_85 = arith.constant dense<0.000000e+00> : vector<4x128xf32>
    %84 = tpu.matmul %81, %83, %cst_85 {dimension_numbers = #tpu.dot_dimension_numbers<[1], [0], [0], [1], [0, 0, 1, 1], [], []>} : vector<4x128xbf16>, vector<128x128xbf16>, vector<4x128xf32> -> vector<4x128xf32>
    %85 = arith.addf %80, %84 : vector<4x128xf32>
    %c0_86 = arith.constant 0 : index
    %c384_87 = arith.constant 384 : index
    %86 = vector.load %arg10[%c0_86, %c384_87] : memref<4x1024xbf16, #tpu.memory_space<vmem>>, vector<4x128xbf16>
    %c5_88 = arith.constant 5 : index
    %c0_89 = arith.constant 0 : index
    %c0_90 = arith.constant 0 : index
    %87 = vector.load %arg5[%c5_88, %c0_89, %c0_90] : memref<9x128x128xbf16, #tpu.memory_space<vmem>>, vector<1x128x128xbf16>
    %88 = vector.shape_cast %87 : vector<1x128x128xbf16> to vector<128x128xbf16>
    %cst_91 = arith.constant dense<0.000000e+00> : vector<4x128xf32>
    %89 = tpu.matmul %86, %88, %cst_91 {dimension_numbers = #tpu.dot_dimension_numbers<[1], [0], [0], [1], [0, 0, 1, 1], [], []>} : vector<4x128xbf16>, vector<128x128xbf16>, vector<4x128xf32> -> vector<4x128xf32>
    %90 = arith.addf %85, %89 : vector<4x128xf32>
    %c1_92 = arith.constant 1 : index
    %c128_93 = arith.constant 128 : index
    %91 = vector.load %arg11[%c1_92, %c128_93] : memref<5x1024xbf16, #tpu.memory_space<vmem>>, vector<4x128xbf16>
    %c6 = arith.constant 6 : index
    %c0_94 = arith.constant 0 : index
    %c0_95 = arith.constant 0 : index
    %92 = vector.load %arg5[%c6, %c0_94, %c0_95] : memref<9x128x128xbf16, #tpu.memory_space<vmem>>, vector<1x128x128xbf16>
    %93 = vector.shape_cast %92 : vector<1x128x128xbf16> to vector<128x128xbf16>
    %cst_96 = arith.constant dense<0.000000e+00> : vector<4x128xf32>
    %94 = tpu.matmul %91, %93, %cst_96 {dimension_numbers = #tpu.dot_dimension_numbers<[1], [0], [0], [1], [0, 0, 1, 1], [], []>} : vector<4x128xbf16>, vector<128x128xbf16>, vector<4x128xf32> -> vector<4x128xf32>
    %95 = arith.addf %90, %94 : vector<4x128xf32>
    %c1_97 = arith.constant 1 : index
    %c256_98 = arith.constant 256 : index
    %96 = vector.load %arg11[%c1_97, %c256_98] : memref<5x1024xbf16, #tpu.memory_space<vmem>>, vector<4x128xbf16>
    %c7_99 = arith.constant 7 : index
    %c0_100 = arith.constant 0 : index
    %c0_101 = arith.constant 0 : index
    %97 = vector.load %arg5[%c7_99, %c0_100, %c0_101] : memref<9x128x128xbf16, #tpu.memory_space<vmem>>, vector<1x128x128xbf16>
    %98 = vector.shape_cast %97 : vector<1x128x128xbf16> to vector<128x128xbf16>
    %cst_102 = arith.constant dense<0.000000e+00> : vector<4x128xf32>
    %99 = tpu.matmul %96, %98, %cst_102 {dimension_numbers = #tpu.dot_dimension_numbers<[1], [0], [0], [1], [0, 0, 1, 1], [], []>} : vector<4x128xbf16>, vector<128x128xbf16>, vector<4x128xf32> -> vector<4x128xf32>
    %100 = arith.addf %95, %99 : vector<4x128xf32>
    %c1_103 = arith.constant 1 : index
    %c384_104 = arith.constant 384 : index
    %101 = vector.load %arg11[%c1_103, %c384_104] : memref<5x1024xbf16, #tpu.memory_space<vmem>>, vector<4x128xbf16>
    %c8_105 = arith.constant 8 : index
    %c0_106 = arith.constant 0 : index
    %c0_107 = arith.constant 0 : index
    %102 = vector.load %arg5[%c8_105, %c0_106, %c0_107] : memref<9x128x128xbf16, #tpu.memory_space<vmem>>, vector<1x128x128xbf16>
    %103 = vector.shape_cast %102 : vector<1x128x128xbf16> to vector<128x128xbf16>
    %cst_108 = arith.constant dense<0.000000e+00> : vector<4x128xf32>
    %104 = tpu.matmul %101, %103, %cst_108 {dimension_numbers = #tpu.dot_dimension_numbers<[1], [0], [0], [1], [0, 0, 1, 1], [], []>} : vector<4x128xbf16>, vector<128x128xbf16>, vector<4x128xf32> -> vector<4x128xf32>
    %105 = arith.addf %100, %104 : vector<4x128xf32>
    %c0_109 = arith.constant 0 : index
    %c0_110 = arith.constant 0 : index
    %106 = vector.load %arg6[%c0_109, %c0_110] : memref<1x128xf32, #tpu.memory_space<vmem>>, vector<1x128xf32>
    %107 = vector.broadcast %106 : vector<1x128xf32> to vector<4x128xf32>
    %108 = arith.addf %105, %107 : vector<4x128xf32>
    %cst_111 = arith.constant 0.000000e+00 : f32
    %109 = vector.broadcast %cst_111 : f32 to vector<4x128xf32>
    %110 = arith.maximumf %108, %109 : vector<4x128xf32>
    %111 = arith.truncf %110 : vector<4x128xf32> to vector<4x128xbf16>
    %c1_112 = arith.constant 1 : index
    %c0_113 = arith.constant 0 : index
    %c0_114 = arith.constant 0 : index
    %112 = vector.load %arg7[%c1_112, %c0_113, %c0_114] : memref<4x128x128xbf16, #tpu.memory_space<vmem>>, vector<1x128x128xbf16>
    %113 = vector.shape_cast %112 : vector<1x128x128xbf16> to vector<128x128xbf16>
    %cst_115 = arith.constant dense<0.000000e+00> : vector<4x128xf32>
    %114 = tpu.matmul %111, %113, %cst_115 {dimension_numbers = #tpu.dot_dimension_numbers<[1], [0], [0], [1], [0, 0, 1, 1], [], []>} : vector<4x128xbf16>, vector<128x128xbf16>, vector<4x128xf32> -> vector<4x128xf32>
    %115 = arith.addf %61, %114 : vector<4x128xf32>
    %c0_116 = arith.constant 0 : index
    %c384_117 = arith.constant 384 : index
    %116 = vector.load %arg11[%c0_116, %c384_117] : memref<5x1024xbf16, #tpu.memory_space<vmem>>, vector<4x128xbf16>
    %c0_118 = arith.constant 0 : index
    %c0_119 = arith.constant 0 : index
    %c0_120 = arith.constant 0 : index
    %117 = vector.load %arg5[%c0_118, %c0_119, %c0_120] : memref<9x128x128xbf16, #tpu.memory_space<vmem>>, vector<1x128x128xbf16>
    %118 = vector.shape_cast %117 : vector<1x128x128xbf16> to vector<128x128xbf16>
    %cst_121 = arith.constant dense<0.000000e+00> : vector<4x128xf32>
    %119 = tpu.matmul %116, %118, %cst_121 {dimension_numbers = #tpu.dot_dimension_numbers<[1], [0], [0], [1], [0, 0, 1, 1], [], []>} : vector<4x128xbf16>, vector<128x128xbf16>, vector<4x128xf32> -> vector<4x128xf32>
    %c0_122 = arith.constant 0 : index
    %c512 = arith.constant 512 : index
    %120 = vector.load %arg11[%c0_122, %c512] : memref<5x1024xbf16, #tpu.memory_space<vmem>>, vector<4x128xbf16>
    %c1_123 = arith.constant 1 : index
    %c0_124 = arith.constant 0 : index
    %c0_125 = arith.constant 0 : index
    %121 = vector.load %arg5[%c1_123, %c0_124, %c0_125] : memref<9x128x128xbf16, #tpu.memory_space<vmem>>, vector<1x128x128xbf16>
    %122 = vector.shape_cast %121 : vector<1x128x128xbf16> to vector<128x128xbf16>
    %cst_126 = arith.constant dense<0.000000e+00> : vector<4x128xf32>
    %123 = tpu.matmul %120, %122, %cst_126 {dimension_numbers = #tpu.dot_dimension_numbers<[1], [0], [0], [1], [0, 0, 1, 1], [], []>} : vector<4x128xbf16>, vector<128x128xbf16>, vector<4x128xf32> -> vector<4x128xf32>
    %124 = arith.addf %119, %123 : vector<4x128xf32>
    %c0_127 = arith.constant 0 : index
    %c640 = arith.constant 640 : index
    %125 = vector.load %arg11[%c0_127, %c640] : memref<5x1024xbf16, #tpu.memory_space<vmem>>, vector<4x128xbf16>
    %c2_128 = arith.constant 2 : index
    %c0_129 = arith.constant 0 : index
    %c0_130 = arith.constant 0 : index
    %126 = vector.load %arg5[%c2_128, %c0_129, %c0_130] : memref<9x128x128xbf16, #tpu.memory_space<vmem>>, vector<1x128x128xbf16>
    %127 = vector.shape_cast %126 : vector<1x128x128xbf16> to vector<128x128xbf16>
    %cst_131 = arith.constant dense<0.000000e+00> : vector<4x128xf32>
    %128 = tpu.matmul %125, %127, %cst_131 {dimension_numbers = #tpu.dot_dimension_numbers<[1], [0], [0], [1], [0, 0, 1, 1], [], []>} : vector<4x128xbf16>, vector<128x128xbf16>, vector<4x128xf32> -> vector<4x128xf32>
    %129 = arith.addf %124, %128 : vector<4x128xf32>
    %c0_132 = arith.constant 0 : index
    %c384_133 = arith.constant 384 : index
    %130 = vector.load %arg10[%c0_132, %c384_133] : memref<4x1024xbf16, #tpu.memory_space<vmem>>, vector<4x128xbf16>
    %c3_134 = arith.constant 3 : index
    %c0_135 = arith.constant 0 : index
    %c0_136 = arith.constant 0 : index
    %131 = vector.load %arg5[%c3_134, %c0_135, %c0_136] : memref<9x128x128xbf16, #tpu.memory_space<vmem>>, vector<1x128x128xbf16>
    %132 = vector.shape_cast %131 : vector<1x128x128xbf16> to vector<128x128xbf16>
    %cst_137 = arith.constant dense<0.000000e+00> : vector<4x128xf32>
    %133 = tpu.matmul %130, %132, %cst_137 {dimension_numbers = #tpu.dot_dimension_numbers<[1], [0], [0], [1], [0, 0, 1, 1], [], []>} : vector<4x128xbf16>, vector<128x128xbf16>, vector<4x128xf32> -> vector<4x128xf32>
    %134 = arith.addf %129, %133 : vector<4x128xf32>
    %c0_138 = arith.constant 0 : index
    %c512_139 = arith.constant 512 : index
    %135 = vector.load %arg10[%c0_138, %c512_139] : memref<4x1024xbf16, #tpu.memory_space<vmem>>, vector<4x128xbf16>
    %c4_140 = arith.constant 4 : index
    %c0_141 = arith.constant 0 : index
    %c0_142 = arith.constant 0 : index
    %136 = vector.load %arg5[%c4_140, %c0_141, %c0_142] : memref<9x128x128xbf16, #tpu.memory_space<vmem>>, vector<1x128x128xbf16>
    %137 = vector.shape_cast %136 : vector<1x128x128xbf16> to vector<128x128xbf16>
    %cst_143 = arith.constant dense<0.000000e+00> : vector<4x128xf32>
    %138 = tpu.matmul %135, %137, %cst_143 {dimension_numbers = #tpu.dot_dimension_numbers<[1], [0], [0], [1], [0, 0, 1, 1], [], []>} : vector<4x128xbf16>, vector<128x128xbf16>, vector<4x128xf32> -> vector<4x128xf32>
    %139 = arith.addf %134, %138 : vector<4x128xf32>
    %c0_144 = arith.constant 0 : index
    %c640_145 = arith.constant 640 : index
    %140 = vector.load %arg10[%c0_144, %c640_145] : memref<4x1024xbf16, #tpu.memory_space<vmem>>, vector<4x128xbf16>
    %c5_146 = arith.constant 5 : index
    %c0_147 = arith.constant 0 : index
    %c0_148 = arith.constant 0 : index
    %141 = vector.load %arg5[%c5_146, %c0_147, %c0_148] : memref<9x128x128xbf16, #tpu.memory_space<vmem>>, vector<1x128x128xbf16>
    %142 = vector.shape_cast %141 : vector<1x128x128xbf16> to vector<128x128xbf16>
    %cst_149 = arith.constant dense<0.000000e+00> : vector<4x128xf32>
    %143 = tpu.matmul %140, %142, %cst_149 {dimension_numbers = #tpu.dot_dimension_numbers<[1], [0], [0], [1], [0, 0, 1, 1], [], []>} : vector<4x128xbf16>, vector<128x128xbf16>, vector<4x128xf32> -> vector<4x128xf32>
    %144 = arith.addf %139, %143 : vector<4x128xf32>
    %c1_150 = arith.constant 1 : index
    %c384_151 = arith.constant 384 : index
    %145 = vector.load %arg11[%c1_150, %c384_151] : memref<5x1024xbf16, #tpu.memory_space<vmem>>, vector<4x128xbf16>
    %c6_152 = arith.constant 6 : index
    %c0_153 = arith.constant 0 : index
    %c0_154 = arith.constant 0 : index
    %146 = vector.load %arg5[%c6_152, %c0_153, %c0_154] : memref<9x128x128xbf16, #tpu.memory_space<vmem>>, vector<1x128x128xbf16>
    %147 = vector.shape_cast %146 : vector<1x128x128xbf16> to vector<128x128xbf16>
    %cst_155 = arith.constant dense<0.000000e+00> : vector<4x128xf32>
    %148 = tpu.matmul %145, %147, %cst_155 {dimension_numbers = #tpu.dot_dimension_numbers<[1], [0], [0], [1], [0, 0, 1, 1], [], []>} : vector<4x128xbf16>, vector<128x128xbf16>, vector<4x128xf32> -> vector<4x128xf32>
    %149 = arith.addf %144, %148 : vector<4x128xf32>
    %c1_156 = arith.constant 1 : index
    %c512_157 = arith.constant 512 : index
    %150 = vector.load %arg11[%c1_156, %c512_157] : memref<5x1024xbf16, #tpu.memory_space<vmem>>, vector<4x128xbf16>
    %c7_158 = arith.constant 7 : index
    %c0_159 = arith.constant 0 : index
    %c0_160 = arith.constant 0 : index
    %151 = vector.load %arg5[%c7_158, %c0_159, %c0_160] : memref<9x128x128xbf16, #tpu.memory_space<vmem>>, vector<1x128x128xbf16>
    %152 = vector.shape_cast %151 : vector<1x128x128xbf16> to vector<128x128xbf16>
    %cst_161 = arith.constant dense<0.000000e+00> : vector<4x128xf32>
    %153 = tpu.matmul %150, %152, %cst_161 {dimension_numbers = #tpu.dot_dimension_numbers<[1], [0], [0], [1], [0, 0, 1, 1], [], []>} : vector<4x128xbf16>, vector<128x128xbf16>, vector<4x128xf32> -> vector<4x128xf32>
    %154 = arith.addf %149, %153 : vector<4x128xf32>
    %c1_162 = arith.constant 1 : index
    %c640_163 = arith.constant 640 : index
    %155 = vector.load %arg11[%c1_162, %c640_163] : memref<5x1024xbf16, #tpu.memory_space<vmem>>, vector<4x128xbf16>
    %c8_164 = arith.constant 8 : index
    %c0_165 = arith.constant 0 : index
    %c0_166 = arith.constant 0 : index
    %156 = vector.load %arg5[%c8_164, %c0_165, %c0_166] : memref<9x128x128xbf16, #tpu.memory_space<vmem>>, vector<1x128x128xbf16>
    %157 = vector.shape_cast %156 : vector<1x128x128xbf16> to vector<128x128xbf16>
    %cst_167 = arith.constant dense<0.000000e+00> : vector<4x128xf32>
    %158 = tpu.matmul %155, %157, %cst_167 {dimension_numbers = #tpu.dot_dimension_numbers<[1], [0], [0], [1], [0, 0, 1, 1], [], []>} : vector<4x128xbf16>, vector<128x128xbf16>, vector<4x128xf32> -> vector<4x128xf32>
    %159 = arith.addf %154, %158 : vector<4x128xf32>
    %c0_168 = arith.constant 0 : index
    %c0_169 = arith.constant 0 : index
    %160 = vector.load %arg6[%c0_168, %c0_169] : memref<1x128xf32, #tpu.memory_space<vmem>>, vector<1x128xf32>
    %161 = vector.broadcast %160 : vector<1x128xf32> to vector<4x128xf32>
    %162 = arith.addf %159, %161 : vector<4x128xf32>
    %cst_170 = arith.constant 0.000000e+00 : f32
    %163 = vector.broadcast %cst_170 : f32 to vector<4x128xf32>
    %164 = arith.maximumf %162, %163 : vector<4x128xf32>
    %165 = arith.truncf %164 : vector<4x128xf32> to vector<4x128xbf16>
    %c2_171 = arith.constant 2 : index
    %c0_172 = arith.constant 0 : index
    %c0_173 = arith.constant 0 : index
    %166 = vector.load %arg7[%c2_171, %c0_172, %c0_173] : memref<4x128x128xbf16, #tpu.memory_space<vmem>>, vector<1x128x128xbf16>
    %167 = vector.shape_cast %166 : vector<1x128x128xbf16> to vector<128x128xbf16>
    %cst_174 = arith.constant dense<0.000000e+00> : vector<4x128xf32>
    %168 = tpu.matmul %165, %167, %cst_174 {dimension_numbers = #tpu.dot_dimension_numbers<[1], [0], [0], [1], [0, 0, 1, 1], [], []>} : vector<4x128xbf16>, vector<128x128xbf16>, vector<4x128xf32> -> vector<4x128xf32>
    %169 = arith.addf %115, %168 : vector<4x128xf32>
    %c0_175 = arith.constant 0 : index
    %c640_176 = arith.constant 640 : index
    %170 = vector.load %arg11[%c0_175, %c640_176] : memref<5x1024xbf16, #tpu.memory_space<vmem>>, vector<4x128xbf16>
    %c0_177 = arith.constant 0 : index
    %c0_178 = arith.constant 0 : index
    %c0_179 = arith.constant 0 : index
    %171 = vector.load %arg5[%c0_177, %c0_178, %c0_179] : memref<9x128x128xbf16, #tpu.memory_space<vmem>>, vector<1x128x128xbf16>
    %172 = vector.shape_cast %171 : vector<1x128x128xbf16> to vector<128x128xbf16>
    %cst_180 = arith.constant dense<0.000000e+00> : vector<4x128xf32>
    %173 = tpu.matmul %170, %172, %cst_180 {dimension_numbers = #tpu.dot_dimension_numbers<[1], [0], [0], [1], [0, 0, 1, 1], [], []>} : vector<4x128xbf16>, vector<128x128xbf16>, vector<4x128xf32> -> vector<4x128xf32>
    %c0_181 = arith.constant 0 : index
    %c768 = arith.constant 768 : index
    %174 = vector.load %arg11[%c0_181, %c768] : memref<5x1024xbf16, #tpu.memory_space<vmem>>, vector<4x128xbf16>
    %c1_182 = arith.constant 1 : index
    %c0_183 = arith.constant 0 : index
    %c0_184 = arith.constant 0 : index
    %175 = vector.load %arg5[%c1_182, %c0_183, %c0_184] : memref<9x128x128xbf16, #tpu.memory_space<vmem>>, vector<1x128x128xbf16>
    %176 = vector.shape_cast %175 : vector<1x128x128xbf16> to vector<128x128xbf16>
    %cst_185 = arith.constant dense<0.000000e+00> : vector<4x128xf32>
    %177 = tpu.matmul %174, %176, %cst_185 {dimension_numbers = #tpu.dot_dimension_numbers<[1], [0], [0], [1], [0, 0, 1, 1], [], []>} : vector<4x128xbf16>, vector<128x128xbf16>, vector<4x128xf32> -> vector<4x128xf32>
    %178 = arith.addf %173, %177 : vector<4x128xf32>
    %c0_186 = arith.constant 0 : index
    %c896 = arith.constant 896 : index
    %179 = vector.load %arg11[%c0_186, %c896] : memref<5x1024xbf16, #tpu.memory_space<vmem>>, vector<4x128xbf16>
    %c2_187 = arith.constant 2 : index
    %c0_188 = arith.constant 0 : index
    %c0_189 = arith.constant 0 : index
    %180 = vector.load %arg5[%c2_187, %c0_188, %c0_189] : memref<9x128x128xbf16, #tpu.memory_space<vmem>>, vector<1x128x128xbf16>
    %181 = vector.shape_cast %180 : vector<1x128x128xbf16> to vector<128x128xbf16>
    %cst_190 = arith.constant dense<0.000000e+00> : vector<4x128xf32>
    %182 = tpu.matmul %179, %181, %cst_190 {dimension_numbers = #tpu.dot_dimension_numbers<[1], [0], [0], [1], [0, 0, 1, 1], [], []>} : vector<4x128xbf16>, vector<128x128xbf16>, vector<4x128xf32> -> vector<4x128xf32>
    %183 = arith.addf %178, %182 : vector<4x128xf32>
    %c0_191 = arith.constant 0 : index
    %c640_192 = arith.constant 640 : index
    %184 = vector.load %arg10[%c0_191, %c640_192] : memref<4x1024xbf16, #tpu.memory_space<vmem>>, vector<4x128xbf16>
    %c3_193 = arith.constant 3 : index
    %c0_194 = arith.constant 0 : index
    %c0_195 = arith.constant 0 : index
    %185 = vector.load %arg5[%c3_193, %c0_194, %c0_195] : memref<9x128x128xbf16, #tpu.memory_space<vmem>>, vector<1x128x128xbf16>
    %186 = vector.shape_cast %185 : vector<1x128x128xbf16> to vector<128x128xbf16>
    %cst_196 = arith.constant dense<0.000000e+00> : vector<4x128xf32>
    %187 = tpu.matmul %184, %186, %cst_196 {dimension_numbers = #tpu.dot_dimension_numbers<[1], [0], [0], [1], [0, 0, 1, 1], [], []>} : vector<4x128xbf16>, vector<128x128xbf16>, vector<4x128xf32> -> vector<4x128xf32>
    %188 = arith.addf %183, %187 : vector<4x128xf32>
    %c0_197 = arith.constant 0 : index
    %c768_198 = arith.constant 768 : index
    %189 = vector.load %arg10[%c0_197, %c768_198] : memref<4x1024xbf16, #tpu.memory_space<vmem>>, vector<4x128xbf16>
    %c4_199 = arith.constant 4 : index
    %c0_200 = arith.constant 0 : index
    %c0_201 = arith.constant 0 : index
    %190 = vector.load %arg5[%c4_199, %c0_200, %c0_201] : memref<9x128x128xbf16, #tpu.memory_space<vmem>>, vector<1x128x128xbf16>
    %191 = vector.shape_cast %190 : vector<1x128x128xbf16> to vector<128x128xbf16>
    %cst_202 = arith.constant dense<0.000000e+00> : vector<4x128xf32>
    %192 = tpu.matmul %189, %191, %cst_202 {dimension_numbers = #tpu.dot_dimension_numbers<[1], [0], [0], [1], [0, 0, 1, 1], [], []>} : vector<4x128xbf16>, vector<128x128xbf16>, vector<4x128xf32> -> vector<4x128xf32>
    %193 = arith.addf %188, %192 : vector<4x128xf32>
    %c0_203 = arith.constant 0 : index
    %c896_204 = arith.constant 896 : index
    %194 = vector.load %arg10[%c0_203, %c896_204] : memref<4x1024xbf16, #tpu.memory_space<vmem>>, vector<4x128xbf16>
    %c5_205 = arith.constant 5 : index
    %c0_206 = arith.constant 0 : index
    %c0_207 = arith.constant 0 : index
    %195 = vector.load %arg5[%c5_205, %c0_206, %c0_207] : memref<9x128x128xbf16, #tpu.memory_space<vmem>>, vector<1x128x128xbf16>
    %196 = vector.shape_cast %195 : vector<1x128x128xbf16> to vector<128x128xbf16>
    %cst_208 = arith.constant dense<0.000000e+00> : vector<4x128xf32>
    %197 = tpu.matmul %194, %196, %cst_208 {dimension_numbers = #tpu.dot_dimension_numbers<[1], [0], [0], [1], [0, 0, 1, 1], [], []>} : vector<4x128xbf16>, vector<128x128xbf16>, vector<4x128xf32> -> vector<4x128xf32>
    %198 = arith.addf %193, %197 : vector<4x128xf32>
    %c1_209 = arith.constant 1 : index
    %c640_210 = arith.constant 640 : index
    %199 = vector.load %arg11[%c1_209, %c640_210] : memref<5x1024xbf16, #tpu.memory_space<vmem>>, vector<4x128xbf16>
    %c6_211 = arith.constant 6 : index
    %c0_212 = arith.constant 0 : index
    %c0_213 = arith.constant 0 : index
    %200 = vector.load %arg5[%c6_211, %c0_212, %c0_213] : memref<9x128x128xbf16, #tpu.memory_space<vmem>>, vector<1x128x128xbf16>
    %201 = vector.shape_cast %200 : vector<1x128x128xbf16> to vector<128x128xbf16>
    %cst_214 = arith.constant dense<0.000000e+00> : vector<4x128xf32>
    %202 = tpu.matmul %199, %201, %cst_214 {dimension_numbers = #tpu.dot_dimension_numbers<[1], [0], [0], [1], [0, 0, 1, 1], [], []>} : vector<4x128xbf16>, vector<128x128xbf16>, vector<4x128xf32> -> vector<4x128xf32>
    %203 = arith.addf %198, %202 : vector<4x128xf32>
    %c1_215 = arith.constant 1 : index
    %c768_216 = arith.constant 768 : index
    %204 = vector.load %arg11[%c1_215, %c768_216] : memref<5x1024xbf16, #tpu.memory_space<vmem>>, vector<4x128xbf16>
    %c7_217 = arith.constant 7 : index
    %c0_218 = arith.constant 0 : index
    %c0_219 = arith.constant 0 : index
    %205 = vector.load %arg5[%c7_217, %c0_218, %c0_219] : memref<9x128x128xbf16, #tpu.memory_space<vmem>>, vector<1x128x128xbf16>
    %206 = vector.shape_cast %205 : vector<1x128x128xbf16> to vector<128x128xbf16>
    %cst_220 = arith.constant dense<0.000000e+00> : vector<4x128xf32>
    %207 = tpu.matmul %204, %206, %cst_220 {dimension_numbers = #tpu.dot_dimension_numbers<[1], [0], [0], [1], [0, 0, 1, 1], [], []>} : vector<4x128xbf16>, vector<128x128xbf16>, vector<4x128xf32> -> vector<4x128xf32>
    %208 = arith.addf %203, %207 : vector<4x128xf32>
    %c1_221 = arith.constant 1 : index
    %c896_222 = arith.constant 896 : index
    %209 = vector.load %arg11[%c1_221, %c896_222] : memref<5x1024xbf16, #tpu.memory_space<vmem>>, vector<4x128xbf16>
    %c8_223 = arith.constant 8 : index
    %c0_224 = arith.constant 0 : index
    %c0_225 = arith.constant 0 : index
    %210 = vector.load %arg5[%c8_223, %c0_224, %c0_225] : memref<9x128x128xbf16, #tpu.memory_space<vmem>>, vector<1x128x128xbf16>
    %211 = vector.shape_cast %210 : vector<1x128x128xbf16> to vector<128x128xbf16>
    %cst_226 = arith.constant dense<0.000000e+00> : vector<4x128xf32>
    %212 = tpu.matmul %209, %211, %cst_226 {dimension_numbers = #tpu.dot_dimension_numbers<[1], [0], [0], [1], [0, 0, 1, 1], [], []>} : vector<4x128xbf16>, vector<128x128xbf16>, vector<4x128xf32> -> vector<4x128xf32>
    %213 = arith.addf %208, %212 : vector<4x128xf32>
    %c0_227 = arith.constant 0 : index
    %c0_228 = arith.constant 0 : index
    %214 = vector.load %arg6[%c0_227, %c0_228] : memref<1x128xf32, #tpu.memory_space<vmem>>, vector<1x128xf32>
    %215 = vector.broadcast %214 : vector<1x128xf32> to vector<4x128xf32>
    %216 = arith.addf %213, %215 : vector<4x128xf32>
    %cst_229 = arith.constant 0.000000e+00 : f32
    %217 = vector.broadcast %cst_229 : f32 to vector<4x128xf32>
    %218 = arith.maximumf %216, %217 : vector<4x128xf32>
    %219 = arith.truncf %218 : vector<4x128xf32> to vector<4x128xbf16>
    %c3_230 = arith.constant 3 : index
    %c0_231 = arith.constant 0 : index
    %c0_232 = arith.constant 0 : index
    %220 = vector.load %arg7[%c3_230, %c0_231, %c0_232] : memref<4x128x128xbf16, #tpu.memory_space<vmem>>, vector<1x128x128xbf16>
    %221 = vector.shape_cast %220 : vector<1x128x128xbf16> to vector<128x128xbf16>
    %cst_233 = arith.constant dense<0.000000e+00> : vector<4x128xf32>
    %222 = tpu.matmul %219, %221, %cst_233 {dimension_numbers = #tpu.dot_dimension_numbers<[1], [0], [0], [1], [0, 0, 1, 1], [], []>} : vector<4x128xbf16>, vector<128x128xbf16>, vector<4x128xf32> -> vector<4x128xf32>
    %223 = arith.addf %169, %222 : vector<4x128xf32>
    %c0_234 = arith.constant 0 : index
    %c0_235 = arith.constant 0 : index
    %224 = vector.load %arg8[%c0_234, %c0_235] : memref<1x128xf32, #tpu.memory_space<vmem>>, vector<1x128xf32>
    %225 = vector.broadcast %224 : vector<1x128xf32> to vector<4x128xf32>
    %226 = arith.addf %223, %225 : vector<4x128xf32>
    %c0_236 = arith.constant 0 : index
    %c0_237 = arith.constant 0 : index
    %c0_238 = arith.constant 0 : index
    %227 = vector.load %arg9[%c0_236, %c0_237, %c0_238] : memref<1x4x128xf32, #tpu.memory_space<vmem>>, vector<1x4x128xf32>
    %228 = vector.shape_cast %227 : vector<1x4x128xf32> to vector<4x128xf32>
    %229 = vector.shape_cast %226 : vector<4x128xf32> to vector<1x4x128xf32>
    tpu.vector_store %arg9[%c0_236, %c0_237, %c0_238], %229 {strides = array<i32>} : memref<1x4x128xf32, #tpu.memory_space<vmem>>, vector<1x4x128xf32>,
    return
  }
  func.func @transform_0(%arg0: i32) -> (i32, i32, i32) {
    %c0_i32 = arith.constant 0 : i32
    %c0_i32_0 = arith.constant 0 : i32
    %c0_i32_1 = arith.constant 0 : i32
    return %arg0, %c0_i32, %c0_i32_0 : i32, i32, i32
  }
  func.func @transform_1(%arg0: i32) -> (i32, i32, i32) {
    %c0_i32 = arith.constant 0 : i32
    %c0_i32_0 = arith.constant 0 : i32
    %c0_i32_1 = arith.constant 0 : i32
    return %arg0, %c0_i32, %c0_i32_0 : i32, i32, i32
  }
  func.func @transform_2(%arg0: i32) -> (i32, i32) {
    %c0_i32 = arith.constant 0 : i32
    %c0_i32_0 = arith.constant 0 : i32
    %c0_i32_1 = arith.constant 0 : i32
    return %c0_i32, %c0_i32_0 : i32, i32
  }
  func.func @transform_3(%arg0: i32) -> (i32, i32) {
    %c0_i32 = arith.constant 0 : i32
    %c0_i32_0 = arith.constant 0 : i32
    %c0_i32_1 = arith.constant 0 : i32
    return %c0_i32, %c0_i32_0 : i32, i32
  }
  func.func @transform_4(%arg0: i32) -> (i32, i32, i32) {
    %c0_i32 = arith.constant 0 : i32
    %c0_i32_0 = arith.constant 0 : i32
    %c0_i32_1 = arith.constant 0 : i32
    %c0_i32_2 = arith.constant 0 : i32
    return %c0_i32, %c0_i32_0, %c0_i32_1 : i32, i32, i32
  }
  func.func @transform_5(%arg0: i32) -> (i32, i32) {
    %c0_i32 = arith.constant 0 : i32
    %c0_i32_0 = arith.constant 0 : i32
    %c0_i32_1 = arith.constant 0 : i32
    return %c0_i32, %c0_i32_0 : i32, i32
  }
  func.func @transform_6(%arg0: i32) -> (i32, i32, i32) {
    %c0_i32 = arith.constant 0 : i32
    %c0_i32_0 = arith.constant 0 : i32
    %c0_i32_1 = arith.constant 0 : i32
    %c0_i32_2 = arith.constant 0 : i32
    return %c0_i32, %c0_i32_0, %c0_i32_1 : i32, i32, i32
  }
  func.func @transform_7(%arg0: i32) -> (i32, i32) {
    %c0_i32 = arith.constant 0 : i32
    %c0_i32_0 = arith.constant 0 : i32
    %c0_i32_1 = arith.constant 0 : i32
    return %c0_i32, %c0_i32_0 : i32, i32
  }
  func.func @transform_8(%arg0: i32) -> (i32, i32, i32) {
    %c0_i32 = arith.constant 0 : i32
    %c0_i32_0 = arith.constant 0 : i32
    %c0_i32_1 = arith.constant 0 : i32
    return %arg0, %c0_i32, %c0_i32_0 : i32, i32, i32
  }
}

</mosaic_0001>

<bundles_post_ra>
// kernel: conv2d_subsampler_forward.1
= control target key start
LH: loop header
LB: loop body
LE: loop exit
PB: predicated region body
PF: predicated region fallthrough
CT: control target
= control target key end

     0   :  { %13 = vsyncpa [#allocation5], 0  ;;  %s6869_s0 = inlined_call_operand.vmem [shape: bf16[2,4,54], index: 0, kind: input, shape index: {}]   ;;  %s6870_s1 = inlined_call_operand.vmem [shape: bf16[2,4,54], index: 1, kind: input, shape index: {}]   ;;  %s6871_s2 = inlined_call_operand.hbm [shape: bf16[54,1024], index: 2, kind: input, shape index: {}]   ;;  %s6872_s3 = inlined_call_operand.vmem [shape: f32[1,1024], index: 3, kind: input, shape index: {}]   ;;  %s6873_s4 = inlined_call_operand.hbm [shape: bf16[9,128,128], index: 4, kind: input, shape index: {}]   ;;  %s6874_s5 = inlined_call_operand.vmem [shape: f32[1,128], index: 5, kind: input, shape index: {}]   ;;  %s6875_s6 = inlined_call_operand.hbm [shape: bf16[4,128,128], index: 6, kind: input, shape index: {}]   ;;  %s6876_s7 = inlined_call_operand.vmem [shape: f32[1,128], index: 7, kind: input, shape index: {}]   ;;  %s6877_s8 = inlined_call_operand.vmem [shape: f32[2,4,128], index: 8, kind: output, shape index: {}]  }
   0x1   :  { %14 = vsyncpa [#allocation7], 0  ;;  %s5614_s27 = smov 0  }
   0x2 LB: > { %s5558_s28 = smov [#allocation6]   ;;  %s5620_s30 = sadd.s32 4294967295, %s5556_s27   ;;  %s5556_s27 = sphi %s5614_s27, %s20_s27  }
   0x3   : > { %s257_s29 = sshll.u32 %s5558_s28, 4  ;;  %p3925_p0 = scmp.ge.s32.totalorder %s5556_s27, 1  ;;  %s5629_s29 = int_to_ptr.vmem [resolvable:$true] %s257_s29 }
   0x4   : > { %p229_p1 = scmp.lt.s32.totalorder %s5556_s27, 3  ;;  %p6878_p2 = scmp.eq.s32.totalorder %s5620_s30, 0 }
   0x5   : > { %s5559_s10 = smov [#allocation4]   ;;  %s5560_s13 = smov [#allocation8]  }
   0x6   : > { %p5625_p3 = pnand %p3925_p0, %p229_p1  ;;  %s241_s11 = sshll.u32 %s5559_s10, 4  ;;  %s5633_s11 = int_to_ptr.vmem [resolvable:$true] %s241_s11 }
   0x7   : > { %s5641_s14 = sshll.u32 %s5560_s13, 4  ;;  %s5458_s17 = scalar_lea.hbm %s6873_s4, 9216  ;;  %s274_s14 = int_to_ptr.vmem [resolvable:$true] %s5641_s14 }
   0x8   : > { %s6886_s9 = scalar_select %p5625_p3, 1, 0 }
   0x9   : > { %p5230_p4 = pneg %p5625_p3  ;;  %p5459_p6 = scmp.ne.s32.totalorder %s6873_s4, %s5458_s17 }
   0xa   : > { %p5465_p10 = scmp.lt.u32.totalorder %s5458_s17, %s6873_s4 }
   0xb   : > { %p5637_p5 = pnand %p6878_p2, %p5230_p4 }
   0xd   : > { %p5651_p7 = pneg %p5637_p5 }
   0xf   : > { %p5461_p8 = pnand %p5651_p7, %p5459_p6 }
  0x11   : > { %p5462_p9 = pneg %p5461_p8 }
  0x13   : > { %p5467_p11 = pnand %p5465_p10, %p5462_p9 }
  0x15   : > { %5470 = shalt.err (!%p5467_p11)
}
  0x16   : > { %s5471_s23 = scalar_lea.vmem %s5629_s29, 9216  ;;  %p5479_p1 = scmp.lt.s32.totalorder %s5629_s29, %s5629_s29 }
  0x17   : > { %p5472_p12 = scmp.ne.s32.totalorder %s5629_s29, %s5471_s23  ;;  %p5480_p4 = scmp.lt.s32.totalorder %s5471_s23, %s5471_s23 }
  0x19   : > { %p5474_p13 = pnand %p5472_p12, %p5651_p7  ;;  %p5481_p6 = por %p5480_p4, %p5479_p1 }
  0x1b   : > { %p5475_p0 = pneg %p5474_p13 }
  0x1d   : > { %p5482_p8 = pnand %p5481_p6, %p5475_p0 }
  0x1f   : > { %5485 = shalt.err (!%p5482_p8)
}
  0x20   : > { %s5561_s24 = smov 64   ;;  %s5562_s25 = smov 4  }
  0x21   : > { %5236 = dma.hbm_to_vmem [thread:$0]  (!%p5637_p5), %s6873_s4, 9216, %s5629_s29, [#allocation7], %s5561_s24, %s5561_s24, %s5562_s25  }
  0x22   : > { %s5486_s15 = scalar_lea.hbm %s6871_s2, 3584 }
  0x23   : > { %p5487_p9 = scmp.ne.s32.totalorder %s6871_s2, %s5486_s15  ;;  %p5493_p12 = scmp.lt.u32.totalorder %s5486_s15, %s6871_s2 }
  0x25   : > { %p5489_p10 = pnand %p5487_p9, %p5651_p7 }
  0x27   : > { %p5490_p11 = pneg %p5489_p10 }
  0x29   : > { %p5495_p13 = pnand %p5493_p12, %p5490_p11 }
  0x2b   : > { %5498 = shalt.err (!%p5495_p13)
}
  0x2c   : > { %s5499_s29 = scalar_lea.vmem %s5633_s11, 3584  ;;  %p5507_p6 = scmp.lt.s32.totalorder %s5633_s11, %s5633_s11 }
  0x2d   : > { %p5500_p0 = scmp.ne.s32.totalorder %s5633_s11, %s5499_s29  ;;  %p5508_p8 = scmp.lt.s32.totalorder %s5499_s29, %s5499_s29 }
  0x2f   : > { %p5502_p1 = pnand %p5500_p0, %p5651_p7  ;;  %p5509_p9 = por %p5508_p8, %p5507_p6 }
  0x31   : > { %p5503_p4 = pneg %p5502_p1 }
  0x33   : > { %p5510_p10 = pnand %p5509_p9, %p5503_p4 }
  0x35   : > { %5513 = shalt.err (!%p5510_p10)
}
  0x36   : > { %s5563_s21 = smov 512   ;;  %s5564_s22 = smov 32  }
  0x37   : > { %5233 = dma.hbm_to_vmem [thread:$0]  (!%p5637_p5), %s6871_s2, 3584, %s5633_s11, [#allocation5], %s5563_s21, %s5563_s21, %s5564_s22  }
  0x38   : > { %s5514_s13 = scalar_lea.hbm %s6875_s6, 4096 }
  0x39   : > { %p5515_p11 = scmp.ne.s32.totalorder %s6875_s6, %s5514_s13  ;;  %p5521_p0 = scmp.lt.u32.totalorder %s5514_s13, %s6875_s6 }
  0x3b   : > { %p5517_p12 = pnand %p5515_p11, %p5651_p7 }
  0x3d   : > { %p5518_p13 = pneg %p5517_p12 }
  0x3f   : > { %p5523_p1 = pnand %p5521_p0, %p5518_p13 }
  0x41   : > { %5526 = shalt.err (!%p5523_p1)
}
  0x42   : > { %s5527_s19 = scalar_lea.vmem %s274_s14, 4096  ;;  %p5535_p9 = scmp.lt.s32.totalorder %s274_s14, %s274_s14 }
  0x43   : > { %p5528_p4 = scmp.ne.s32.totalorder %s274_s14, %s5527_s19  ;;  %p5536_p10 = scmp.lt.s32.totalorder %s5527_s19, %s5527_s19 }
  0x45   : > { %p5530_p6 = pnand %p5528_p4, %p5651_p7  ;;  %p5537_p2 = por %p5536_p10, %p5535_p9 }
  0x47   : > { %p5531_p8 = pneg %p5530_p6 }
  0x49   : > { %p5538_p3 = pnand %p5537_p2, %p5531_p8 }
  0x4b   : > { %5541 = shalt.err (!%p5538_p3)
}
  0x4c   : > { %5239 = dma.hbm_to_vmem [thread:$0]  (!%p5637_p5), %s6875_s6, 4096, %s274_s14, [#allocation7], %s5561_s24, %s5561_s24, %s5562_s25  }
  0x4d   : > { %p6889_p11 = scmp.ne.s32.totalorder %s6886_s9, 0 }
  0x4f   : > { %306 = sbr.rel (%p6889_p11) target bundleno = 1753 (0x6d9), region = 52 }
  0x56   : > { %p6890_p7 = scmp.eq.s32.totalorder %s5620_s30, 0 }
  0x58   : > { %5547 = dma.done.wait (%p6890_p7), [#allocation5], 3584   ;;  %p6891_p12 = pmov %p6890_p7 }
  0x59   : > { %p6892_p2 = pmov %p6890_p7 }
  0x5a   : > { %5549 = vsyncadd (%p6891_p12), [#allocation5], 4294963712 }
  0x5b   : > { %5551 = dma.done.wait (%p6892_p2), [#allocation7], 13312   ;;  %p6893_p3 = pmov %p6892_p2 }
  0x5c   : > { %v5565_v0 = vmov 0   ;;  %v364_v1 = vld [vmem:[#allocation4] sm:$0xff]  ;;  %v366_v3 = vld [vmem:[#allocation4 + $0x10] sm:$0xff]  ;;  %p350_p5 = scmp.lt.s32.totalorder %s5620_s30, 1  ;;  %v5764_v27 = vld [vmem:[#allocation4 + $0xc8] sm:$0x77] }
  0x5d   : > { %5553 = vsyncadd (%p6893_p3), [#allocation7], 4294953984  ;;  %717 = vmatprep.mubr.bf16.mxu0 %v5565_v0  ;;  %635 = vmatprep.mubr.bf16.mxu1 %v5565_v0  ;;  %v368_v2 = vld [vmem:[#allocation4 + $0x20] sm:$0xff]  ;;  %v370_v5 = vld [vmem:[#allocation4 + $0x30] sm:$0xff]  ;;  %vm578_vm0 = vcmask 1042432   ;;  %v3963_v34 = vcombine.low %v5764_v27, %v5764_v27  ;;  %vm574_vm1 = vcmask 441344   ;;  %v3964_v63 = vcombine.high %v5764_v27, %v5764_v27 }
  0x5e   : > { %v5733_v4 = vcombine.high %v364_v1, %v368_v2  ;;  %v5735_v6 = vcombine.low %v364_v1, %v368_v2  ;;  %v372_v7 = vld [vmem:[#allocation4 + $0x40] sm:$0xff]  ;;  %v5737_v9 = vcombine.high %v366_v3, %v370_v5  ;;  %v5739_v10 = vcombine.low %v366_v3, %v370_v5  ;;  %v374_v12 = vld [vmem:[#allocation4 + $0x50] sm:$0xff]  ;;  %s6911_s30 = smov (!%p350_p5, %s5620_s30), 1  ;;  %v365_v32 = vld [vmem:[#allocation4 + $0x8] sm:$0xff] }
  0x5f   : > { %v376_v8 = vld [vmem:[#allocation4 + $0x60] sm:$0xff]  ;;  %v378_v13 = vld [vmem:[#allocation4 + $0x70] sm:$0xff]  ;;  %s3934_s9 = sshll.u32 %s6911_s30, 1  ;;  %v369_v33 = vld [vmem:[#allocation4 + $0x28] sm:$0xff]  ;;  %v586_v42 = vsel %vm578_vm0, %v3963_v34, 0  ;;  %vm829_vm2 = vcmask 1040384  }
  0x60   : > { %v5741_v11 = vcombine.high %v372_v7, %v376_v8  ;;  %v380_v14 = vld [vmem:[#allocation4 + $0x80] sm:$0xff]  ;;  %603 = vmatprep.subr.bf16.mxu1 %v5733_v4  ;;  %v5744_v15 = vcombine.high %v374_v12, %v378_v13  ;;  %v382_v17 = vld [vmem:[#allocation4 + $0x90] sm:$0xff]  ;;  %685 = vmatprep.subr.bf16.mxu0 %v5737_v9  ;;  %v5748_v19 = vcombine.low %v372_v7, %v376_v8  ;;  %v5781_v37 = vld [vmem:[#allocation4 + $0xd8] sm:$0x77]  ;;  %s353_s20 = scalar_lea.vmem %s6869_s0, %s3934_s9  ;;  %s357_s21 = scalar_lea.vmem %s6870_s1, %s3934_s9  ;;  %vm830_vm3 = vsmask.f32 256 }
  0x61   : > { %v384_v16 = vld [vmem:[#allocation4 + $0xa0] sm:$0xff]  ;;  %v386_v18 = vld [vmem:[#allocation4 + $0xb0] sm:$0xff]  ;;  %604 = vmatpush1.bf16.msra.mxu1 %v5735_v6  ;;  %686 = vmatpush1.bf16.msra.mxu0 %v5739_v10  ;;  %v5757_v22 = vcombine.low %v374_v12, %v378_v13  ;;  %v5783_v38 = vld [vmem:[#allocation4 + $0xc8] sm:$0x77]  ;;  %v3967_v45 = vcombine.low %v5781_v37, %v5781_v37  ;;  %v5802_v47 = vcombine.high %v365_v32, %v369_v33  ;;  %vm832_vm4 = vcmask 1044484   ;;  %s3936_s15 = sshll.u32 %s6911_s30, 2 }
  0x62   : > { %v388_v20 = vld [vmem:[#allocation4 + $0xc0] sm:$0x77]  ;;  %v390_v21 = vld [vmem:[#allocation4 + $0xd0] sm:$0x77]  ;;  %605 = vmatprep.subr.bf16.mxu1 %v5741_v11  ;;  %v5759_v23 = vcombine.high %v380_v14, %v384_v16  ;;  %687 = vmatprep.subr.bf16.mxu0 %v5744_v15  ;;  %v5762_v24 = vcombine.high %v382_v17, %v386_v18  ;;  %v5769_v29 = vcombine.low %v380_v14, %v384_v16  ;;  %v373_v43 = vld [vmem:[#allocation4 + $0x48] sm:$0xff]  ;;  %vm5567_vm9 = vmmov 0   ;;  %s361_s11 = scalar_lea.vmem %s6877_s8, %s3936_s15 }
  0x63   : > { %v3961_v25 = vcombine.low %v388_v20, %v388_v20  ;;  %v3965_v26 = vcombine.low %v390_v21, %v390_v21  ;;  %v5766_v28 = vld [vmem:[#allocation4 + $0xc0] sm:$0x77]  ;;  %v5774_v30 = vcombine.low %v382_v17, %v386_v18  ;;  %v3962_v31 = vcombine.high %v388_v20, %v388_v20  ;;  %v5785_v39 = vld [vmem:[#allocation4 + $0xd0] sm:$0x77]  ;;  %v377_v44 = vld [vmem:[#allocation4 + $0x68] sm:$0xff] }
  0x64   : > { %v3966_v35 = vcombine.high %v390_v21, %v390_v21  ;;  %v4005_v36 = vcombine.low %v5766_v28, %v5766_v28  ;;  %v4007_v46 = vcombine.low %v5783_v38, %v5783_v38  ;;  %v4009_v48 = vcombine.low %v5785_v39, %v5785_v39  ;;  %v5807_v49 = vld [vmem:[%s353_s20] sm:$0x3]  ;;  %v381_v55 = vld [vmem:[#allocation4 + $0x88] sm:$0xff]  ;;  %v367_v61 = vld [vmem:[#allocation4 + $0x18] sm:$0xff] }
  0x65   : > { %606 = vmatpush1.bf16.msra.mxu1 %v5748_v19  ;;  %688 = vmatpush1.bf16.msra.mxu0 %v5757_v22  ;;  %v580_v40 = vsel %vm578_vm0, %v3961_v25, 0  ;;  %v592_v41 = vsel %vm578_vm0, %v3965_v26, 0  ;;  %v5811_v51 = vsel %vm578_vm0, %v3967_v45, 0  ;;  %v5819_v54 = vcombine.low %v365_v32, %v369_v33  ;;  %v385_v56 = vld [vmem:[#allocation4 + $0xa8] sm:$0xff]  ;;  %v371_v62 = vld [vmem:[#allocation4 + $0x38] sm:$0xff]  ;;  %v5888_v20 = vld [vmem:[#allocation6 + $0x80] sm:$0xff]  }
  0x66   : > { %607 = vmatprep.subr.bf16.mxu1 %v5759_v23  ;;  %689 = vmatprep.subr.bf16.mxu0 %v5762_v24  ;;  %v1063_v50 = vsel %vm578_vm0, %v4005_v36, 0  ;;  %v5814_v52 = vsel %vm578_vm0, %v4007_v46, 0  ;;  %v5817_v53 = vsel %vm578_vm0, %v4009_v48, 0  ;;  %v5822_v57 = vcombine.high %v373_v43, %v377_v44  ;;  %v375_v2 = vld [vmem:[#allocation4 + $0x58] sm:$0xff]  ;;  %v5849_v5 = vld [vmem:[%s357_s21] sm:$0x3]  ;;  %vm831_vm6 = vmand %vm829_vm2, %vm830_vm3 }
  0x67   : > { %v3947_v58 = vcombine.low %v373_v43, %v377_v44  ;;  %v3956_v59 = vcombine.high %v381_v55, %v385_v56  ;;  %v3955_v60 = vcombine.low %v381_v55, %v385_v56  ;;  %v4006_v1 = vcombine.high %v5766_v28, %v5766_v28  ;;  %v379_v3 = vld [vmem:[#allocation4 + $0x78] sm:$0xff]  ;;  %v5890_v21 = vld [vmem:[#allocation6 + $0x40] sm:$0xff]   ;;  %v5909_v25 = vld [vmem:[#allocation6 + $0x50] sm:$0xff]  }
  0x68   : > { %v383_v7 = vld [vmem:[#allocation4 + $0x98] sm:$0xff]  ;;  %v3951_v12 = vcombine.low %v375_v2, %v379_v3  ;;  %v3968_v14 = vcombine.high %v5781_v37, %v5781_v37  ;;  %v4010_v16 = vcombine.high %v5785_v39, %v5785_v39  ;;  %vm833_vm5 = vsmask.f32 4352  ;;  %v836_v28 = vld [vmem:[#allocation3] sm:$0x11]  ;;  %v5938_v33 = vld [vmem:[#allocation6 + $0xa8] sm:$0xff]  }
  0x69   : > { %608 = vmatpush1.bf16.msra.mxu1 %v5769_v29  ;;  %690 = vmatpush1.bf16.msra.mxu0 %v5774_v30  ;;  %v387_v8 = vld [vmem:[#allocation4 + $0xb8] sm:$0xff]  ;;  %vm834_vm7 = vmand %vm832_vm4, %vm833_vm5  ;;  %v5940_v34 = vld [vmem:[#allocation6 + $0x68] sm:$0xff]   ;;  %vm1319_vm10 = vsmask.f32 2306  ;;  %vm1321_vm11 = vcmask 1046532  }
  0x6a   : > { %3969 = vmatprep.subr.msk.bf16.mxu1 %vm578_vm0, %v3962_v31  ;;  %3973 = vmatprep.subr.msk.bf16.mxu0 %vm578_vm0, %v3966_v35  ;;  %v3960_v13 = vcombine.high %v383_v7, %v387_v8  ;;  %v5916_v26 = vld [vmem:[#allocation6 + $0x98] sm:$0xff]   ;;  %vm5923_vm8 = vmor %vm834_vm7, %vm831_vm6  ;;  %v5930_v31 = vld [vmem:[#allocation6 + $0x60] sm:$0xff]   ;;  %vm1322_vm12 = vsmask.f32 6418 }
  0x6b   : > { %v5918_v27 = vld [vmem:[#allocation6 + $0x58] sm:$0xff]   ;;  %v837_v32 = vsel %vm5923_vm8, 0, %v836_v28  ;;  %v5946_v35 = vld [vmem:[#allocation6 + $0xb0] sm:$0xff]   ;;  %v839_v39 = vld [vmem:[#allocation3 + $0x8] sm:$0x11] }
  0x6c   : > { %838 = vst [vmem:[#allocation3] sm:$0x11] %v837_v32  ;;  %v5948_v36 = vld [vmem:[#allocation6 + $0x70] sm:$0xff]   ;;  %v5954_v37 = vld [vmem:[#allocation6 + $0xb8] sm:$0xff]   ;;  %vm1320_vm13 = vmand %vm578_vm0, %vm1319_vm10 }
  0x6d   : > { %610 = vmatpush1.bf16.msra.mxu1 %v580_v40  ;;  %692 = vmatpush1.bf16.msra.mxu0 %v592_v41  ;;  %v840_v40 = vsel %vm5923_vm8, 0, %v839_v39  ;;  %v394_v41 = vlaneseq  ;;  %v5974_v44 = vld [vmem:[%s6872_s3] sm:$0xff]  ;;  %vm1323_vm14 = vmand %vm1321_vm11, %vm1322_vm12 }
  0x6e   : > { %644 = vmatprep.subr.bf16.mxu1 %v5802_v47  ;;  %1086 = vmatprep.subr.bf16.mxu0 %v5733_v4  ;;  %v3944_v4 = vcombine.high %v367_v61, %v371_v62  ;;  %841 = vst [vmem:[#allocation3 + $0x8] sm:$0x11] %v840_v40  ;;  %vm6005_vm15 = vmor %vm1323_vm14, %vm1320_vm13 }
  0x70   : > { %3970 = vmatmul.mubr.msk.bf16.vlgmr.msra.gmra.mrb[0].mxu1 %vm574_vm1, %v5807_v49  ;;  %3974 = vmatmul.mubr.msk.bf16.vlgmr.msra.gmra.mrb[0].mxu0 %vm574_vm1, %v5807_v49 }
  0x71   : > { %645 = vmatpush1.bf16.msra.mxu1 %v5819_v54  ;;  %1087 = vmatpush1.bf16.msra.mxu0 %v5735_v6  ;;  %v3943_v6 = vcombine.low %v367_v61, %v371_v62 }
  0x72   : > { %646 = vmatprep.subr.bf16.mxu1 %v5822_v57  ;;  %1088 = vmatprep.subr.bf16.mxu0 %v5741_v11  ;;  %v3952_v11 = vcombine.high %v375_v2, %v379_v3 }
  0x73   : > { %1118 = vmatprep.mubr.bf16.mxu0 %v5565_v0  ;;  %676 = vmatprep.mubr.bf16.mxu1 %v5565_v0 }
  0x75   : > { %647 = vmatpush1.bf16.msra.mxu1 %v3947_v58  ;;  %1089 = vmatpush1.bf16.msra.mxu0 %v5748_v19 }
  0x76   : > { %648 = vmatprep.subr.bf16.mxu1 %v3956_v59  ;;  %1090 = vmatprep.subr.bf16.mxu0 %v5759_v23  ;;  %v5901_v23 = vld [vmem:[#allocation6 + $0x48] sm:$0xff]  }
  0x79   : > { %649 = vmatpush1.bf16.msra.mxu1 %v3955_v60  ;;  %1091 = vmatpush1.bf16.msra.mxu0 %v5769_v29 }
  0x7a   : > { %3971 = vmatprep.subr.msk.bf16.mxu1 %vm578_vm0, %v3964_v63  ;;  %4013 = vmatprep.subr.msk.bf16.mxu0 %vm578_vm0, %v4006_v1 }
  0x7d   : > { %651 = vmatpush1.bf16.msra.mxu1 %v586_v42  ;;  %1093 = vmatpush1.bf16.msra.mxu0 %v1063_v50  ;;  %v5968_v42 = vshrl.u32 %v394_v41, 7 }
  0x7e   : > { %726 = vmatprep.subr.bf16.mxu1 %v3944_v4  ;;  %1168 = vmatprep.subr.bf16.mxu0 %v5737_v9  ;;  %v3959_v9 = vcombine.low %v383_v7, %v387_v8 }
  0x7f   : > { %v412_v43 = vsub.s32 4, %v5968_v42  ;;  %v416_v45 = vsub.s32 5, %v5968_v42  ;;  %v396_v46 = vsub.s32 0, %v5968_v42  ;;  %v404_v7 = vsub.s32 2, %v5968_v42 }
  0x80   : > { %3972 = vmatmul.mubr.msk.bf16.vlgmr.msra.gmra.mrb[4].mxu1 %vm574_vm1, %v5807_v49  ;;  %4014 = vmatmul.mubr.msk.bf16.vlgmr.msra.gmra.mrb[4].mxu0 %vm574_vm1, %v5849_v5  ;;  %v408_v8 = vsub.s32 3, %v5968_v42 }
  0x81   : > { %727 = vmatpush1.bf16.msra.mxu1 %v3943_v6  ;;  %758 = vmatprep.mubr.bf16.mxu1 %v5565_v0  ;;  %v5980_v48 = vrot.slane %v5974_v44, %v412_v43  ;;  %v882_v50 = vrot.slane %v5974_v44, %v396_v46 }
  0x82   : > { %728 = vmatprep.subr.bf16.mxu1 %v3952_v11  ;;  %1169 = vmatpush1.bf16.msra.mxu0 %v5739_v10  ;;  %v4008_v10 = vcombine.high %v5783_v38, %v5783_v38  ;;  %v5956_v38 = vld [vmem:[#allocation6 + $0x78] sm:$0xff]  }
  0x83   : > { %1200 = vmatprep.mubr.bf16.mxu0 %v5565_v0  ;;  %1170 = vmatprep.subr.bf16.mxu0 %v5744_v15  ;;  %v876_v15 = vld [vmem:[#allocation4 + $0xd8] sm:$0x77] }
  0x84   : > { %v4012_v17 = vcombine.high %v876_v15, %v876_v15  ;;  %v4011_v18 = vcombine.low %v876_v15, %v876_v15 }
  0x85   : > { %729 = vmatpush1.bf16.msra.mxu1 %v3951_v12 }
  0x86   : > { %730 = vmatprep.subr.bf16.mxu1 %v3960_v13  ;;  %1171 = vmatpush1.bf16.msra.mxu0 %v5757_v22  ;;  %v1081_v19 = vsel %vm578_vm0, %v4011_v18, 0  ;;  %v5566_v22 = vmov 0.0  }
  0x87   : > { %1172 = vmatprep.subr.bf16.mxu0 %v5762_v24  ;;  %v5905_v24 = vld [vmem:[#allocation6 + $0x90] sm:$0xff]  }
  0x89   : > { %731 = vmatpush1.bf16.msra.mxu1 %v3959_v9 }
  0x8a   : > { %3975 = vmatprep.subr.msk.bf16.mxu1 %vm578_vm0, %v3968_v14  ;;  %1173 = vmatpush1.bf16.msra.mxu0 %v5774_v30  ;;  %v5928_v30 = vld [vmem:[#allocation6 + $0xa0] sm:$0xff]  }
  0x8b   : > { %4017 = vmatprep.subr.msk.bf16.mxu0 %vm578_vm0, %v4010_v16 }
  0x8d   : > { %733 = vmatpush1.bf16.msra.mxu1 %v5811_v51 }
  0x8e   : > { %1127 = vmatprep.subr.bf16.mxu1 %v5802_v47  ;;  %1175 = vmatpush1.bf16.msra.mxu0 %v5817_v53  ;;  %v400_v47 = vsub.s32 1, %v5968_v42 }
  0x8f   : > { %4478 = vmatprep.subr.bf16.mxu0 %v5566_v22 }
  0x90   : > { %3976 = vmatmul.mubr.msk.bf16.vlgmr.msra.gmra.mrb[8].mxu1 %vm574_vm1, %v5807_v49  ;;  %v5983_v49 = vrot.slane %v5974_v44, %v416_v45  ;;  %v886_v51 = vrot.slane %v5974_v44, %v400_v47 }
  0x91   : > { %1128 = vmatpush1.bf16.msra.mxu1 %v5819_v54  ;;  %1159 = vmatprep.mubr.bf16.mxu1 %v5565_v0 }
  0x92   : > { %1129 = vmatprep.subr.bf16.mxu1 %v5822_v57  ;;  %4018 = vmatmul.mubr.msk.bf16.vlgmr.msra.gmra.mrb[8].mxu0 %vm574_vm1, %v5849_v5 }
  0x93   : > { %4479 = vmatpush3.bf16.msra.mxu0 %v5888_v20  ;;  %4494 = vmatprep.mubr.msk.bf16.mxu0 %vm5567_vm9, %v5566_v22 }
  0x94   : > { %4480 = vmatprep.subr.bf16.mxu0 %v5566_v22 }
  0x95   : > { %1130 = vmatpush1.bf16.msra.mxu1 %v3947_v58 }
  0x96   : > { %1131 = vmatprep.subr.bf16.mxu1 %v3956_v59 }
  0x99   : > { %1132 = vmatpush1.bf16.msra.mxu1 %v3955_v60 }
  0x9a   : > { %4015 = vmatprep.subr.msk.bf16.mxu1 %vm578_vm0, %v4008_v10 }
  0x9d   : > { %1134 = vmatpush1.bf16.msra.mxu1 %v5814_v52 }
  0x9e   : > { %1209 = vmatprep.subr.bf16.mxu1 %v3944_v4 }
  0xa0   : > { %4016 = vmatmul.mubr.msk.bf16.vlgmr.msra.gmra.mrb[12].mxu1 %vm574_vm1, %v5849_v5 }
  0xa1   : > { %1210 = vmatpush1.bf16.msra.mxu1 %v3943_v6  ;;  %1241 = vmatprep.mubr.bf16.mxu1 %v5565_v0  ;;  %v5899_v0 = vld [vmem:[#allocation6 + $0x88] sm:$0xff]  }
  0xa2   : > { %1211 = vmatprep.subr.bf16.mxu1 %v3952_v11  ;;  %4481 = vmatpush3.bf16.msra.mxu0 %v5899_v0  ;;  %v5568_v11 = vmov 1983009808  }
  0xa3   : > { %4482 = vmatprep.subr.bf16.mxu0 %v5566_v22 }
  0xa5   : > { %1212 = vmatpush1.bf16.msra.mxu1 %v3951_v12  ;;  %v794_v12 = vunpack.c.l.s4 %v5568_v11 }
  0xa6   : > { %1213 = vmatprep.subr.bf16.mxu1 %v3960_v13  ;;  %4483 = vmatpush3.bf16.msra.mxu0 %v5905_v24  ;;  %v5994_v13 = vrot.slane %v5974_v44, %v404_v7 }
  0xa7   : > { %4484 = vmatprep.subr.bf16.mxu0 %v5566_v22  ;;  %v795_v14 = vunpack.c.0.s8 %v794_v12 }
  0xa9   : > { %1214 = vmatpush1.bf16.msra.mxu1 %v3959_v9  ;;  %v5997_v9 = vrot.slane %v5974_v44, %v408_v8  ;;  %v798_v45 = vsub.s32 %v795_v14, %v5968_v42 }
  0xaa   : > { %4019 = vmatprep.subr.msk.bf16.mxu1 %vm578_vm0, %v4012_v17  ;;  %4485 = vmatpush3.bf16.msra.mxu0 %v5916_v26 }
  0xab   : > { %4486 = vmatprep.subr.bf16.mxu0 %v5566_v22 }
  0xad   : > { %1216 = vmatpush1.bf16.msra.mxu1 %v1081_v19 }
  0xae   : > { %4498 = vmatprep.subr.bf16.mxu1 %v5566_v22  ;;  %4487 = vmatpush3.bf16.msra.mxu0 %v5928_v30 }
  0xaf   : > { %4488 = vmatprep.subr.bf16.mxu0 %v5566_v22 }
  0xb0   : > { %4020 = vmatmul.mubr.msk.bf16.vlgmr.msra.gmra.mrb[16].mxu1 %vm574_vm1, %v5849_v5 }
  0xb1   : > { %4499 = vmatpush3.bf16.msra.mxu1 %v5890_v21  ;;  %4514 = vmatprep.mubr.msk.bf16.mxu1 %vm5567_vm9, %v5566_v22 }
  0xb2   : > { %4500 = vmatprep.subr.bf16.mxu1 %v5566_v22  ;;  %4489 = vmatpush3.bf16.msra.mxu0 %v5938_v33 }
  0xb3   : > { %4490 = vmatprep.subr.bf16.mxu0 %v5566_v22 }
  0xb5   : > { %4501 = vmatpush3.bf16.msra.mxu1 %v5901_v23 }
  0xb6   : > { %4502 = vmatprep.subr.bf16.mxu1 %v5566_v22  ;;  %4491 = vmatpush3.bf16.msra.mxu0 %v5946_v35 }
  0xb7   : > { %4492 = vmatprep.subr.bf16.mxu0 %v5566_v22 }
  0xb9   : > { %4503 = vmatpush3.bf16.msra.mxu1 %v5909_v25 }
  0xba   : > { %4504 = vmatprep.subr.bf16.mxu1 %v5566_v22  ;;  %4493 = vmatpush3.bf16.msra.mxu0 %v5954_v37 }
  0xbb   : > { %4518 = vmatprep.subr.bf16.mxu0 %v5566_v22 }
  0xbd   : > { %4505 = vmatpush3.bf16.msra.mxu1 %v5918_v27 }
  0xbe   : > { %4506 = vmatprep.subr.bf16.mxu1 %v5566_v22 }
  0xc1   : > { %4507 = vmatpush3.bf16.msra.mxu1 %v5930_v31 }
  0xc2   : > { %4508 = vmatprep.subr.bf16.mxu1 %v5566_v22 }
  0xc5   : > { %4509 = vmatpush3.bf16.msra.mxu1 %v5940_v34 }
  0xc6   : > { %4510 = vmatprep.subr.bf16.mxu1 %v5566_v22 }
  0xc9   : > { %4511 = vmatpush3.bf16.msra.mxu1 %v5948_v36 }
  0xca   : > { %4512 = vmatprep.subr.bf16.mxu1 %v5566_v22 }
  0xcd   : > { %4513 = vmatpush3.bf16.msra.mxu1 %v5956_v38 }
  0xce   : > { %4538 = vmatprep.subr.bf16.mxu1 %v5566_v22 }
 0x143   : > { %v637_v52 = vpop.f32.mrb[0].mxu1  ;;  %v719_v53 = vpop.f32.mrb[0].mxu0 }
 0x144   : > { %v638_v54 = vadd.f32 %v882_v50, %v637_v52  ;;  %v639_v55 = vpop.f32.mrb[1].mxu1  ;;  %v720_v56 = vadd.f32 %v719_v53, %v5980_v48  ;;  %v721_v57 = vpop.f32.mrb[1].mxu0 }
 0x145   : > { %v640_v58 = vadd.f32 %v886_v51, %v639_v55  ;;  %v641_v59 = vpop.f32.mrb[2].mxu1  ;;  %v722_v60 = vadd.f32 %v721_v57, %v5983_v49  ;;  %v723_v61 = vpop.f32.mrb[2].mxu0 }
 0x146   : > { %v767_v62 = vmax.f32 %v638_v54, 0.0  ;;  %v642_v63 = vpop.f32.mrb[3].mxu1  ;;  %v771_v1 = vmax.f32 %v720_v56, 0.0  ;;  %v724_v2 = vpop.f32.mrb[3].mxu0  ;;  %v424_v59 = vsub.s32 7, %v5968_v42 }
 0x147   : > { %v768_v3 = vmax.f32 %v640_v58, 0.0  ;;  %v772_v4 = vmax.f32 %v722_v60, 0.0  ;;  %v1325_v63 = vld [vmem:[#allocation3] sm:$0x77] }
 0x149   : > { %v3977_v5 = vpack.c.bf16 %v768_v3, %v767_v62  ;;  %v5989_v6 = vpack.c.bf16 %v772_v4, %v771_v1  ;;  %v6013_v3 = vrot.slane %v5974_v44, %v424_v59  ;;  %v6238_v62 = vld [vmem:[#allocation6 + $0xc8] sm:$0xff]  }
 0x14b   : > { %v799_v54 = vrot.slane %v3977_v5, %v798_v45 }
 0x153   : > { %v678_v16 = vpop.f32.mrb[4].mxu1  ;;  %v1120_v10 = vpop.f32.mrb[4].mxu0 }
 0x154   : > { %v679_v15 = vadd.f32 %v678_v16, %v5994_v13  ;;  %v680_v17 = vpop.f32.mrb[5].mxu1  ;;  %v1121_v18 = vadd.f32 %v1120_v10, %v882_v50  ;;  %v1122_v19 = vpop.f32.mrb[5].mxu0  ;;  %v6019_v10 = vld [vmem:[#allocation6 + $0x100] sm:$0xff]  }
 0x155   : > { %v681_v28 = vadd.f32 %v680_v17, %v5997_v9  ;;  %v682_v32 = vpop.f32.mrb[6].mxu1  ;;  %v1123_v39 = vadd.f32 %v1122_v19, %v886_v51  ;;  %v1124_v40 = vpop.f32.mrb[6].mxu0  ;;  %v420_v51 = vsub.s32 6, %v5968_v42  ;;  %v816_v19 = vrot.slane %v5989_v6, %v798_v45  ;;  %v6041_v6 = vld [vmem:[#allocation6 + $0x110] sm:$0xff]  }
 0x156   : > { %v769_v41 = vmax.f32 %v679_v15, 0.0  ;;  %v683_v43 = vpop.f32.mrb[7].mxu1  ;;  %v1250_v46 = vmax.f32 %v1121_v18, 0.0  ;;  %v1125_v47 = vpop.f32.mrb[7].mxu0  ;;  %v6021_v15 = vld [vmem:[#allocation6 + $0x140] sm:$0xff]   ;;  %v6029_v32 = vld [vmem:[#allocation6 + $0x108] sm:$0xff]  }
 0x157   : > { %v770_v52 = vmax.f32 %v681_v28, 0.0  ;;  %v1251_v53 = vmax.f32 %v1123_v39, 0.0  ;;  %v6010_v2 = vrot.slane %v5974_v44, %v420_v51  ;;  %v6031_v39 = vld [vmem:[#allocation6 + $0x148] sm:$0xff]   ;;  %v6061_v51 = vld [vmem:[#allocation6 + $0x160] sm:$0xff]  }
 0x159   : > { %v3978_v55 = vpack.c.bf16 %v770_v52, %v769_v41  ;;  %v4141_v50 = vpack.c.bf16 %v1251_v53, %v1250_v46  ;;  %v6043_v41 = vld [vmem:[#allocation6 + $0x150] sm:$0xff]   ;;  %v6051_v46 = vld [vmem:[#allocation6 + $0x158] sm:$0xff]  }
 0x15b   : > { %v806_v56 = vrot.slane %v3978_v55, %v798_v45  ;;  %v1287_v57 = vshrl.u32 %v4141_v50, 16  ;;  %v1290_v61 = vshll.u32 %v4141_v50, 16 }
 0x15d   : > { %v807_v58 = vcombine.low %v799_v54, %v806_v56  ;;  %v1289_v60 = vrot.slane %v1287_v57, 7  ;;  %v6059_v57 = vld [vmem:[#allocation6 + $0x120] sm:$0xff]  }
 0x15f   : > { %827 = vst [vmem:[#allocation2] sm:$0xff] %v807_v58  ;;  %v1292_v1 = vor.u32 %v1290_v61, %v1289_v60  ;;  %v6069_v60 = vld [vmem:[#allocation6 + $0x168] sm:$0xff]  }
 0x161   : > { %v1326_v4 = vsel %vm6005_vm15, %v1292_v1, %v1325_v63  ;;  %v1328_v63 = vld [vmem:[#allocation3 + $0x8] sm:$0x77] }
 0x162   : > { %1327 = vst [vmem:[#allocation3] sm:$0x77] %v1326_v4  ;;  %v6075_v4 = vld [vmem:[#allocation6 + $0x130] sm:$0xff]  }
 0x163   : > { %v760_v42 = vpop.f32.mrb[8].mxu1 }
 0x164   : > { %v761_v5 = vadd.f32 %v760_v42, %v6010_v2  ;;  %v762_v7 = vpop.f32.mrb[9].mxu1  ;;  %v6077_v42 = vld [vmem:[#allocation6 + $0x170] sm:$0xff]  }
 0x165   : > { %v763_v8 = vadd.f32 %v762_v7, %v6013_v3  ;;  %v764_v11 = vpop.f32.mrb[10].mxu1  ;;  %v6085_v7 = vld [vmem:[#allocation6 + $0x138] sm:$0xff]  }
 0x166   : > { %v773_v12 = vmax.f32 %v761_v5, 0.0  ;;  %v765_v14 = vpop.f32.mrb[11].mxu1  ;;  %v6093_v11 = vld [vmem:[#allocation6 + $0x1c0] sm:$0xff]  }
 0x167   : > { %v774_v16 = vmax.f32 %v763_v8, 0.0  ;;  %v6087_v8 = vld [vmem:[#allocation6 + $0x178] sm:$0xff]   ;;  %v1549_v14 = vld [vmem:[#allocation2] sm:$0x3] }
 0x169   : > { %v3980_v44 = vpack.c.bf16 %v774_v16, %v773_v12  ;;  %v6023_v17 = vld [vmem:[#allocation3 + $0x4] sm:$0x3]  ;;  %v1337_v18 = vld [vmem:[#allocation3] sm:$0x3]  ;;  %v6099_v16 = vld [vmem:[#allocation2 + $0x2] sm:$0x3] }
 0x16a   : > { %4495 = vmatmul.mubr.bf16.vlgmr.msra.gmra.mrb[12].mxu0 %v6023_v17  ;;  %4515 = vmatmul.mubr.bf16.vlgmr.msra.gmra.mrb[20].mxu1 %v1337_v18  ;;  %v6095_v12 = vld [vmem:[#allocation6 + $0x200] sm:$0xff]   ;;  %v6106_v18 = vld [vmem:[#allocation6 + $0x208] sm:$0xff]  }
 0x16b   : > { %v823_v28 = vrot.slane %v3980_v44, %v798_v45  ;;  %4519 = vmatpush3.bf16.msra.mxu0 %v6019_v10  ;;  %4539 = vmatpush3.bf16.msra.mxu1 %v6021_v15  ;;  %v6049_v45 = vld [vmem:[#allocation6 + $0x118] sm:$0xff]   ;;  %v6104_v44 = vld [vmem:[#allocation6 + $0x1c8] sm:$0xff]   ;;  %6898 = vst [vmem:[#allocation11_spill] sm:$0xff] %v6106_v18 }
 0x16c   : > { %4520 = vmatprep.subr.bf16.mxu0 %v5566_v22  ;;  %4540 = vmatprep.subr.bf16.mxu1 %v5566_v22 }
 0x16d   : > { %v824_v40 = vcombine.low %v816_v19, %v823_v28  ;;  %4534 = vmatprep.mubr.msk.bf16.mxu0 %vm5567_vm9, %v5566_v22  ;;  %4554 = vmatprep.mubr.msk.bf16.mxu1 %vm5567_vm9, %v5566_v22  ;;  %v6116_v19 = vld [vmem:[#allocation6 + $0x1d0] sm:$0xff]  }
 0x16e   : > { %v6118_v28 = vld [vmem:[#allocation6 + $0x210] sm:$0xff]  }
 0x16f   : > { %828 = vst [vmem:[#allocation2 + $0x8] sm:$0xff] %v824_v40  ;;  %4521 = vmatpush3.bf16.msra.mxu0 %v6029_v32  ;;  %4541 = vmatpush3.bf16.msra.mxu1 %v6031_v39  ;;  %6899 = vst [vmem:[#allocation12_spill] sm:$0xff] %v6118_v28  ;;  %v6124_v40 = vld [vmem:[#allocation6 + $0x1d8] sm:$0xff]  }
 0x170   : > { %4522 = vmatprep.subr.bf16.mxu0 %v5566_v22  ;;  %4542 = vmatprep.subr.bf16.mxu1 %v5566_v22 }
 0x173   : > { %v1161_v43 = vpop.f32.mrb[12].mxu1  ;;  %4523 = vmatpush3.bf16.msra.mxu0 %v6041_v6  ;;  %4543 = vmatpush3.bf16.msra.mxu1 %v6043_v41 }
 0x174   : > { %v1162_v47 = vadd.f32 %v1161_v43, %v5994_v13  ;;  %v1163_v52 = vpop.f32.mrb[13].mxu1  ;;  %4524 = vmatprep.subr.bf16.mxu0 %v5566_v22  ;;  %4544 = vmatprep.subr.bf16.mxu1 %v5566_v22  ;;  %v6126_v43 = vld [vmem:[#allocation6 + $0x218] sm:$0xff]  }
 0x175   : > { %v1164_v53 = vadd.f32 %v1163_v52, %v5997_v9  ;;  %v1165_v54 = vpop.f32.mrb[14].mxu1  ;;  %v6067_v9 = vld [vmem:[#allocation6 + $0x128] sm:$0xff]   ;;  %6900 = vst [vmem:[#allocation13_spill] sm:$0xff] %v6126_v43  ;;  %v6134_v52 = vld [vmem:[#allocation6 + $0x220] sm:$0xff]  }
 0x176   : > { %v1252_v55 = vmax.f32 %v1162_v47, 0.0  ;;  %v1166_v50 = vpop.f32.mrb[15].mxu1  ;;  %v6132_v47 = vld [vmem:[#allocation6 + $0x1e0] sm:$0xff]   ;;  %6901 = vst [vmem:[#allocation14_spill] sm:$0xff] %v6134_v52  ;;  %v842_v54 = vld [vmem:[#allocation3 + $0x10] sm:$0x11] }
 0x177   : > { %v1253_v56 = vmax.f32 %v1164_v53, 0.0  ;;  %4525 = vmatpush3.bf16.msra.mxu0 %v6049_v45  ;;  %4545 = vmatpush3.bf16.msra.mxu1 %v6051_v46  ;;  %v1202_v53 = vpop.f32.mrb[8].mxu0 }
 0x178   : > { %4526 = vmatprep.subr.bf16.mxu0 %v5566_v22  ;;  %4546 = vmatprep.subr.bf16.mxu1 %v5566_v22  ;;  %v1204_v50 = vpop.f32.mrb[9].mxu0 }
 0x179   : > { %v4142_v13 = vpack.c.bf16 %v1253_v56, %v1252_v55  ;;  %v843_v55 = vsel %vm5923_vm8, 0, %v842_v54  ;;  %v1203_v56 = vadd.f32 %v1202_v53, %v5980_v48  ;;  %v5329_v48 = vld [vmem:[#allocation3] ss:$0 sps:$4 sm:$0x77]   ;;  %v6154_v54 = vld [vmem:[#allocation6 + $0x230] sm:$0xff]  }
 0x17a   : > { %844 = vst [vmem:[#allocation3 + $0x10] sm:$0x11] %v843_v55  ;;  %6903 = vst [vmem:[#allocation16_spill] sm:$0xff] %v6154_v54 }
 0x17b   : > { %v1294_v58 = vshrl.u32 %v4142_v13, 16  ;;  %v1297_v59 = vshll.u32 %v4142_v13, 16  ;;  %4527 = vmatpush3.bf16.msra.mxu0 %v6059_v57  ;;  %4547 = vmatpush3.bf16.msra.mxu1 %v6061_v51  ;;  %v1205_v13 = vadd.f32 %v1204_v50, %v5983_v49  ;;  %v6152_v49 = vld [vmem:[#allocation6 + $0x1f0] sm:$0xff]  }
 0x17c   : > { %4528 = vmatprep.subr.bf16.mxu0 %v5566_v22  ;;  %4548 = vmatprep.subr.bf16.mxu1 %v5566_v22 }
 0x17d   : > { %v1296_v61 = vrot.slane %v1294_v58, 7  ;;  %v1206_v58 = vpop.f32.mrb[10].mxu0 }
 0x17f   : > { %v1299_v1 = vor.u32 %v1297_v59, %v1296_v61  ;;  %4529 = vmatpush3.bf16.msra.mxu0 %v6067_v9  ;;  %4549 = vmatpush3.bf16.msra.mxu1 %v6069_v60  ;;  %v1207_v59 = vpop.f32.mrb[11].mxu0  ;;  %v6144_v61 = vld [vmem:[#allocation6 + $0x1e8] sm:$0xff]  }
 0x180   : > { %4530 = vmatprep.subr.bf16.mxu0 %v5566_v22  ;;  %4550 = vmatprep.subr.bf16.mxu1 %v5566_v22 }
 0x181   : > { %v1329_v5 = vsel %vm6005_vm15, %v1299_v1, %v1328_v63  ;;  %v6146_v63 = vld [vmem:[#allocation6 + $0x228] sm:$0xff]   ;;  %v1254_v1 = vmax.f32 %v1203_v56, 0.0  ;;  %v1787_v56 = vshll.u32 %v5329_v48, 16  ;;  %v1331_v59 = vld [vmem:[#allocation3 + $0x10] sm:$0x77] }
 0x182   : > { %1330 = vst [vmem:[#allocation3 + $0x8] sm:$0x77] %v1329_v5  ;;  %6902 = vst [vmem:[#allocation15_spill] sm:$0xff] %v6146_v63  ;;  %v1255_v5 = vmax.f32 %v1205_v13, 0.0 }
 0x183   : > { %4531 = vmatpush3.bf16.msra.mxu0 %v6075_v4  ;;  %4551 = vmatpush3.bf16.msra.mxu1 %v6077_v42 }
 0x184   : > { %4532 = vmatprep.subr.bf16.mxu0 %v5566_v22  ;;  %4552 = vmatprep.subr.bf16.mxu1 %v5566_v22  ;;  %v4143_v53 = vpack.c.bf16 %v1255_v5, %v1254_v1  ;;  %v6160_v1 = vld [vmem:[#allocation6 + $0x1f8] sm:$0xff]  }
 0x185   : > { %v6162_v5 = vld [vmem:[#allocation6 + $0x238] sm:$0xff]  }
 0x186   : > { %v1301_v55 = vshrl.u32 %v4143_v53, 16  ;;  %v1304_v50 = vshll.u32 %v4143_v53, 16  ;;  %v1789_v53 = vrot.slane %v1787_v56, 1 }
 0x187   : > { %4533 = vmatpush3.bf16.msra.mxu0 %v6085_v7  ;;  %4553 = vmatpush3.bf16.msra.mxu1 %v6087_v8 }
 0x188   : > { %4558 = vmatprep.subr.bf16.mxu0 %v5566_v22  ;;  %4578 = vmatprep.subr.bf16.mxu1 %v5566_v22  ;;  %v1303_v58 = vrot.slane %v1301_v55, 7  ;;  %v1785_v55 = vshrl.u32 %v5329_v48, 16 }
 0x18a   : > { %4535 = vmatmul.mubr.bf16.vlgmr.msra.gmra.mrb[16].mxu0 %v1549_v14  ;;  %4555 = vmatmul.mubr.bf16.vlgmr.msra.gmra.mrb[24].mxu1 %v6099_v16  ;;  %v5330_v14 = vld [vmem:[#allocation3 + $0x4] ss:$0 sps:$4 sm:$0x77]  }
 0x18b   : > { %4559 = vmatpush3.bf16.msra.mxu0 %v6093_v11  ;;  %4579 = vmatpush3.bf16.msra.mxu1 %v6095_v12  ;;  %v1905_v13 = vshll.u32 %v5330_v14, 16 }
 0x18c   : > { %4560 = vmatprep.subr.bf16.mxu0 %v5566_v22  ;;  %4580 = vmatprep.subr.bf16.mxu1 %v5566_v22 }
 0x18d   : > { %4574 = vmatprep.mubr.msk.bf16.mxu0 %vm5567_vm9, %v5566_v22  ;;  %4594 = vmatprep.mubr.msk.bf16.mxu1 %vm5567_vm9, %v5566_v22 }
 0x18f   : > { %4561 = vmatpush3.bf16.msra.mxu0 %v6104_v44  ;;  %4581 = vmatpush3.bf16.msra.mxu1 %v6106_v18  ;;  %v1790_v18 = vor.u32 %v1789_v53, %v1785_v55 }
 0x190   : > { %4562 = vmatprep.subr.bf16.mxu0 %v5566_v22  ;;  %4582 = vmatprep.subr.bf16.mxu1 %v5566_v22 }
 0x193   : > { %4563 = vmatpush3.bf16.msra.mxu0 %v6116_v19  ;;  %4583 = vmatpush3.bf16.msra.mxu1 %v6118_v28  ;;  %v1903_v28 = vshrl.u32 %v5330_v14, 16 }
 0x194   : > { %4564 = vmatprep.subr.bf16.mxu0 %v5566_v22  ;;  %4584 = vmatprep.subr.bf16.mxu1 %v5566_v22 }
 0x197   : > { %4565 = vmatpush3.bf16.msra.mxu0 %v6124_v40  ;;  %4585 = vmatpush3.bf16.msra.mxu1 %v6126_v43 }
 0x198   : > { %4566 = vmatprep.subr.bf16.mxu0 %v5566_v22  ;;  %4586 = vmatprep.subr.bf16.mxu1 %v5566_v22 }
 0x19b   : > { %4567 = vmatpush3.bf16.msra.mxu0 %v6132_v47  ;;  %4587 = vmatpush3.bf16.msra.mxu1 %v6134_v52  ;;  %v1907_v52 = vrot.slane %v1905_v13, 1 }
 0x19c   : > { %4568 = vmatprep.subr.bf16.mxu0 %v5566_v22  ;;  %4588 = vmatprep.subr.bf16.mxu1 %v5566_v22 }
 0x19f   : > { %4569 = vmatpush3.bf16.msra.mxu0 %v6144_v61  ;;  %4589 = vmatpush3.bf16.msra.mxu1 %v6146_v63  ;;  %v1306_v63 = vor.u32 %v1304_v50, %v1303_v58  ;;  %v6172_v50 = vor.u32 %v1907_v52, %v1903_v28  ;;  %v1243_v28 = vpop.f32.mrb[16].mxu1  ;;  %v6202_v52 = vld [vmem:[#allocation6 + $0x20] sm:$0xff]   ;;  %v6211_v58 = vld [vmem:[#allocation6 + $0x28] sm:$0xff]  }
 0x1a0   : > { %4570 = vmatprep.subr.bf16.mxu0 %v5566_v22  ;;  %4590 = vmatprep.subr.bf16.mxu1 %v5566_v22  ;;  %v1245_v48 = vpop.f32.mrb[17].mxu1 }
 0x1a1   : > { %v1332_v43 = vsel %vm6005_vm15, %v1306_v63, %v1331_v59  ;;  %v845_v63 = vld [vmem:[#allocation3 + $0x18] sm:$0x11]  ;;  %v1246_v56 = vadd.f32 %v1245_v48, %v6013_v3  ;;  %v1247_v13 = vpop.f32.mrb[18].mxu1  ;;  %v6217_v3 = vld [vmem:[#allocation6 + $0x30] sm:$0xff]  }
 0x1a2   : > { %1333 = vst [vmem:[#allocation3 + $0x10] sm:$0x77] %v1332_v43  ;;  %v6179_v43 = vld [vmem:[#allocation6 + $0x8] sm:$0xff]   ;;  %v846_v14 = vsel %vm5923_vm8, 0, %v845_v63  ;;  %v6231_v63 = vld [vmem:[#allocation6 + $0xc0] sm:$0xff]  }
 0x1a3   : > { %4571 = vmatpush3.bf16.msra.mxu0 %v6152_v49  ;;  %4591 = vmatpush3.bf16.msra.mxu1 %v6154_v54  ;;  %v6170_v54 = vld [vmem:[#allocation6] sm:$0xff]   ;;  %847 = vst [vmem:[#allocation3 + $0x18] sm:$0x11] %v846_v14  ;;  %v6905_v14 = vld [vmem:[#allocation12_spill] sm:$0xff] }
 0x1a4   : > { %4572 = vmatprep.subr.bf16.mxu0 %v5566_v22  ;;  %4592 = vmatprep.subr.bf16.mxu1 %v5566_v22 }
 0x1a7   : > { %4573 = vmatpush3.bf16.msra.mxu0 %v6160_v1  ;;  %4593 = vmatpush3.bf16.msra.mxu1 %v6162_v5 }
 0x1a8   : > { %4598 = vmatprep.subr.bf16.mxu0 %v5566_v22  ;;  %4618 = vmatprep.subr.bf16.mxu1 %v5566_v22 }
 0x1aa   : > { %4575 = vmatmul.mubr.bf16.vlgmr.msra.gmra.mrb[20].mxu0 %v1790_v18  ;;  %4595 = vmatmul.mubr.bf16.vlgmr.msra.gmra.mrb[28].mxu1 %v6172_v50  ;;  %v6189_v18 = vld [vmem:[#allocation6 + $0x10] sm:$0xff]   ;;  %v1334_v55 = vld [vmem:[#allocation3 + $0x18] sm:$0x77] }
 0x1ab   : > { %4599 = vmatpush3.bf16.msra.mxu0 %v5890_v21  ;;  %4619 = vmatpush3.bf16.msra.mxu1 %v6170_v54  ;;  %v6195_v21 = vld [vmem:[#allocation6 + $0x18] sm:$0xff]  }
 0x1ac   : > { %4600 = vmatprep.subr.bf16.mxu0 %v5566_v22  ;;  %4620 = vmatprep.subr.bf16.mxu1 %v5566_v22 }
 0x1ad   : > { %4614 = vmatprep.mubr.msk.bf16.mxu0 %vm5567_vm9, %v5566_v22  ;;  %4634 = vmatprep.mubr.msk.bf16.mxu1 %vm5567_vm9, %v5566_v22 }
 0x1af   : > { %4601 = vmatpush3.bf16.msra.mxu0 %v5901_v23  ;;  %4621 = vmatpush3.bf16.msra.mxu1 %v6179_v43  ;;  %v1244_v23 = vadd.f32 %v1243_v28, %v6010_v2  ;;  %v1248_v2 = vpop.f32.mrb[19].mxu1 }
 0x1b0   : > { %4602 = vmatprep.subr.bf16.mxu0 %v5566_v22  ;;  %4622 = vmatprep.subr.bf16.mxu1 %v5566_v22 }
 0x1b3   : > { %4603 = vmatpush3.bf16.msra.mxu0 %v5909_v25  ;;  %4623 = vmatpush3.bf16.msra.mxu1 %v6189_v18  ;;  %v1256_v25 = vmax.f32 %v1244_v23, 0.0  ;;  %v6223_v23 = vld [vmem:[#allocation6 + $0x38] sm:$0xff]  }
 0x1b4   : > { %4604 = vmatprep.subr.bf16.mxu0 %v5566_v22  ;;  %4624 = vmatprep.subr.bf16.mxu1 %v5566_v22 }
 0x1b7   : > { %4605 = vmatpush3.bf16.msra.mxu0 %v5918_v27  ;;  %4625 = vmatpush3.bf16.msra.mxu1 %v6195_v21  ;;  %v1257_v27 = vmax.f32 %v1246_v56, 0.0  ;;  %v5356_v56 = vld [vmem:[#allocation3 + $0xc] ss:$0 sps:$4 sm:$0x77]  }
 0x1b8   : > { %4606 = vmatprep.subr.bf16.mxu0 %v5566_v22  ;;  %4626 = vmatprep.subr.bf16.mxu1 %v5566_v22 }
 0x1b9   : > { %v4144_v59 = vpack.c.bf16 %v1257_v27, %v1256_v25  ;;  %v6904_v25 = vld [vmem:[#allocation11_spill] sm:$0xff] }
 0x1bb   : > { %4607 = vmatpush3.bf16.msra.mxu0 %v5930_v31  ;;  %4627 = vmatpush3.bf16.msra.mxu1 %v6202_v52  ;;  %v1308_v53 = vshrl.u32 %v4144_v59, 16  ;;  %v1311_v29 = vshll.u32 %v4144_v59, 16 }
 0x1bc   : > { %4608 = vmatprep.subr.bf16.mxu0 %v5566_v22  ;;  %4628 = vmatprep.subr.bf16.mxu1 %v5566_v22 }
 0x1bd   : > { %v1310_v31 = vrot.slane %v1308_v53, 7 }
 0x1bf   : > { %4609 = vmatpush3.bf16.msra.mxu0 %v5940_v34  ;;  %4629 = vmatpush3.bf16.msra.mxu1 %v6211_v58  ;;  %v1313_v28 = vor.u32 %v1311_v29, %v1310_v31  ;;  %v6908_v29 = vld [vmem:[#allocation15_spill] sm:$0xff] }
 0x1c0   : > { %4610 = vmatprep.subr.bf16.mxu0 %v5566_v22  ;;  %4630 = vmatprep.subr.bf16.mxu1 %v5566_v22 }
 0x1c1   : > { %v1335_v34 = vsel %vm6005_vm15, %v1313_v28, %v1334_v55 }
 0x1c2   : > { %1336 = vst [vmem:[#allocation3 + $0x18] sm:$0x77] %v1335_v34 }
 0x1c3   : > { %4611 = vmatpush3.bf16.msra.mxu0 %v5948_v36  ;;  %4631 = vmatpush3.bf16.msra.mxu1 %v6217_v3  ;;  %v2041_v36 = vld [vmem:[#allocation3 + $0x8] sm:$0x3] }
 0x1c4   : > { %4612 = vmatprep.subr.bf16.mxu0 %v5566_v22  ;;  %4632 = vmatprep.subr.bf16.mxu1 %v5566_v22 }
 0x1c7   : > { %4613 = vmatpush3.bf16.msra.mxu0 %v5956_v38  ;;  %4633 = vmatpush3.bf16.msra.mxu1 %v6223_v23  ;;  %v6248_v38 = vld [vmem:[#allocation6 + $0xd0] sm:$0xff]  }
 0x1c8   : > { %4638 = vmatprep.subr.bf16.mxu0 %v5566_v22  ;;  %4658 = vmatprep.subr.bf16.mxu1 %v5566_v22 }
 0x1ca   : > { %4615 = vmatmul.mubr.bf16.vlgmr.msra.gmra.mrb[24].mxu0 %v2041_v36  ;;  %4635 = vmatmul.mubr.bf16.vlgmr.msra.gmra.mrb[32].mxu1 %v6023_v17  ;;  %v6343_v17 = vld [vmem:[#allocation6 + $0x190] sm:$0xff]   ;;  %v2568_v36 = vshll.u32 %v5356_v56, 16 }
 0x1cb   : > { %4639 = vmatpush3.bf16.msra.mxu0 %v5888_v20  ;;  %4659 = vmatpush3.bf16.msra.mxu1 %v6231_v63  ;;  %v6254_v20 = vld [vmem:[#allocation6 + $0xd8] sm:$0xff]  }
 0x1cc   : > { %4640 = vmatprep.subr.bf16.mxu0 %v5566_v22  ;;  %4660 = vmatprep.subr.bf16.mxu1 %v5566_v22 }
 0x1cd   : > { %4654 = vmatprep.mubr.msk.bf16.mxu0 %vm5567_vm9, %v5566_v22  ;;  %4674 = vmatprep.mubr.msk.bf16.mxu1 %vm5567_vm9, %v5566_v22 }
 0x1cf   : > { %4641 = vmatpush3.bf16.msra.mxu0 %v5899_v0  ;;  %4661 = vmatpush3.bf16.msra.mxu1 %v6238_v62  ;;  %v6260_v0 = vld [vmem:[#allocation6 + $0xe0] sm:$0xff]  }
 0x1d0   : > { %4642 = vmatprep.subr.bf16.mxu0 %v5566_v22  ;;  %4662 = vmatprep.subr.bf16.mxu1 %v5566_v22 }
 0x1d3   : > { %4643 = vmatpush3.bf16.msra.mxu0 %v5905_v24  ;;  %4663 = vmatpush3.bf16.msra.mxu1 %v6248_v38  ;;  %v6266_v24 = vld [vmem:[#allocation6 + $0xe8] sm:$0xff]  }
 0x1d4   : > { %4644 = vmatprep.subr.bf16.mxu0 %v5566_v22  ;;  %4664 = vmatprep.subr.bf16.mxu1 %v5566_v22 }
 0x1d7   : > { %4645 = vmatpush3.bf16.msra.mxu0 %v5916_v26  ;;  %4665 = vmatpush3.bf16.msra.mxu1 %v6254_v20  ;;  %v6272_v26 = vld [vmem:[#allocation6 + $0xf0] sm:$0xff]  }
 0x1d8   : > { %4646 = vmatprep.subr.bf16.mxu0 %v5566_v22  ;;  %4666 = vmatprep.subr.bf16.mxu1 %v5566_v22 }
 0x1db   : > { %4647 = vmatpush3.bf16.msra.mxu0 %v5928_v30  ;;  %4667 = vmatpush3.bf16.msra.mxu1 %v6260_v0  ;;  %v6278_v30 = vld [vmem:[#allocation6 + $0xf8] sm:$0xff]  }
 0x1dc   : > { %4648 = vmatprep.subr.bf16.mxu0 %v5566_v22  ;;  %4668 = vmatprep.subr.bf16.mxu1 %v5566_v22 }
 0x1df   : > { %4649 = vmatpush3.bf16.msra.mxu0 %v5938_v33  ;;  %4669 = vmatpush3.bf16.msra.mxu1 %v6266_v24  ;;  %v6286_v33 = vld [vmem:[#allocation3 + $0xc] sm:$0x3] }
 0x1e0   : > { %4650 = vmatprep.subr.bf16.mxu0 %v5566_v22  ;;  %4670 = vmatprep.subr.bf16.mxu1 %v5566_v22 }
 0x1e3   : > { %4651 = vmatpush3.bf16.msra.mxu0 %v5946_v35  ;;  %4671 = vmatpush3.bf16.msra.mxu1 %v6272_v26  ;;  %v6324_v35 = vld [vmem:[#allocation6 + $0x180] sm:$0xff]  }
 0x1e4   : > { %4652 = vmatprep.subr.bf16.mxu0 %v5566_v22  ;;  %4672 = vmatprep.subr.bf16.mxu1 %v5566_v22 }
 0x1e7   : > { %4653 = vmatpush3.bf16.msra.mxu0 %v5954_v37  ;;  %4673 = vmatpush3.bf16.msra.mxu1 %v6278_v30  ;;  %v2318_v37 = vld [vmem:[#allocation2 + $0x4] sm:$0x3] }
 0x1e8   : > { %4678 = vmatprep.subr.bf16.mxu0 %v5566_v22  ;;  %4698 = vmatprep.subr.bf16.mxu1 %v5566_v22 }
 0x1ea   : > { %4655 = vmatmul.mubr.bf16.vlgmr.msra.gmra.mrb[28].mxu0 %v6286_v33  ;;  %4675 = vmatmul.mubr.bf16.vlgmr.msra.gmra.mrb[36].mxu1 %v6099_v16 }
 0x1eb   : > { %4679 = vmatpush3.bf16.msra.mxu0 %v6019_v10  ;;  %4699 = vmatpush3.bf16.msra.mxu1 %v6021_v15  ;;  %v6328_v10 = vld [vmem:[#allocation2 + $0x6] sm:$0x3]  ;;  %v6333_v15 = vld [vmem:[#allocation6 + $0x188] sm:$0xff]  }
 0x1ec   : > { %4680 = vmatprep.subr.bf16.mxu0 %v5566_v22  ;;  %4700 = vmatprep.subr.bf16.mxu1 %v5566_v22 }
 0x1ed   : > { %4694 = vmatprep.mubr.msk.bf16.mxu0 %vm5567_vm9, %v5566_v22  ;;  %4714 = vmatprep.mubr.msk.bf16.mxu1 %vm5567_vm9, %v5566_v22 }
 0x1ef   : > { %4681 = vmatpush3.bf16.msra.mxu0 %v6029_v32  ;;  %4701 = vmatpush3.bf16.msra.mxu1 %v6031_v39  ;;  %v6349_v32 = vld [vmem:[#allocation6 + $0x198] sm:$0xff]   ;;  %v6355_v39 = vld [vmem:[#allocation6 + $0x1a0] sm:$0xff]  }
 0x1f0   : > { %4682 = vmatprep.subr.bf16.mxu0 %v5566_v22  ;;  %4702 = vmatprep.subr.bf16.mxu1 %v5566_v22 }
 0x1f3   : > { %4683 = vmatpush3.bf16.msra.mxu0 %v6041_v6  ;;  %4703 = vmatpush3.bf16.msra.mxu1 %v6043_v41  ;;  %v6361_v6 = vld [vmem:[#allocation6 + $0x1a8] sm:$0xff]  }
 0x1f4   : > { %4684 = vmatprep.subr.bf16.mxu0 %v5566_v22  ;;  %4704 = vmatprep.subr.bf16.mxu1 %v5566_v22 }
 0x1f7   : > { %4685 = vmatpush3.bf16.msra.mxu0 %v6049_v45  ;;  %4705 = vmatpush3.bf16.msra.mxu1 %v6051_v46  ;;  %v5355_v45 = vld [vmem:[#allocation3 + $0x8] ss:$0 sps:$4 sm:$0x77]  }
 0x1f8   : > { %4686 = vmatprep.subr.bf16.mxu0 %v5566_v22  ;;  %4706 = vmatprep.subr.bf16.mxu1 %v5566_v22 }
 0x1fb   : > { %4687 = vmatpush3.bf16.msra.mxu0 %v6059_v57  ;;  %4707 = vmatpush3.bf16.msra.mxu1 %v6061_v51  ;;  %v6367_v57 = vld [vmem:[#allocation6 + $0x1b0] sm:$0xff]  }
 0x1fc   : > { %4688 = vmatprep.subr.bf16.mxu0 %v5566_v22  ;;  %4708 = vmatprep.subr.bf16.mxu1 %v5566_v22 }
 0x1ff   : > { %4689 = vmatpush3.bf16.msra.mxu0 %v6067_v9  ;;  %4709 = vmatpush3.bf16.msra.mxu1 %v6069_v60  ;;  %v2515_v9 = vshll.u32 %v5355_v45, 16 }
 0x200   : > { %4690 = vmatprep.subr.bf16.mxu0 %v5566_v22  ;;  %4710 = vmatprep.subr.bf16.mxu1 %v5566_v22 }
 0x201   : > { %v2517_v16 = vrot.slane %v2515_v9, 1  ;;  %v2570_v9 = vrot.slane %v2568_v36, 1  ;;  %v5364_v36 = vld [vmem:[#allocation8 + $0x38] sm:$0xff]  }
 0x203   : > { %4691 = vmatpush3.bf16.msra.mxu0 %v6075_v4  ;;  %4711 = vmatpush3.bf16.msra.mxu1 %v6077_v42  ;;  %v6373_v4 = vld [vmem:[#allocation6 + $0x1b8] sm:$0xff]  }
 0x204   : > { %4692 = vmatprep.subr.bf16.mxu0 %v5566_v22  ;;  %4712 = vmatprep.subr.bf16.mxu1 %v5566_v22 }
 0x207   : > { %4693 = vmatpush3.bf16.msra.mxu0 %v6085_v7  ;;  %4713 = vmatpush3.bf16.msra.mxu1 %v6087_v8  ;;  %v2513_v7 = vshrl.u32 %v5355_v45, 16  ;;  %v2566_v45 = vshrl.u32 %v5356_v56, 16 }
 0x208   : > { %4718 = vmatprep.subr.bf16.mxu0 %v5566_v22  ;;  %4738 = vmatprep.subr.bf16.mxu1 %v5566_v22 }
 0x209   : > { %v2518_v48 = vor.u32 %v2517_v16, %v2513_v7  ;;  %v5357_v7 = vld [vmem:[#allocation8] sm:$0xff]   ;;  %v6401_v16 = vor.u32 %v2570_v9, %v2566_v45 }
 0x20a   : > { %4695 = vmatmul.mubr.bf16.vlgmr.msra.gmra.mrb[32].mxu0 %v2318_v37  ;;  %4715 = vmatmul.mubr.bf16.vlgmr.msra.gmra.mrb[40].mxu1 %v6328_v10  ;;  %v6909_v37 = vld [vmem:[#allocation16_spill] sm:$0xff] }
 0x20b   : > { %4719 = vmatpush3.bf16.msra.mxu0 %v6324_v35  ;;  %4739 = vmatpush3.bf16.msra.mxu1 %v6093_v11 }
 0x20c   : > { %4720 = vmatprep.subr.bf16.mxu0 %v5566_v22  ;;  %4740 = vmatprep.subr.bf16.mxu1 %v5566_v22 }
 0x20d   : > { %4734 = vmatprep.mubr.msk.bf16.mxu0 %vm5567_vm9, %v5566_v22  ;;  %4754 = vmatprep.mubr.msk.bf16.mxu1 %vm5567_vm9, %v5566_v22 }
 0x20f   : > { %4721 = vmatpush3.bf16.msra.mxu0 %v6333_v15  ;;  %4741 = vmatpush3.bf16.msra.mxu1 %v6104_v44 }
 0x210   : > { %4722 = vmatprep.subr.bf16.mxu0 %v5566_v22  ;;  %4742 = vmatprep.subr.bf16.mxu1 %v5566_v22 }
 0x213   : > { %4723 = vmatpush3.bf16.msra.mxu0 %v6343_v17  ;;  %4743 = vmatpush3.bf16.msra.mxu1 %v6116_v19 }
 0x214   : > { %4724 = vmatprep.subr.bf16.mxu0 %v5566_v22  ;;  %4744 = vmatprep.subr.bf16.mxu1 %v5566_v22 }
 0x217   : > { %4725 = vmatpush3.bf16.msra.mxu0 %v6349_v32  ;;  %4745 = vmatpush3.bf16.msra.mxu1 %v6124_v40 }
 0x218   : > { %4726 = vmatprep.subr.bf16.mxu0 %v5566_v22  ;;  %4746 = vmatprep.subr.bf16.mxu1 %v5566_v22 }
 0x21b   : > { %4727 = vmatpush3.bf16.msra.mxu0 %v6355_v39  ;;  %4747 = vmatpush3.bf16.msra.mxu1 %v6132_v47 }
 0x21c   : > { %4728 = vmatprep.subr.bf16.mxu0 %v5566_v22  ;;  %4748 = vmatprep.subr.bf16.mxu1 %v5566_v22 }
 0x21f   : > { %4729 = vmatpush3.bf16.msra.mxu0 %v6361_v6  ;;  %4749 = vmatpush3.bf16.msra.mxu1 %v6144_v61 }
 0x220   : > { %4730 = vmatprep.subr.bf16.mxu0 %v5566_v22  ;;  %4750 = vmatprep.subr.bf16.mxu1 %v5566_v22 }
 0x223   : > { %4731 = vmatpush3.bf16.msra.mxu0 %v6367_v57  ;;  %4751 = vmatpush3.bf16.msra.mxu1 %v6152_v49 }
 0x224   : > { %4732 = vmatprep.subr.bf16.mxu0 %v5566_v22  ;;  %4752 = vmatprep.subr.bf16.mxu1 %v5566_v22 }
 0x227   : > { %4733 = vmatpush3.bf16.msra.mxu0 %v6373_v4  ;;  %4753 = vmatpush3.bf16.msra.mxu1 %v6160_v1 }
 0x228   : > { %4758 = vmatprep.subr.bf16.mxu0 %v5566_v22  ;;  %4778 = vmatprep.subr.bf16.mxu1 %v5566_v22 }
 0x22a   : > { %4735 = vmatmul.mubr.bf16.vlgmr.msra.gmra.mrb[36].mxu0 %v6172_v50  ;;  %4755 = vmatmul.mubr.bf16.vlgmr.msra.gmra.mrb[44].mxu1 %v2518_v48  ;;  %v6906_v50 = vld [vmem:[#allocation13_spill] sm:$0xff]  ;;  %v5358_v48 = vld [vmem:[#allocation8 + $0x8] sm:$0xff]  }
 0x22b   : > { %4759 = vmatpush3.bf16.msra.mxu0 %v6095_v12  ;;  %4774 = vmatprep.mubr.msk.bf16.mxu0 %vm5567_vm9, %v5566_v22  ;;  %v6907_v12 = vld [vmem:[#allocation14_spill] sm:$0xff] }
 0x22c   : > { %4760 = vmatprep.subr.bf16.mxu0 %v5566_v22  ;;  %4794 = vmatprep.mubr.msk.bf16.mxu1 %vm5567_vm9, %v5566_v22 }
 0x22f   : > { %4761 = vmatpush3.bf16.msra.mxu0 %v6904_v25  ;;  %v5359_v25 = vld [vmem:[#allocation8 + $0x10] sm:$0xff]  }
 0x230   : > { %4762 = vmatprep.subr.bf16.mxu0 %v5566_v22 }
 0x233   : > { %4763 = vmatpush3.bf16.msra.mxu0 %v6905_v14  ;;  %v5361_v14 = vld [vmem:[#allocation8 + $0x20] sm:$0xff]  }
 0x234   : > { %4764 = vmatprep.subr.bf16.mxu0 %v5566_v22 }
 0x237   : > { %4765 = vmatpush3.bf16.msra.mxu0 %v6906_v50  ;;  %v5362_v50 = vld [vmem:[#allocation8 + $0x28] sm:$0xff]  }
 0x238   : > { %4766 = vmatprep.subr.bf16.mxu0 %v5566_v22 }
 0x23b   : > { %4767 = vmatpush3.bf16.msra.mxu0 %v6907_v12 }
 0x23c   : > { %4768 = vmatprep.subr.bf16.mxu0 %v5566_v22 }
 0x23d   : > { %v1455_v13 = vpop.f32.mrb[12].mxu0  ;;  %v1543_v2 = vpop.f32.mrb[20].mxu1 }
 0x23e   : > { %v1544_v27 = vadd.f32 %v1543_v2, %v1455_v13  ;;  %v4496_v59 = vpop.f32.mrb[13].mxu0  ;;  %v4516_v53 = vpop.f32.mrb[21].mxu1 }
 0x23f   : > { %4769 = vmatpush3.bf16.msra.mxu0 %v6908_v29  ;;  %v1458_v31 = vpop.f32.mrb[14].mxu0  ;;  %v1546_v55 = vpop.f32.mrb[22].mxu1 }
 0x240   : > { %v4497_v28 = vpop.f32.mrb[15].mxu0  ;;  %v4517_v34 = vpop.f32.mrb[23].mxu1  ;;  %4770 = vmatprep.subr.bf16.mxu0 %v5566_v22  ;;  %v5363_v31 = vld [vmem:[#allocation8 + $0x30] sm:$0xff]  }
 0x243   : > { %4771 = vmatpush3.bf16.msra.mxu0 %v6909_v37 }
 0x244   : > { %4772 = vmatprep.subr.bf16.mxu0 %v5566_v22 }
 0x247   : > { %4773 = vmatpush3.bf16.msra.mxu0 %v6162_v5  ;;  %v5360_v5 = vld [vmem:[#allocation8 + $0x18] sm:$0xff]  }
 0x248   : > { %4798 = vmatprep.subr.bf16.mxu0 %v5566_v22 }
 0x24a   : > { %4775 = vmatmul.mubr.bf16.vlgmr.msra.gmra.mrb[40].mxu0 %v6401_v16 }
 0x24b   : > { %4799 = vmatpush3.bf16.msra.mxu0 %v5357_v7  ;;  %4814 = vmatprep.mubr.msk.bf16.mxu0 %vm5567_vm9, %v5566_v22 }
 0x24c   : > { %4800 = vmatprep.subr.bf16.mxu0 %v5566_v22 }
 0x24f   : > { %4801 = vmatpush3.bf16.msra.mxu0 %v5358_v48  ;;  %v6418_v48 = vld [vmem:[%s6874_s5] ss:$0 sm:$0xff] }
 0x250   : > { %4802 = vmatprep.subr.bf16.mxu0 %v5566_v22 }
 0x253   : > { %4803 = vmatpush3.bf16.msra.mxu0 %v5359_v25 }
 0x254   : > { %4804 = vmatprep.subr.bf16.mxu0 %v5566_v22 }
 0x257   : > { %4805 = vmatpush3.bf16.msra.mxu0 %v5360_v5 }
 0x258   : > { %4806 = vmatprep.subr.bf16.mxu0 %v5566_v22 }
 0x25b   : > { %4807 = vmatpush3.bf16.msra.mxu0 %v5361_v14 }
 0x25c   : > { %4808 = vmatprep.subr.bf16.mxu0 %v5566_v22 }
 0x25d   : > { %v1649_v12 = vpop.f32.mrb[16].mxu0  ;;  %v1756_v56 = vpop.f32.mrb[24].mxu1 }
 0x25e   : > { %v1655_v13 = vadd.f32 %v1649_v12, %v1544_v27  ;;  %v4536_v2 = vpop.f32.mrb[17].mxu0  ;;  %v4556_v59 = vpop.f32.mrb[25].mxu1 }
 0x25f   : > { %v1652_v53 = vpop.f32.mrb[18].mxu0  ;;  %v1759_v29 = vpop.f32.mrb[26].mxu1  ;;  %4809 = vmatpush3.bf16.msra.mxu0 %v5362_v50  ;;  %v5365_v2 = vld [vmem:[#allocation8 + $0x40] sm:$0xff]  }
 0x260   : > { %v1762_v55 = vadd.f32 %v1756_v56, %v1655_v13  ;;  %v4537_v28 = vpop.f32.mrb[19].mxu0  ;;  %v4557_v34 = vpop.f32.mrb[27].mxu1  ;;  %4810 = vmatprep.subr.bf16.mxu0 %v5566_v22  ;;  %4779 = vmatpush3.bf16.msra.mxu1 %v5365_v2  ;;  %v5367_v53 = vld [vmem:[#allocation8 + $0x48] sm:$0xff]   ;;  %v5368_v29 = vld [vmem:[#allocation8 + $0x50] sm:$0xff]  }
 0x261   : > { %4780 = vmatprep.subr.bf16.mxu1 %v5566_v22  ;;  %v5372_v28 = vld [vmem:[#allocation8 + $0x70] sm:$0xff]  }
 0x263   : > { %4811 = vmatpush3.bf16.msra.mxu0 %v5363_v31  ;;  %v5369_v31 = vld [vmem:[#allocation8 + $0x58] sm:$0xff]  }
 0x264   : > { %4812 = vmatprep.subr.bf16.mxu0 %v5566_v22  ;;  %4781 = vmatpush3.bf16.msra.mxu1 %v5367_v53 }
 0x265   : > { %4782 = vmatprep.subr.bf16.mxu1 %v5566_v22 }
 0x267   : > { %4813 = vmatpush3.bf16.msra.mxu0 %v5364_v36 }
 0x268   : > { %4838 = vmatprep.subr.bf16.mxu0 %v5566_v22  ;;  %4783 = vmatpush3.bf16.msra.mxu1 %v5368_v29 }
 0x269   : > { %4784 = vmatprep.subr.bf16.mxu1 %v5566_v22 }
 0x26c   : > { %4785 = vmatpush3.bf16.msra.mxu1 %v5369_v31 }
 0x26d   : > { %4786 = vmatprep.subr.bf16.mxu1 %v5566_v22 }
 0x27d   : > { %v1874_v37 = vpop.f32.mrb[20].mxu0  ;;  %v1992_v27 = vpop.f32.mrb[28].mxu1 }
 0x27e   : > { %v1880_v45 = vadd.f32 %v1874_v37, %v1762_v55  ;;  %v4576_v9 = vpop.f32.mrb[21].mxu0  ;;  %v4596_v7 = vpop.f32.mrb[29].mxu1 }
 0x27f   : > { %v1877_v25 = vpop.f32.mrb[22].mxu0  ;;  %v1995_v5 = vpop.f32.mrb[30].mxu1  ;;  %v5373_v9 = vld [vmem:[#allocation8 + $0x78] sm:$0xff]  }
 0x280   : > { %v1998_v14 = vadd.f32 %v1992_v27, %v1880_v45  ;;  %v4577_v50 = vpop.f32.mrb[23].mxu0  ;;  %v4597_v12 = vpop.f32.mrb[31].mxu1 }
 0x282   : > { %v2006_v56 = vadd.f32 %v6418_v48, %v1998_v14 }
 0x284   : > { %v2007_v13 = vmax.f32 %v2006_v56, 0.0 }
 0x286   : > { %v2008_v59 = vpack.c.bf16 %v2007_v13, %v2007_v13 }
 0x288   : > { %4815 = vmatmul.mubr.bf16.vlgmr.msra.gmra.mrb[44].mxu0 %v2008_v59 }
 0x289   : > { %4839 = vmatpush3.bf16.msra.mxu0 %v6170_v54  ;;  %4854 = vmatprep.mubr.msk.bf16.mxu0 %vm5567_vm9, %v5566_v22  ;;  %v5370_v54 = vld [vmem:[#allocation8 + $0x60] sm:$0xff]  }
 0x28a   : > { %4840 = vmatprep.subr.bf16.mxu0 %v5566_v22  ;;  %4787 = vmatpush3.bf16.msra.mxu1 %v5370_v54 }
 0x28b   : > { %4788 = vmatprep.subr.bf16.mxu1 %v5566_v22 }
 0x28d   : > { %4841 = vmatpush3.bf16.msra.mxu0 %v6179_v43  ;;  %v5371_v43 = vld [vmem:[#allocation8 + $0x68] sm:$0xff]  }
 0x28e   : > { %4842 = vmatprep.subr.bf16.mxu0 %v5566_v22  ;;  %4789 = vmatpush3.bf16.msra.mxu1 %v5371_v43 }
 0x28f   : > { %4790 = vmatprep.subr.bf16.mxu1 %v5566_v22 }
 0x291   : > { %4843 = vmatpush3.bf16.msra.mxu0 %v6189_v18 }
 0x292   : > { %4844 = vmatprep.subr.bf16.mxu0 %v5566_v22  ;;  %4791 = vmatpush3.bf16.msra.mxu1 %v5372_v28 }
 0x293   : > { %4792 = vmatprep.subr.bf16.mxu1 %v5566_v22 }
 0x295   : > { %4845 = vmatpush3.bf16.msra.mxu0 %v6195_v21 }
 0x296   : > { %4846 = vmatprep.subr.bf16.mxu0 %v5566_v22  ;;  %4793 = vmatpush3.bf16.msra.mxu1 %v5373_v9  ;;  %v6539_v9 = vld [vmem:[#allocation6 + $0x70] sm:$0xff]  }
 0x297   : > { %4818 = vmatprep.subr.bf16.mxu1 %v5566_v22 }
 0x299   : > { %4847 = vmatpush3.bf16.msra.mxu0 %v6202_v52 }
 0x29a   : > { %4848 = vmatprep.subr.bf16.mxu0 %v5566_v22 }
 0x29d   : > { %4849 = vmatpush3.bf16.msra.mxu0 %v6211_v58  ;;  %v2076_v18 = vpop.f32.mrb[24].mxu0  ;;  %v2164_v55 = vpop.f32.mrb[32].mxu1 }
 0x29e   : > { %v2165_v34 = vadd.f32 %v2164_v55, %v2076_v18  ;;  %v4616_v21 = vpop.f32.mrb[25].mxu0  ;;  %v4636_v36 = vpop.f32.mrb[33].mxu1  ;;  %4850 = vmatprep.subr.bf16.mxu0 %v5566_v22 }
 0x29f   : > { %v2079_v37 = vpop.f32.mrb[26].mxu0  ;;  %v2167_v27 = vpop.f32.mrb[34].mxu1  ;;  %v6513_v36 = vld [vmem:[#allocation6 + $0x40] sm:$0xff]  }
 0x2a0   : > { %v4617_v45 = vpop.f32.mrb[27].mxu0  ;;  %v4637_v52 = vpop.f32.mrb[35].mxu1  ;;  %v6523_v37 = vld [vmem:[#allocation6 + $0x50] sm:$0xff]   ;;  %v6527_v27 = vld [vmem:[#allocation6 + $0x58] sm:$0xff]  }
 0x2a1   : > { %4851 = vmatpush3.bf16.msra.mxu0 %v6217_v3  ;;  %v6531_v45 = vld [vmem:[#allocation6 + $0x60] sm:$0xff]   ;;  %v6535_v52 = vld [vmem:[#allocation6 + $0x68] sm:$0xff]  }
 0x2a2   : > { %4852 = vmatprep.subr.bf16.mxu0 %v5566_v22 }
 0x2a5   : > { %4853 = vmatpush3.bf16.msra.mxu0 %v6223_v23 }
 0x2a6   : > { %4878 = vmatprep.subr.bf16.mxu0 %v5566_v22 }
 0x2a8   : > { %4855 = vmatmul.mubr.bf16.vlgmr.msra.gmra.mrb[48].mxu0 %v6286_v33 }
 0x2a9   : > { %4879 = vmatpush3.bf16.msra.mxu0 %v6231_v63  ;;  %4894 = vmatprep.mubr.msk.bf16.mxu0 %vm5567_vm9, %v5566_v22 }
 0x2aa   : > { %4880 = vmatprep.subr.bf16.mxu0 %v5566_v22 }
 0x2ad   : > { %4881 = vmatpush3.bf16.msra.mxu0 %v6238_v62 }
 0x2ae   : > { %4882 = vmatprep.subr.bf16.mxu0 %v5566_v22 }
 0x2b1   : > { %4883 = vmatpush3.bf16.msra.mxu0 %v6248_v38 }
 0x2b2   : > { %4884 = vmatprep.subr.bf16.mxu0 %v5566_v22 }
 0x2b5   : > { %4885 = vmatpush3.bf16.msra.mxu0 %v6254_v20 }
 0x2b6   : > { %4886 = vmatprep.subr.bf16.mxu0 %v5566_v22 }
 0x2b9   : > { %4887 = vmatpush3.bf16.msra.mxu0 %v6260_v0  ;;  %v6467_v0 = vld [vmem:[#allocation6 + $0x140] sm:$0xff]  }
 0x2ba   : > { %4888 = vmatprep.subr.bf16.mxu0 %v5566_v22 }
 0x2bd   : > { %4889 = vmatpush3.bf16.msra.mxu0 %v6266_v24  ;;  %v2205_v58 = vpop.f32.mrb[28].mxu0  ;;  %v2311_v3 = vpop.f32.mrb[36].mxu1  ;;  %v6473_v24 = vld [vmem:[#allocation6 + $0x148] sm:$0xff]  }
 0x2be   : > { %v2211_v23 = vadd.f32 %v2205_v58, %v2165_v34  ;;  %v4656_v63 = vpop.f32.mrb[29].mxu0  ;;  %v4676_v62 = vpop.f32.mrb[37].mxu1  ;;  %4890 = vmatprep.subr.bf16.mxu0 %v5566_v22  ;;  %v6543_v58 = vld [vmem:[#allocation6 + $0x78] sm:$0xff]  }
 0x2bf   : > { %v2208_v38 = vpop.f32.mrb[30].mxu0  ;;  %v2314_v33 = vpop.f32.mrb[38].mxu1  ;;  %v6553_v63 = vld [vmem:[#allocation6 + $0x88] sm:$0xff]   ;;  %v6557_v62 = vld [vmem:[#allocation6 + $0x90] sm:$0xff]  }
 0x2c0   : > { %v2317_v7 = vadd.f32 %v2311_v3, %v2211_v23  ;;  %v4657_v25 = vpop.f32.mrb[31].mxu0  ;;  %v4677_v20 = vpop.f32.mrb[39].mxu1  ;;  %v2810_v3 = vld [vmem:[#allocation3 + $0x10] sm:$0x3]  ;;  %v6547_v23 = vld [vmem:[#allocation6 + $0x80] sm:$0xff]   ;;  %v6561_v38 = vld [vmem:[#allocation6 + $0x98] sm:$0xff]  }
 0x2c1   : > { %4891 = vmatpush3.bf16.msra.mxu0 %v6272_v26  ;;  %v6565_v33 = vld [vmem:[#allocation6 + $0xa0] sm:$0xff]  }
 0x2c2   : > { %4892 = vmatprep.subr.bf16.mxu0 %v5566_v22 }
 0x2c5   : > { %4893 = vmatpush3.bf16.msra.mxu0 %v6278_v30 }
 0x2c6   : > { %4918 = vmatprep.subr.bf16.mxu0 %v5566_v22 }
 0x2c8   : > { %4895 = vmatmul.mubr.bf16.vlgmr.msra.gmra.mrb[52].mxu0 %v6328_v10 }
 0x2c9   : > { %4919 = vmatpush3.bf16.msra.mxu0 %v6467_v0  ;;  %4934 = vmatprep.mubr.msk.bf16.mxu0 %vm5567_vm9, %v5566_v22 }
 0x2ca   : > { %4920 = vmatprep.subr.bf16.mxu0 %v5566_v22 }
 0x2cd   : > { %4921 = vmatpush3.bf16.msra.mxu0 %v6473_v24 }
 0x2ce   : > { %4922 = vmatprep.subr.bf16.mxu0 %v5566_v22 }
 0x2d1   : > { %4923 = vmatpush3.bf16.msra.mxu0 %v6043_v41 }
 0x2d2   : > { %4924 = vmatprep.subr.bf16.mxu0 %v5566_v22 }
 0x2d5   : > { %4925 = vmatpush3.bf16.msra.mxu0 %v6051_v46 }
 0x2d6   : > { %4926 = vmatprep.subr.bf16.mxu0 %v5566_v22 }
 0x2d9   : > { %4927 = vmatpush3.bf16.msra.mxu0 %v6061_v51  ;;  %v6489_v51 = vld [vmem:[#allocation2 + $0xa] sm:$0x3] }
 0x2da   : > { %4928 = vmatprep.subr.bf16.mxu0 %v5566_v22 }
 0x2dd   : > { %4929 = vmatpush3.bf16.msra.mxu0 %v6069_v60  ;;  %v2353_v26 = vpop.f32.mrb[32].mxu0  ;;  %v2395_v30 = vpop.f32.mrb[40].mxu1  ;;  %v5366_v60 = vld [vmem:[#allocation3 + $0x10] ss:$0 sps:$4 sm:$0x77]  }
 0x2de   : > { %v2359_v10 = vadd.f32 %v2353_v26, %v2317_v7  ;;  %v4696_v5 = vpop.f32.mrb[33].mxu0  ;;  %v4716_v14 = vpop.f32.mrb[41].mxu1  ;;  %4930 = vmatprep.subr.bf16.mxu0 %v5566_v22  ;;  %v6569_v7 = vld [vmem:[#allocation6 + $0xa8] sm:$0xff]  }
 0x2df   : > { %v2356_v41 = vpop.f32.mrb[34].mxu0  ;;  %v2398_v50 = vpop.f32.mrb[42].mxu1  ;;  %v6579_v5 = vld [vmem:[#allocation6 + $0xb8] sm:$0xff]   ;;  %v6583_v14 = vld [vmem:[#allocation3 + $0x14] sm:$0x3] }
 0x2e0   : > { %v2401_v12 = vadd.f32 %v2395_v30, %v2359_v10  ;;  %v4697_v56 = vpop.f32.mrb[35].mxu0  ;;  %v4717_v46 = vpop.f32.mrb[43].mxu1  ;;  %v6575_v10 = vld [vmem:[#allocation6 + $0xb0] sm:$0xff]   ;;  %v6586_v41 = vld [vmem:[#allocation6 + $0x100] sm:$0xff]   ;;  %v6592_v50 = vld [vmem:[#allocation6 + $0x108] sm:$0xff]  }
 0x2e1   : > { %4931 = vmatpush3.bf16.msra.mxu0 %v6077_v42  ;;  %v6600_v56 = vld [vmem:[#allocation6 + $0x118] sm:$0xff]   ;;  %v6604_v46 = vld [vmem:[#allocation6 + $0x120] sm:$0xff]  }
 0x2e2   : > { %4932 = vmatprep.subr.bf16.mxu0 %v5566_v22 }
 0x2e5   : > { %4933 = vmatpush3.bf16.msra.mxu0 %v6087_v8 }
 0x2e6   : > { %4958 = vmatprep.subr.bf16.mxu0 %v5566_v22 }
 0x2e8   : > { %4935 = vmatmul.mubr.bf16.vlgmr.msra.gmra.mrb[56].mxu0 %v6489_v51 }
 0x2e9   : > { %4959 = vmatpush3.bf16.msra.mxu0 %v6093_v11  ;;  %4974 = vmatprep.mubr.msk.bf16.mxu0 %vm5567_vm9, %v5566_v22 }
 0x2ea   : > { %4960 = vmatprep.subr.bf16.mxu0 %v5566_v22 }
 0x2ed   : > { %4961 = vmatpush3.bf16.msra.mxu0 %v6104_v44 }
 0x2ee   : > { %4962 = vmatprep.subr.bf16.mxu0 %v5566_v22 }
 0x2f1   : > { %4963 = vmatpush3.bf16.msra.mxu0 %v6116_v19  ;;  %v3106_v19 = vshll.u32 %v5366_v60, 16 }
 0x2f2   : > { %4964 = vmatprep.subr.bf16.mxu0 %v5566_v22 }
 0x2f3   : > { %v3108_v31 = vrot.slane %v3106_v19, 1  ;;  %v6618_v19 = vld [vmem:[#allocation6 + $0x138] sm:$0xff]  }
 0x2f5   : > { %4965 = vmatpush3.bf16.msra.mxu0 %v6124_v40 }
 0x2f6   : > { %4966 = vmatprep.subr.bf16.mxu0 %v5566_v22 }
 0x2f9   : > { %4967 = vmatpush3.bf16.msra.mxu0 %v6132_v47  ;;  %v3104_v47 = vshrl.u32 %v5366_v60, 16 }
 0x2fa   : > { %4968 = vmatprep.subr.bf16.mxu0 %v5566_v22 }
 0x2fd   : > { %4969 = vmatpush3.bf16.msra.mxu0 %v6144_v61  ;;  %v2501_v42 = vpop.f32.mrb[36].mxu0  ;;  %v2554_v8 = vpop.f32.mrb[44].mxu1  ;;  %v3109_v61 = vor.u32 %v3108_v31, %v3104_v47  ;;  %v6643_v47 = vld [vmem:[#allocation6 + $0x200] sm:$0xff]   ;;  %v6649_v31 = vld [vmem:[#allocation6 + $0x208] sm:$0xff]  }
 0x2fe   : > { %v2507_v11 = vadd.f32 %v2501_v42, %v2401_v12  ;;  %v4736_v44 = vpop.f32.mrb[37].mxu0  ;;  %v4756_v13 = vpop.f32.mrb[45].mxu1  ;;  %4970 = vmatprep.subr.bf16.mxu0 %v5566_v22  ;;  %v6596_v12 = vld [vmem:[#allocation6 + $0x110] sm:$0xff]   ;;  %v6610_v42 = vld [vmem:[#allocation6 + $0x128] sm:$0xff]  }
 0x2ff   : > { %v2504_v2 = vpop.f32.mrb[38].mxu0  ;;  %v2557_v59 = vpop.f32.mrb[46].mxu1  ;;  %v6614_v13 = vld [vmem:[#allocation6 + $0x130] sm:$0xff]  }
 0x300   : > { %v2560_v40 = vadd.f32 %v2554_v8, %v2507_v11  ;;  %v4737_v53 = vpop.f32.mrb[39].mxu0  ;;  %v4757_v29 = vpop.f32.mrb[47].mxu1  ;;  %v2974_v2 = vld [vmem:[#allocation2 + $0x8] sm:$0x3] }
 0x301   : > { %4971 = vmatpush3.bf16.msra.mxu0 %v6152_v49 }
 0x302   : > { %4972 = vmatprep.subr.bf16.mxu0 %v5566_v22 }
 0x305   : > { %4973 = vmatpush3.bf16.msra.mxu0 %v6160_v1  ;;  %v6519_v1 = vld [vmem:[#allocation6 + $0x48] sm:$0xff]  }
 0x306   : > { %4998 = vmatprep.subr.bf16.mxu0 %v5566_v22 }
 0x308   : > { %4975 = vmatmul.mubr.bf16.vlgmr.msra.gmra.mrb[60].mxu0 %v3109_v61  ;;  %v6653_v61 = vld [vmem:[#allocation6 + $0x210] sm:$0xff]  }
 0x309   : > { %5014 = vmatprep.mubr.msk.bf16.mxu0 %vm5567_vm9, %v5566_v22 }
 0x31d   : > { %v2607_v54 = vpop.f32.mrb[40].mxu0 }
 0x31e   : > { %v2613_v43 = vadd.f32 %v2607_v54, %v2560_v40  ;;  %v4776_v18 = vpop.f32.mrb[41].mxu0  ;;  %v6661_v54 = vld [vmem:[#allocation6 + $0x220] sm:$0xff]  }
 0x31f   : > { %v2610_v55 = vpop.f32.mrb[42].mxu0 }
 0x320   : > { %v2614_v28 = vadd.f32 %v6418_v48, %v2613_v43  ;;  %v4777_v49 = vpop.f32.mrb[43].mxu0  ;;  %v5374_v43 = vld [vmem:[#allocation3 + $0x14] ss:$0 sps:$4 sm:$0x77]   ;;  %v6667_v55 = vld [vmem:[#allocation6 + $0x228] sm:$0xff]  }
 0x321   : > { %v3159_v49 = vshll.u32 %v5374_v43, 16 }
 0x322   : > { %v2615_v34 = vmax.f32 %v2614_v28, 0.0 }
 0x324   : > { %v2616_v21 = vpack.c.bf16 %v2615_v34, %v2615_v34 }
 0x326   : > { %4795 = vmatmul.mubr.bf16.vlgmr.msra.gmra.mrb[48].mxu1 %v2616_v21 }
 0x327   : > { %4819 = vmatpush3.bf16.msra.mxu1 %v6513_v36  ;;  %4834 = vmatprep.mubr.msk.bf16.mxu1 %vm5567_vm9, %v5566_v22 }
 0x328   : > { %4820 = vmatprep.subr.bf16.mxu1 %v5566_v22 }
 0x32b   : > { %4821 = vmatpush3.bf16.msra.mxu1 %v6519_v1 }
 0x32c   : > { %4822 = vmatprep.subr.bf16.mxu1 %v5566_v22 }
 0x32f   : > { %4823 = vmatpush3.bf16.msra.mxu1 %v6523_v37 }
 0x330   : > { %4824 = vmatprep.subr.bf16.mxu1 %v5566_v22 }
 0x333   : > { %4825 = vmatpush3.bf16.msra.mxu1 %v6527_v27 }
 0x334   : > { %4826 = vmatprep.subr.bf16.mxu1 %v5566_v22 }
 0x337   : > { %4827 = vmatpush3.bf16.msra.mxu1 %v6531_v45 }
 0x338   : > { %4828 = vmatprep.subr.bf16.mxu1 %v5566_v22 }
 0x33b   : > { %4829 = vmatpush3.bf16.msra.mxu1 %v6535_v52 }
 0x33c   : > { %4830 = vmatprep.subr.bf16.mxu1 %v5566_v22 }
 0x33f   : > { %4831 = vmatpush3.bf16.msra.mxu1 %v6539_v9 }
 0x340   : > { %4832 = vmatprep.subr.bf16.mxu1 %v5566_v22 }
 0x343   : > { %4833 = vmatpush3.bf16.msra.mxu1 %v6543_v58 }
 0x344   : > { %4858 = vmatprep.subr.bf16.mxu1 %v5566_v22 }
 0x346   : > { %4835 = vmatmul.mubr.bf16.vlgmr.msra.gmra.mrb[52].mxu1 %v2810_v3  ;;  %v6671_v3 = vld [vmem:[#allocation6 + $0x230] sm:$0xff]  }
 0x347   : > { %4859 = vmatpush3.bf16.msra.mxu1 %v6547_v23  ;;  %4874 = vmatprep.mubr.msk.bf16.mxu1 %vm5567_vm9, %v5566_v22 }
 0x348   : > { %4860 = vmatprep.subr.bf16.mxu1 %v5566_v22 }
 0x34b   : > { %4861 = vmatpush3.bf16.msra.mxu1 %v6553_v63 }
 0x34c   : > { %4862 = vmatprep.subr.bf16.mxu1 %v5566_v22 }
 0x34f   : > { %4863 = vmatpush3.bf16.msra.mxu1 %v6557_v62 }
 0x350   : > { %4864 = vmatprep.subr.bf16.mxu1 %v5566_v22 }
 0x353   : > { %4865 = vmatpush3.bf16.msra.mxu1 %v6561_v38 }
 0x354   : > { %4866 = vmatprep.subr.bf16.mxu1 %v5566_v22 }
 0x357   : > { %4867 = vmatpush3.bf16.msra.mxu1 %v6565_v33 }
 0x358   : > { %4868 = vmatprep.subr.bf16.mxu1 %v5566_v22 }
 0x35b   : > { %4869 = vmatpush3.bf16.msra.mxu1 %v6569_v7  ;;  %v6572_v25 = vpop.f32.mrb[44].mxu0 }
 0x35c   : > { %v4816_v20 = vpop.f32.mrb[45].mxu0  ;;  %4870 = vmatprep.subr.bf16.mxu1 %v5566_v22 }
 0x35d   : > { %v2807_v26 = vpop.f32.mrb[46].mxu0  ;;  %v3157_v20 = vshrl.u32 %v5374_v43, 16 }
 0x35e   : > { %v4817_v30 = vpop.f32.mrb[47].mxu0  ;;  %v3161_v26 = vrot.slane %v3159_v49, 1 }
 0x35f   : > { %4871 = vmatpush3.bf16.msra.mxu1 %v6575_v10  ;;  %v6675_v30 = vld [vmem:[#allocation6 + $0x238] sm:$0xff]  }
 0x360   : > { %4872 = vmatprep.subr.bf16.mxu1 %v5566_v22 }
 0x363   : > { %4873 = vmatpush3.bf16.msra.mxu1 %v6579_v5 }
 0x364   : > { %4898 = vmatprep.subr.bf16.mxu1 %v5566_v22 }
 0x366   : > { %4875 = vmatmul.mubr.bf16.vlgmr.msra.gmra.mrb[56].mxu1 %v6583_v14 }
 0x367   : > { %4899 = vmatpush3.bf16.msra.mxu1 %v6586_v41  ;;  %4914 = vmatprep.mubr.msk.bf16.mxu1 %vm5567_vm9, %v5566_v22 }
 0x368   : > { %4900 = vmatprep.subr.bf16.mxu1 %v5566_v22 }
 0x36b   : > { %4901 = vmatpush3.bf16.msra.mxu1 %v6592_v50 }
 0x36c   : > { %4902 = vmatprep.subr.bf16.mxu1 %v5566_v22 }
 0x36f   : > { %4903 = vmatpush3.bf16.msra.mxu1 %v6596_v12 }
 0x370   : > { %4904 = vmatprep.subr.bf16.mxu1 %v5566_v22 }
 0x373   : > { %4905 = vmatpush3.bf16.msra.mxu1 %v6600_v56 }
 0x374   : > { %4906 = vmatprep.subr.bf16.mxu1 %v5566_v22 }
 0x377   : > { %4907 = vmatpush3.bf16.msra.mxu1 %v6604_v46 }
 0x378   : > { %4908 = vmatprep.subr.bf16.mxu1 %v5566_v22 }
 0x37b   : > { %v6608_v60 = vpop.f32.mrb[48].mxu0  ;;  %4909 = vmatpush3.bf16.msra.mxu1 %v6610_v42 }
 0x37c   : > { %v4856_v8 = vpop.f32.mrb[49].mxu0  ;;  %4910 = vmatprep.subr.bf16.mxu1 %v5566_v22 }
 0x37d   : > { %v2888_v11 = vpop.f32.mrb[50].mxu0  ;;  %v6678_v8 = vor.u32 %v3161_v26, %v3157_v20 }
 0x37e   : > { %v4857_v44 = vpop.f32.mrb[51].mxu0 }
 0x37f   : > { %4911 = vmatpush3.bf16.msra.mxu1 %v6614_v13 }
 0x380   : > { %4912 = vmatprep.subr.bf16.mxu1 %v5566_v22 }
 0x383   : > { %4913 = vmatpush3.bf16.msra.mxu1 %v6618_v19 }
 0x384   : > { %4938 = vmatprep.subr.bf16.mxu1 %v5566_v22 }
 0x386   : > { %4915 = vmatmul.mubr.bf16.vlgmr.msra.gmra.mrb[60].mxu1 %v2974_v2  ;;  %v5383_v2 = vld [vmem:[#allocation8 + $0xb8] sm:$0xff]  }
 0x387   : > { %4939 = vmatpush3.bf16.msra.mxu1 %v6324_v35  ;;  %4954 = vmatprep.mubr.msk.bf16.mxu1 %vm5567_vm9, %v5566_v22 }
 0x388   : > { %4940 = vmatprep.subr.bf16.mxu1 %v5566_v22 }
 0x38b   : > { %4941 = vmatpush3.bf16.msra.mxu1 %v6333_v15 }
 0x38c   : > { %4942 = vmatprep.subr.bf16.mxu1 %v5566_v22 }
 0x38f   : > { %4943 = vmatpush3.bf16.msra.mxu1 %v6343_v17 }
 0x390   : > { %4944 = vmatprep.subr.bf16.mxu1 %v5566_v22 }
 0x393   : > { %4945 = vmatpush3.bf16.msra.mxu1 %v6349_v32 }
 0x394   : > { %4946 = vmatprep.subr.bf16.mxu1 %v5566_v22 }
 0x397   : > { %4947 = vmatpush3.bf16.msra.mxu1 %v6355_v39 }
 0x398   : > { %4948 = vmatprep.subr.bf16.mxu1 %v5566_v22 }
 0x39b   : > { %v6634_v59 = vpop.f32.mrb[52].mxu0  ;;  %4949 = vmatpush3.bf16.msra.mxu1 %v6361_v6 }
 0x39c   : > { %v4896_v40 = vpop.f32.mrb[53].mxu0  ;;  %4950 = vmatprep.subr.bf16.mxu1 %v5566_v22 }
 0x39d   : > { %v2970_v53 = vpop.f32.mrb[54].mxu0 }
 0x39e   : > { %v4897_v29 = vpop.f32.mrb[55].mxu0 }
 0x39f   : > { %4951 = vmatpush3.bf16.msra.mxu1 %v6367_v57 }
 0x3a0   : > { %4952 = vmatprep.subr.bf16.mxu1 %v5566_v22 }
 0x3a3   : > { %4953 = vmatpush3.bf16.msra.mxu1 %v6373_v4 }
 0x3a4   : > { %4978 = vmatprep.subr.bf16.mxu1 %v5566_v22 }
 0x3a6   : > { %4955 = vmatmul.mubr.bf16.vlgmr.msra.gmra.mrb[64].mxu1 %v6401_v16  ;;  %v6657_v16 = vld [vmem:[#allocation6 + $0x218] sm:$0xff]  }
 0x3a7   : > { %4979 = vmatpush3.bf16.msra.mxu1 %v6643_v47  ;;  %4994 = vmatprep.mubr.msk.bf16.mxu1 %vm5567_vm9, %v5566_v22 }
 0x3a8   : > { %4980 = vmatprep.subr.bf16.mxu1 %v5566_v22 }
 0x3ab   : > { %4981 = vmatpush3.bf16.msra.mxu1 %v6649_v31 }
 0x3ac   : > { %4982 = vmatprep.subr.bf16.mxu1 %v5566_v22 }
 0x3af   : > { %4983 = vmatpush3.bf16.msra.mxu1 %v6653_v61 }
 0x3b0   : > { %4984 = vmatprep.subr.bf16.mxu1 %v5566_v22 }
 0x3b3   : > { %4985 = vmatpush3.bf16.msra.mxu1 %v6657_v16 }
 0x3b4   : > { %4986 = vmatprep.subr.bf16.mxu1 %v5566_v22 }
 0x3b7   : > { %4987 = vmatpush3.bf16.msra.mxu1 %v6661_v54 }
 0x3b8   : > { %4988 = vmatprep.subr.bf16.mxu1 %v5566_v22 }
 0x3bb   : > { %v6665_v18 = vpop.f32.mrb[56].mxu0  ;;  %4989 = vmatpush3.bf16.msra.mxu1 %v6667_v55 }
 0x3bc   : > { %v4936_v28 = vpop.f32.mrb[57].mxu0  ;;  %4990 = vmatprep.subr.bf16.mxu1 %v5566_v22 }
 0x3bd   : > { %v3054_v34 = vpop.f32.mrb[58].mxu0 }
 0x3be   : > { %v4937_v21 = vpop.f32.mrb[59].mxu0 }
 0x3bf   : > { %4991 = vmatpush3.bf16.msra.mxu1 %v6671_v3 }
 0x3c0   : > { %4992 = vmatprep.subr.bf16.mxu1 %v5566_v22 }
 0x3c3   : > { %4993 = vmatpush3.bf16.msra.mxu1 %v6675_v30 }
 0x3c4   : > { %5018 = vmatprep.subr.bf16.mxu1 %v5566_v22 }
 0x3c6   : > { %4995 = vmatmul.mubr.bf16.vlgmr.msra.gmra.mrb[68].mxu1 %v6678_v8 }
 0x3c7   : > { %5019 = vmatpush3.bf16.msra.mxu1 %v6513_v36  ;;  %5034 = vmatprep.mubr.msk.bf16.mxu1 %vm5567_vm9, %v5566_v22 }
 0x3c8   : > { %5020 = vmatprep.subr.bf16.mxu1 %v5566_v22 }
 0x3cb   : > { %5021 = vmatpush3.bf16.msra.mxu1 %v6519_v1 }
 0x3cc   : > { %5022 = vmatprep.subr.bf16.mxu1 %v5566_v22 }
 0x3cf   : > { %5023 = vmatpush3.bf16.msra.mxu1 %v6523_v37  ;;  %v3314_v37 = vld [vmem:[#allocation3 + $0x18] sm:$0x3] }
 0x3d0   : > { %5024 = vmatprep.subr.bf16.mxu1 %v5566_v22 }
 0x3d3   : > { %5025 = vmatpush3.bf16.msra.mxu1 %v6527_v27 }
 0x3d4   : > { %5026 = vmatprep.subr.bf16.mxu1 %v5566_v22 }
 0x3d7   : > { %5027 = vmatpush3.bf16.msra.mxu1 %v6531_v45 }
 0x3d8   : > { %5028 = vmatprep.subr.bf16.mxu1 %v5566_v22 }
 0x3db   : > { %v6694_v36 = vpop.f32.mrb[60].mxu0  ;;  %5029 = vmatpush3.bf16.msra.mxu1 %v6535_v52 }
 0x3dc   : > { %v4976_v11 = vpop.f32.mrb[61].mxu0  ;;  %5030 = vmatprep.subr.bf16.mxu1 %v5566_v22 }
 0x3dd   : > { %v3148_v1 = vpop.f32.mrb[62].mxu0  ;;  %v5431_v11 = vld [vmem:[#allocation6 + $0x20] sm:$0xff]  }
 0x3de   : > { %v4977_v44 = vpop.f32.mrb[63].mxu0  ;;  %v5432_v1 = vld [vmem:[#allocation6 + $0x28] sm:$0xff]  }
 0x3df   : > { %5031 = vmatpush3.bf16.msra.mxu1 %v6539_v9 }
 0x3e0   : > { %5032 = vmatprep.subr.bf16.mxu1 %v5566_v22 }
 0x3e3   : > { %5033 = vmatpush3.bf16.msra.mxu1 %v6543_v58 }
 0x3e4   : > { %5058 = vmatprep.subr.bf16.mxu1 %v5566_v22 }
 0x3e6   : > { %5035 = vmatmul.mubr.bf16.vlgmr.msra.gmra.mrb[72].mxu1 %v3314_v37 }
 0x3e7   : > { %5059 = vmatpush3.bf16.msra.mxu1 %v6547_v23  ;;  %5074 = vmatprep.mubr.msk.bf16.mxu1 %vm5567_vm9, %v5566_v22  ;;  %v5376_v23 = vld [vmem:[#allocation8 + $0x80] sm:$0xff]  }
 0x3e8   : > { %5060 = vmatprep.subr.bf16.mxu1 %v5566_v22  ;;  %4999 = vmatpush3.bf16.msra.mxu0 %v5376_v23  ;;  %v5435_v23 = vld [vmem:[#allocation6 + $0xc0] sm:$0xff]  }
 0x3e9   : > { %5000 = vmatprep.subr.bf16.mxu0 %v5566_v22 }
 0x3eb   : > { %5061 = vmatpush3.bf16.msra.mxu1 %v6553_v63  ;;  %v5377_v63 = vld [vmem:[#allocation8 + $0x88] sm:$0xff]  }
 0x3ec   : > { %5062 = vmatprep.subr.bf16.mxu1 %v5566_v22  ;;  %5001 = vmatpush3.bf16.msra.mxu0 %v5377_v63  ;;  %v5436_v63 = vld [vmem:[#allocation6 + $0xc8] sm:$0xff]  }
 0x3ed   : > { %5002 = vmatprep.subr.bf16.mxu0 %v5566_v22 }
 0x3ef   : > { %5063 = vmatpush3.bf16.msra.mxu1 %v6557_v62  ;;  %v5378_v62 = vld [vmem:[#allocation8 + $0x90] sm:$0xff]  }
 0x3f0   : > { %5064 = vmatprep.subr.bf16.mxu1 %v5566_v22  ;;  %5003 = vmatpush3.bf16.msra.mxu0 %v5378_v62  ;;  %v5437_v62 = vld [vmem:[#allocation6 + $0xd0] sm:$0xff]  }
 0x3f1   : > { %5004 = vmatprep.subr.bf16.mxu0 %v5566_v22 }
 0x3f3   : > { %5065 = vmatpush3.bf16.msra.mxu1 %v6561_v38  ;;  %v3395_v38 = vld [vmem:[#allocation3 + $0x1c] sm:$0x3] }
 0x3f4   : > { %5066 = vmatprep.subr.bf16.mxu1 %v5566_v22 }
 0x3f7   : > { %5067 = vmatpush3.bf16.msra.mxu1 %v6565_v33  ;;  %v5379_v33 = vld [vmem:[#allocation8 + $0x98] sm:$0xff]  }
 0x3f8   : > { %5068 = vmatprep.subr.bf16.mxu1 %v5566_v22  ;;  %5005 = vmatpush3.bf16.msra.mxu0 %v5379_v33  ;;  %v5440_v33 = vld [vmem:[#allocation6 + $0xe8] sm:$0xff]  }
 0x3f9   : > { %v2716_v27 = vpop.f32.mrb[48].mxu1  ;;  %5006 = vmatprep.subr.bf16.mxu0 %v5566_v22 }
 0x3fa   : > { %v6715_v45 = vadd.f32 %v6572_v25, %v2716_v27  ;;  %v4796_v52 = vpop.f32.mrb[49].mxu1  ;;  %v5381_v25 = vld [vmem:[#allocation8 + $0xa8] sm:$0xff]   ;;  %v5433_v27 = vld [vmem:[#allocation6 + $0x30] sm:$0xff]  }
 0x3fb   : > { %5069 = vmatpush3.bf16.msra.mxu1 %v6569_v7  ;;  %v2719_v9 = vpop.f32.mrb[50].mxu1  ;;  %v5380_v7 = vld [vmem:[#allocation8 + $0xa0] sm:$0xff]  }
 0x3fc   : > { %v4797_v58 = vpop.f32.mrb[51].mxu1  ;;  %5070 = vmatprep.subr.bf16.mxu1 %v5566_v22  ;;  %5007 = vmatpush3.bf16.msra.mxu0 %v5380_v7 }
 0x3fd   : > { %5008 = vmatprep.subr.bf16.mxu0 %v5566_v22  ;;  %v5434_v58 = vld [vmem:[#allocation6 + $0x38] sm:$0xff]  }
 0x3ff   : > { %5071 = vmatpush3.bf16.msra.mxu1 %v6575_v10  ;;  %v5382_v10 = vld [vmem:[#allocation8 + $0xb0] sm:$0xff]  }
 0x400   : > { %5072 = vmatprep.subr.bf16.mxu1 %v5566_v22  ;;  %5009 = vmatpush3.bf16.msra.mxu0 %v5381_v25 }
 0x401   : > { %5010 = vmatprep.subr.bf16.mxu0 %v5566_v22 }
 0x403   : > { %5073 = vmatpush3.bf16.msra.mxu1 %v6579_v5 }
 0x404   : > { %5098 = vmatprep.subr.bf16.mxu1 %v5566_v22  ;;  %5011 = vmatpush3.bf16.msra.mxu0 %v5382_v10  ;;  %v5441_v10 = vld [vmem:[#allocation6 + $0xf0] sm:$0xff]  }
 0x405   : > { %5012 = vmatprep.subr.bf16.mxu0 %v5566_v22 }
 0x406   : > { %5075 = vmatmul.mubr.bf16.vlgmr.msra.gmra.mrb[76].mxu1 %v3395_v38  ;;  %v5438_v38 = vld [vmem:[#allocation6 + $0xd8] sm:$0xff]  }
 0x407   : > { %5099 = vmatpush3.bf16.msra.mxu1 %v6586_v41  ;;  %5114 = vmatprep.mubr.msk.bf16.mxu1 %vm5567_vm9, %v5566_v22 }
 0x408   : > { %5100 = vmatprep.subr.bf16.mxu1 %v5566_v22  ;;  %5013 = vmatpush3.bf16.msra.mxu0 %v5383_v2 }
 0x409   : > { %5038 = vmatprep.subr.bf16.mxu0 %v5566_v22 }
 0x40b   : > { %5101 = vmatpush3.bf16.msra.mxu1 %v6592_v50 }
 0x40c   : > { %5102 = vmatprep.subr.bf16.mxu1 %v5566_v22 }
 0x40f   : > { %5103 = vmatpush3.bf16.msra.mxu1 %v6596_v12 }
 0x410   : > { %5104 = vmatprep.subr.bf16.mxu1 %v5566_v22 }
 0x413   : > { %5105 = vmatpush3.bf16.msra.mxu1 %v6600_v56 }
 0x414   : > { %5106 = vmatprep.subr.bf16.mxu1 %v5566_v22 }
 0x417   : > { %5107 = vmatpush3.bf16.msra.mxu1 %v6604_v46  ;;  %v3478_v46 = vld [vmem:[#allocation2 + $0xc] sm:$0x3] }
 0x418   : > { %5108 = vmatprep.subr.bf16.mxu1 %v5566_v22 }
 0x419   : > { %v2845_v5 = vpop.f32.mrb[52].mxu1 }
 0x41a   : > { %v2886_v41 = vadd.f32 %v6608_v60, %v2845_v5  ;;  %v4836_v50 = vpop.f32.mrb[53].mxu1 }
 0x41b   : > { %v2848_v12 = vpop.f32.mrb[54].mxu1  ;;  %5109 = vmatpush3.bf16.msra.mxu1 %v6610_v42  ;;  %v5442_v50 = vld [vmem:[#allocation6 + $0xf8] sm:$0xff]  }
 0x41c   : > { %v4837_v56 = vpop.f32.mrb[55].mxu1  ;;  %5110 = vmatprep.subr.bf16.mxu1 %v5566_v22  ;;  %v5443_v12 = vld [vmem:[#allocation6 + $0x150] sm:$0xff]  }
 0x41d   : > { %v5444_v56 = vld [vmem:[#allocation6 + $0x158] sm:$0xff]  }
 0x41f   : > { %5111 = vmatpush3.bf16.msra.mxu1 %v6614_v13 }
 0x420   : > { %5112 = vmatprep.subr.bf16.mxu1 %v5566_v22 }
 0x423   : > { %5113 = vmatpush3.bf16.msra.mxu1 %v6618_v19 }
 0x424   : > { %5138 = vmatprep.subr.bf16.mxu1 %v5566_v22 }
 0x426   : > { %5115 = vmatmul.mubr.bf16.vlgmr.msra.gmra.mrb[80].mxu1 %v3478_v46  ;;  %v5447_v46 = vld [vmem:[#allocation6 + $0x170] sm:$0xff]  }
 0x427   : > { %5139 = vmatpush3.bf16.msra.mxu1 %v6324_v35  ;;  %5154 = vmatprep.mubr.msk.bf16.mxu1 %vm5567_vm9, %v5566_v22 }
 0x428   : > { %5140 = vmatprep.subr.bf16.mxu1 %v5566_v22 }
 0x42b   : > { %5141 = vmatpush3.bf16.msra.mxu1 %v6333_v15 }
 0x42c   : > { %5142 = vmatprep.subr.bf16.mxu1 %v5566_v22 }
 0x42f   : > { %5143 = vmatpush3.bf16.msra.mxu1 %v6343_v17 }
 0x430   : > { %5144 = vmatprep.subr.bf16.mxu1 %v5566_v22 }
 0x433   : > { %5145 = vmatpush3.bf16.msra.mxu1 %v6349_v32  ;;  %v5375_v32 = vld [vmem:[#allocation3 + $0x1c] ss:$0 sps:$4 sm:$0x77]  }
 0x434   : > { %5146 = vmatprep.subr.bf16.mxu1 %v5566_v22  ;;  %v3661_v53 = vshrl.u32 %v5375_v32, 16 }
 0x437   : > { %5147 = vmatpush3.bf16.msra.mxu1 %v6355_v39 }
 0x438   : > { %5148 = vmatprep.subr.bf16.mxu1 %v5566_v22 }
 0x439   : > { %v2926_v35 = vpop.f32.mrb[56].mxu1 }
 0x43a   : > { %v2932_v60 = vadd.f32 %v2926_v35, %v2886_v41  ;;  %v4876_v42 = vpop.f32.mrb[57].mxu1 }
 0x43b   : > { %v2929_v13 = vpop.f32.mrb[58].mxu1  ;;  %5149 = vmatpush3.bf16.msra.mxu1 %v6361_v6  ;;  %v5448_v42 = vld [vmem:[#allocation6 + $0x178] sm:$0xff]  }
 0x43c   : > { %v4877_v15 = vpop.f32.mrb[59].mxu1  ;;  %5150 = vmatprep.subr.bf16.mxu1 %v5566_v22  ;;  %v2973_v17 = vadd.f32 %v6634_v59, %v2932_v60  ;;  %v3663_v59 = vshll.u32 %v5375_v32, 16  ;;  %v3520_v13 = vld [vmem:[#allocation2 + $0xe] sm:$0x3]  ;;  %v5451_v32 = vld [vmem:[#allocation6 + $0x1d0] sm:$0xff]  }
 0x43d   : > { %v5449_v15 = vld [vmem:[#allocation6 + $0x1c0] sm:$0xff]  }
 0x43e   : > { %v3665_v29 = vrot.slane %v3663_v59, 1 }
 0x43f   : > { %5151 = vmatpush3.bf16.msra.mxu1 %v6367_v57 }
 0x440   : > { %5152 = vmatprep.subr.bf16.mxu1 %v5566_v22 }
 0x443   : > { %5153 = vmatpush3.bf16.msra.mxu1 %v6373_v4 }
 0x444   : > { %5178 = vmatprep.subr.bf16.mxu1 %v5566_v22 }
 0x446   : > { %5155 = vmatmul.mubr.bf16.vlgmr.msra.gmra.mrb[84].mxu1 %v6678_v8  ;;  %v5428_v8 = vld [vmem:[#allocation6 + $0x8] sm:$0xff]  }
 0x447   : > { %5179 = vmatpush3.bf16.msra.mxu1 %v6643_v47  ;;  %5194 = vmatprep.mubr.msk.bf16.mxu1 %vm5567_vm9, %v5566_v22  ;;  %v3666_v47 = vor.u32 %v3665_v29, %v3661_v53  ;;  %v5455_v53 = vld [vmem:[#allocation6 + $0x1f0] sm:$0xff]  }
 0x448   : > { %5180 = vmatprep.subr.bf16.mxu1 %v5566_v22 }
 0x44b   : > { %5181 = vmatpush3.bf16.msra.mxu1 %v6649_v31 }
 0x44c   : > { %5182 = vmatprep.subr.bf16.mxu1 %v5566_v22 }
 0x44f   : > { %5183 = vmatpush3.bf16.msra.mxu1 %v6653_v61 }
 0x450   : > { %5184 = vmatprep.subr.bf16.mxu1 %v5566_v22 }
 0x453   : > { %5185 = vmatpush3.bf16.msra.mxu1 %v6657_v16 }
 0x454   : > { %5186 = vmatprep.subr.bf16.mxu1 %v5566_v22 }
 0x457   : > { %5187 = vmatpush3.bf16.msra.mxu1 %v6661_v54 }
 0x458   : > { %5188 = vmatprep.subr.bf16.mxu1 %v5566_v22 }
 0x459   : > { %v3009_v39 = vpop.f32.mrb[60].mxu1 }
 0x45a   : > { %v3015_v6 = vadd.f32 %v3009_v39, %v2973_v17  ;;  %v4916_v57 = vpop.f32.mrb[61].mxu1  ;;  %v5450_v17 = vld [vmem:[#allocation6 + $0x1c8] sm:$0xff]   ;;  %v5452_v39 = vld [vmem:[#allocation6 + $0x1d8] sm:$0xff]  }
 0x45b   : > { %v3012_v4 = vpop.f32.mrb[62].mxu1  ;;  %5189 = vmatpush3.bf16.msra.mxu1 %v6667_v55  ;;  %v5384_v57 = vld [vmem:[#allocation3 + $0x18] ss:$0 sps:$4 sm:$0x77]  }
 0x45c   : > { %v4917_v19 = vpop.f32.mrb[63].mxu1  ;;  %5190 = vmatprep.subr.bf16.mxu1 %v5566_v22  ;;  %v3057_v40 = vadd.f32 %v6665_v18, %v3015_v6  ;;  %v5453_v6 = vld [vmem:[#allocation6 + $0x1e0] sm:$0xff]   ;;  %v5454_v4 = vld [vmem:[#allocation6 + $0x1e8] sm:$0xff]  }
 0x45d   : > { %v3610_v19 = vshll.u32 %v5384_v57, 16 }
 0x45f   : > { %5191 = vmatpush3.bf16.msra.mxu1 %v6671_v3 }
 0x460   : > { %5192 = vmatprep.subr.bf16.mxu1 %v5566_v22 }
 0x463   : > { %5193 = vmatpush3.bf16.msra.mxu1 %v6675_v30  ;;  %v5427_v30 = vld [vmem:[#allocation6] sm:$0xff]  }
 0x466   : > { %5195 = vmatmul.mubr.bf16.vlgmr.msra.gmra.mrb[88].mxu1 %v3666_v47 }
 0x479   : > { %v3092_v31 = vpop.f32.mrb[64].mxu1 }
 0x47a   : > { %v3098_v61 = vadd.f32 %v3092_v31, %v3057_v40  ;;  %v4956_v16 = vpop.f32.mrb[65].mxu1  ;;  %v3608_v31 = vshrl.u32 %v5384_v57, 16 }
 0x47b   : > { %v3095_v54 = vpop.f32.mrb[66].mxu1  ;;  %v5456_v16 = vld [vmem:[#allocation6 + $0x1f8] sm:$0xff]  }
 0x47c   : > { %v4957_v43 = vpop.f32.mrb[67].mxu1  ;;  %v3151_v55 = vadd.f32 %v6694_v36, %v3098_v61  ;;  %v5429_v36 = vld [vmem:[#allocation6 + $0x10] sm:$0xff]   ;;  %v3612_v61 = vrot.slane %v3610_v19, 1 }
 0x47e   : > { %v3613_v54 = vor.u32 %v3612_v61, %v3608_v31 }
 0x499   : > { %v3198_v28 = vpop.f32.mrb[68].mxu1 }
 0x49a   : > { %v3204_v49 = vadd.f32 %v3198_v28, %v3151_v55  ;;  %v4996_v18 = vpop.f32.mrb[69].mxu1 }
 0x49b   : > { %v3201_v34 = vpop.f32.mrb[70].mxu1  ;;  %v5385_v18 = vld [vmem:[#allocation8 + $0xc0] sm:$0xff]  }
 0x49c   : > { %v3205_v21 = vadd.f32 %v6418_v48, %v3204_v49  ;;  %v4997_v3 = vpop.f32.mrb[71].mxu1  ;;  %v5430_v48 = vld [vmem:[#allocation6 + $0x18] sm:$0xff]   ;;  %v5386_v34 = vld [vmem:[#allocation8 + $0xc8] sm:$0xff]  }
 0x49d   : > { %v5388_v3 = vld [vmem:[#allocation8 + $0xd8] sm:$0xff]  }
 0x49e   : > { %v3206_v20 = vmax.f32 %v3205_v21, 0.0  ;;  %v5387_v21 = vld [vmem:[#allocation8 + $0xd0] sm:$0xff]  }
 0x4a0   : > { %v3207_v26 = vpack.c.bf16 %v3206_v20, %v3206_v20  ;;  %v5389_v20 = vld [vmem:[#allocation8 + $0xe0] sm:$0xff]  }
 0x4a2   : > { %5015 = vmatmul.mubr.bf16.vlgmr.msra.gmra.mrb[64].mxu0 %v3207_v26  ;;  %v5390_v26 = vld [vmem:[#allocation8 + $0xe8] sm:$0xff]  }
 0x4a3   : > { %5039 = vmatpush3.bf16.msra.mxu0 %v5427_v30  ;;  %5054 = vmatprep.mubr.msk.bf16.mxu0 %vm5567_vm9, %v5566_v22 }
 0x4a4   : > { %5040 = vmatprep.subr.bf16.mxu0 %v5566_v22 }
 0x4a7   : > { %5041 = vmatpush3.bf16.msra.mxu0 %v5428_v8 }
 0x4a8   : > { %5042 = vmatprep.subr.bf16.mxu0 %v5566_v22 }
 0x4ab   : > { %5043 = vmatpush3.bf16.msra.mxu0 %v5429_v36 }
 0x4ac   : > { %5044 = vmatprep.subr.bf16.mxu0 %v5566_v22 }
 0x4af   : > { %5045 = vmatpush3.bf16.msra.mxu0 %v5430_v48 }
 0x4b0   : > { %5046 = vmatprep.subr.bf16.mxu0 %v5566_v22 }
 0x4b3   : > { %5047 = vmatpush3.bf16.msra.mxu0 %v5431_v11  ;;  %v5391_v11 = vld [vmem:[#allocation8 + $0xf0] sm:$0xff]  }
 0x4b4   : > { %5048 = vmatprep.subr.bf16.mxu0 %v5566_v22 }
 0x4b7   : > { %5049 = vmatpush3.bf16.msra.mxu0 %v5432_v1 }
 0x4b8   : > { %5050 = vmatprep.subr.bf16.mxu0 %v5566_v22 }
 0x4b9   : > { %v6798_v44 = vpop.f32.mrb[72].mxu1 }
 0x4ba   : > { %v5036_v37 = vpop.f32.mrb[73].mxu1 }
 0x4bb   : > { %5051 = vmatpush3.bf16.msra.mxu0 %v5433_v27  ;;  %v3352_v52 = vpop.f32.mrb[74].mxu1  ;;  %v5392_v37 = vld [vmem:[#allocation8 + $0xf8] sm:$0xff]  }
 0x4bc   : > { %v5037_v9 = vpop.f32.mrb[75].mxu1  ;;  %5052 = vmatprep.subr.bf16.mxu0 %v5566_v22 }
 0x4bf   : > { %5053 = vmatpush3.bf16.msra.mxu0 %v5434_v58 }
 0x4c0   : > { %5078 = vmatprep.subr.bf16.mxu0 %v5566_v22 }
 0x4c2   : > { %5055 = vmatmul.mubr.bf16.vlgmr.msra.gmra.mrb[68].mxu0 %v6583_v14  ;;  %v5439_v14 = vld [vmem:[#allocation6 + $0xe0] sm:$0xff]  }
 0x4c3   : > { %5079 = vmatpush3.bf16.msra.mxu0 %v5435_v23  ;;  %5094 = vmatprep.mubr.msk.bf16.mxu0 %vm5567_vm9, %v5566_v22 }
 0x4c4   : > { %5080 = vmatprep.subr.bf16.mxu0 %v5566_v22 }
 0x4c7   : > { %5081 = vmatpush3.bf16.msra.mxu0 %v5436_v63 }
 0x4c8   : > { %5082 = vmatprep.subr.bf16.mxu0 %v5566_v22 }
 0x4cb   : > { %5083 = vmatpush3.bf16.msra.mxu0 %v5437_v62 }
 0x4cc   : > { %5084 = vmatprep.subr.bf16.mxu0 %v5566_v22 }
 0x4cf   : > { %5085 = vmatpush3.bf16.msra.mxu0 %v5438_v38 }
 0x4d0   : > { %5086 = vmatprep.subr.bf16.mxu0 %v5566_v22 }
 0x4d3   : > { %5087 = vmatpush3.bf16.msra.mxu0 %v5439_v14 }
 0x4d4   : > { %5088 = vmatprep.subr.bf16.mxu0 %v5566_v22 }
 0x4d7   : > { %5089 = vmatpush3.bf16.msra.mxu0 %v5440_v33 }
 0x4d8   : > { %5090 = vmatprep.subr.bf16.mxu0 %v5566_v22 }
 0x4d9   : > { %v6811_v7 = vpop.f32.mrb[76].mxu1 }
 0x4da   : > { %v5076_v25 = vpop.f32.mrb[77].mxu1 }
 0x4db   : > { %5091 = vmatpush3.bf16.msra.mxu0 %v5441_v10  ;;  %v3433_v5 = vpop.f32.mrb[78].mxu1 }
 0x4dc   : > { %v5077_v41 = vpop.f32.mrb[79].mxu1  ;;  %5092 = vmatprep.subr.bf16.mxu0 %v5566_v22 }
 0x4df   : > { %5093 = vmatpush3.bf16.msra.mxu0 %v5442_v50 }
 0x4e0   : > { %5118 = vmatprep.subr.bf16.mxu0 %v5566_v22 }
 0x4e2   : > { %5095 = vmatmul.mubr.bf16.vlgmr.msra.gmra.mrb[72].mxu0 %v6489_v51  ;;  %v5445_v51 = vld [vmem:[#allocation6 + $0x160] sm:$0xff]  }
 0x4e3   : > { %5119 = vmatpush3.bf16.msra.mxu0 %v6467_v0  ;;  %5134 = vmatprep.mubr.msk.bf16.mxu0 %vm5567_vm9, %v5566_v22  ;;  %v5446_v0 = vld [vmem:[#allocation6 + $0x168] sm:$0xff]  }
 0x4e4   : > { %5120 = vmatprep.subr.bf16.mxu0 %v5566_v22 }
 0x4e7   : > { %5121 = vmatpush3.bf16.msra.mxu0 %v6473_v24 }
 0x4e8   : > { %5122 = vmatprep.subr.bf16.mxu0 %v5566_v22 }
 0x4eb   : > { %5123 = vmatpush3.bf16.msra.mxu0 %v5443_v12 }
 0x4ec   : > { %5124 = vmatprep.subr.bf16.mxu0 %v5566_v22 }
 0x4ef   : > { %5125 = vmatpush3.bf16.msra.mxu0 %v5444_v56 }
 0x4f0   : > { %5126 = vmatprep.subr.bf16.mxu0 %v5566_v22 }
 0x4f3   : > { %5127 = vmatpush3.bf16.msra.mxu0 %v5445_v51 }
 0x4f4   : > { %5128 = vmatprep.subr.bf16.mxu0 %v5566_v22 }
 0x4f7   : > { %5129 = vmatpush3.bf16.msra.mxu0 %v5446_v0 }
 0x4f8   : > { %5130 = vmatprep.subr.bf16.mxu0 %v5566_v22 }
 0x4f9   : > { %v6826_v2 = vpop.f32.mrb[80].mxu1 }
 0x4fa   : > { %v5116_v24 = vpop.f32.mrb[81].mxu1 }
 0x4fb   : > { %5131 = vmatpush3.bf16.msra.mxu0 %v5447_v46  ;;  %v3516_v35 = vpop.f32.mrb[82].mxu1  ;;  %v5457_v46 = vld [vmem:[%s6874_s5] ss:$0 sm:$0xff] }
 0x4fc   : > { %v5117_v60 = vpop.f32.mrb[83].mxu1  ;;  %5132 = vmatprep.subr.bf16.mxu0 %v5566_v22 }
 0x4ff   : > { %5133 = vmatpush3.bf16.msra.mxu0 %v5448_v42 }
 0x500   : > { %5158 = vmatprep.subr.bf16.mxu0 %v5566_v22 }
 0x502   : > { %5135 = vmatmul.mubr.bf16.vlgmr.msra.gmra.mrb[76].mxu0 %v3520_v13  ;;  %v4138_v13 = vld [vmem:[%s6876_s7] ss:$0 sm:$0xff] }
 0x503   : > { %5159 = vmatpush3.bf16.msra.mxu0 %v5449_v15  ;;  %5174 = vmatprep.mubr.msk.bf16.mxu0 %vm5567_vm9, %v5566_v22 }
 0x504   : > { %5160 = vmatprep.subr.bf16.mxu0 %v5566_v22 }
 0x507   : > { %5161 = vmatpush3.bf16.msra.mxu0 %v5450_v17 }
 0x508   : > { %5162 = vmatprep.subr.bf16.mxu0 %v5566_v22 }
 0x50b   : > { %5163 = vmatpush3.bf16.msra.mxu0 %v5451_v32 }
 0x50c   : > { %5164 = vmatprep.subr.bf16.mxu0 %v5566_v22 }
 0x50f   : > { %5165 = vmatpush3.bf16.msra.mxu0 %v5452_v39 }
 0x510   : > { %5166 = vmatprep.subr.bf16.mxu0 %v5566_v22 }
 0x513   : > { %5167 = vmatpush3.bf16.msra.mxu0 %v5453_v6 }
 0x514   : > { %5168 = vmatprep.subr.bf16.mxu0 %v5566_v22 }
 0x517   : > { %5169 = vmatpush3.bf16.msra.mxu0 %v5454_v4 }
 0x518   : > { %5170 = vmatprep.subr.bf16.mxu0 %v5566_v22 }
 0x519   : > { %v6838_v59 = vpop.f32.mrb[84].mxu1 }
 0x51a   : > { %v5156_v40 = vpop.f32.mrb[85].mxu1 }
 0x51b   : > { %5171 = vmatpush3.bf16.msra.mxu0 %v5455_v53  ;;  %v3599_v29 = vpop.f32.mrb[86].mxu1 }
 0x51c   : > { %v5157_v47 = vpop.f32.mrb[87].mxu1  ;;  %5172 = vmatprep.subr.bf16.mxu0 %v5566_v22 }
 0x51f   : > { %5173 = vmatpush3.bf16.msra.mxu0 %v5456_v16 }
 0x520   : > { %5198 = vmatprep.subr.bf16.mxu0 %v5566_v22 }
 0x522   : > { %5175 = vmatmul.mubr.bf16.vlgmr.msra.gmra.mrb[80].mxu0 %v3613_v54 }
 0x523   : > { %5214 = vmatprep.mubr.msk.bf16.mxu0 %vm5567_vm9, %v5566_v22  ;;  %5199 = vmatpush3.bf16.msra.mxu0 %v5385_v18 }
 0x524   : > { %5200 = vmatprep.subr.bf16.mxu0 %v5566_v22 }
 0x527   : > { %5201 = vmatpush3.bf16.msra.mxu0 %v5386_v34 }
 0x528   : > { %5202 = vmatprep.subr.bf16.mxu0 %v5566_v22 }
 0x52b   : > { %5203 = vmatpush3.bf16.msra.mxu0 %v5387_v21 }
 0x52c   : > { %5204 = vmatprep.subr.bf16.mxu0 %v5566_v22 }
 0x52f   : > { %5205 = vmatpush3.bf16.msra.mxu0 %v5388_v3 }
 0x530   : > { %5206 = vmatprep.subr.bf16.mxu0 %v5566_v22 }
 0x533   : > { %5207 = vmatpush3.bf16.msra.mxu0 %v5389_v20 }
 0x534   : > { %5208 = vmatprep.subr.bf16.mxu0 %v5566_v22 }
 0x537   : > { %5209 = vmatpush3.bf16.msra.mxu0 %v5390_v26 }
 0x538   : > { %5210 = vmatprep.subr.bf16.mxu0 %v5566_v22 }
 0x539   : > { %v3702_v43 = vpop.f32.mrb[88].mxu1 }
 0x53a   : > { %v5196_v55 = vpop.f32.mrb[89].mxu1 }
 0x53b   : > { %v3705_v28 = vpop.f32.mrb[90].mxu1  ;;  %5211 = vmatpush3.bf16.msra.mxu0 %v5391_v11 }
 0x53c   : > { %v5197_v49 = vpop.f32.mrb[91].mxu1  ;;  %5212 = vmatprep.subr.bf16.mxu0 %v5566_v22 }
 0x53f   : > { %5213 = vmatpush3.bf16.msra.mxu0 %v5392_v37 }
 0x575   : > { %v3307_v30 = vpop.f32.mrb[64].mxu0 }
 0x576   : > { %v3313_v8 = vadd.f32 %v3307_v30, %v6715_v45  ;;  %v5016_v36 = vpop.f32.mrb[65].mxu0 }
 0x577   : > { %v3310_v48 = vpop.f32.mrb[66].mxu0 }
 0x578   : > { %v5017_v1 = vpop.f32.mrb[67].mxu0 }
 0x595   : > { %v3389_v27 = vpop.f32.mrb[68].mxu0 }
 0x596   : > { %v3390_v52 = vadd.f32 %v3389_v27, %v6798_v44  ;;  %v5056_v9 = vpop.f32.mrb[69].mxu0 }
 0x597   : > { %v3392_v58 = vpop.f32.mrb[70].mxu0 }
 0x598   : > { %v5057_v23 = vpop.f32.mrb[71].mxu0  ;;  %v3436_v63 = vadd.f32 %v6811_v7, %v3390_v52 }
 0x5b5   : > { %v3471_v45 = vpop.f32.mrb[72].mxu0 }
 0x5b6   : > { %v3477_v62 = vadd.f32 %v3471_v45, %v3436_v63  ;;  %v5096_v38 = vpop.f32.mrb[73].mxu0 }
 0x5b7   : > { %v3474_v14 = vpop.f32.mrb[74].mxu0 }
 0x5b8   : > { %v5097_v33 = vpop.f32.mrb[75].mxu0  ;;  %v3519_v25 = vadd.f32 %v6826_v2, %v3477_v62 }
 0x5d5   : > { %v3555_v10 = vpop.f32.mrb[76].mxu0 }
 0x5d6   : > { %v3561_v5 = vadd.f32 %v3555_v10, %v3519_v25  ;;  %v5136_v22 = vpop.f32.mrb[77].mxu0 }
 0x5d7   : > { %v3558_v41 = vpop.f32.mrb[78].mxu0 }
 0x5d8   : > { %v5137_v50 = vpop.f32.mrb[79].mxu0  ;;  %v3602_v44 = vadd.f32 %v6838_v59, %v3561_v5 }
 0x5f5   : > { %v3649_v12 = vpop.f32.mrb[80].mxu0 }
 0x5f6   : > { %v3655_v56 = vadd.f32 %v3649_v12, %v3602_v44  ;;  %v5176_v51 = vpop.f32.mrb[81].mxu0 }
 0x5f7   : > { %v3652_v0 = vpop.f32.mrb[82].mxu0 }
 0x5f8   : > { %v3708_v7 = vadd.f32 %v3702_v43, %v3655_v56  ;;  %v5177_v24 = vpop.f32.mrb[83].mxu0 }
 0x5fa   : > { %v3709_v35 = vadd.f32 %v5457_v46, %v3708_v7 }
 0x5fc   : > { %v3710_v2 = vmax.f32 %v3709_v35, 0.0 }
 0x5fe   : > { %v3711_v60 = vpack.c.bf16 %v3710_v2, %v3710_v2 }
 0x600   : > { %5215 = vmatmul.mubr.bf16.vlgmr.msra.gmra.mrb[84].mxu0 %v3711_v60 }
 0x6d3   : > { %v3811_v42 = vpop.f32.mrb[84].mxu0 }
 0x6d4   : > { %v3817_v15 = vadd.f32 %v3811_v42, %v3313_v8  ;;  %v5216_v17 = vpop.f32.mrb[85].mxu0 }
 0x6d5   : > { %v3814_v32 = vpop.f32.mrb[86].mxu0 }
 0x6d6   : > { %v3825_v39 = vadd.f32 %v4138_v13, %v3817_v15  ;;  %v5217_v6 = vpop.f32.mrb[87].mxu0 }
 0x6d8   : > { %3826 = vst [vmem:[%s361_s11] sm:$0xf] %v3825_v39 }
 0x6d9 PF: > { %s20_s27 = sadd.s32 1, %s5556_s27  }
 0x6da   : > { %p17_p13 = scmp.ge.s32.totalorder %s20_s27, 4  }
 0x6dc   :  { %19 = sbr.rel (!%p17_p13) target bundleno = 2 (0x2), region = 109 }
 0x6e3   :  { %3846 = vsyncpa [#allocation5], 1 }
 0x6e4   :  { %3848 = vsyncpa [#allocation5 + $0x1], 1 }
 0x6e5   :  { %3849 = vsyncpa [#allocation7], 1 }

</bundles_post_ra>
